<compile_context>
chip_gen: v5e
topology: v5e:2x2
jax: 0.10.0
libtpu: 0.0.40
codegen_flags: <defaults>
</compile_context>

<pallas_src>
import functools
import math

import jax
import jax.numpy as jnp
import numpy as np
from jax.experimental import pallas as pl
from jax.experimental.pallas import tpu as pltpu

LRELU_SLOPE = 0.2
IT_CPAD = 16                       # pad 3/6-channel image inputs to a bf16 tile
_VMEM_LIMIT = 64 * 1024 * 1024     # raise above the 32 MiB scoped default


def _lrelu(x):
    # max(x, a*x) == LeakyReLU(a) for 0 < a < 1: mul+max instead of cmp+mul+sel.
    return jnp.maximum(x, x * LRELU_SLOPE)


def _patches(slabs, *, Wp, Lw, lead):
    """Stack the 9 shifted 3x3-tap views of each bf16 slab along the
    contraction axis.  slabs: list of (Cin_k, Lext) bf16 arrays.
    Returns (sum_k 9*Cin_k, Lw) bf16, rows ordered (slab, ky, kx, ci)."""
    taps = []
    for xp in slabs:
        for dy in range(3):
            for dx in range(3):
                off = lead + (dy - 1) * Wp + (dx - 1)
                taps.append(xp[:, off:off + Lw])
    return jnp.concatenate(taps, axis=0)


def _store(ref, prefix, acc, maskb, *, lead, Lw):
    """Single unmasked, 128-aligned, lane-dense store.  Padded-grid border
    lanes (and the Lw-Lp alignment lanes) are zeroed via select so they act as
    the next conv's zero padding.  Keep the select (margins may hold NaN)."""
    val = jnp.where(maskb, acc, 0.0).astype(ref.dtype)
    ref[prefix + (slice(None), slice(lead, lead + Lw))] = val


# ----------------------------------------------------------------------------
# Fused kernels.
# ----------------------------------------------------------------------------
def _convc_kernel(it_ref, ht_ref, w_ref, b_ref, mask_ref, o_ref,
                  *, Wp, Lw, lead):
    """Successor stage: inp[i] = lrelu(conv3x3(cat([it_i, ht_i]))).
    it|ht contributions fused into ONE deep GEMM per branch."""
    maskb = mask_ref[...] > 0.5
    for i in range(3):
        patch = _patches([it_ref[0, i], ht_ref[0, i]], Wp=Wp, Lw=Lw, lead=lead)
        acc = jnp.dot(w_ref[i], patch,
                      preferred_element_type=jnp.float32) + b_ref[i]
        _store(o_ref, (0, i), _lrelu(acc), maskb, lead=lead, Lw=Lw)


def _precursor_kernel(itc_ref, itsup_ref, htp_ref, wc_ref, bc_ref, ws_ref,
                      bs_ref, mask_ref, o_ref, *, Wp, Lw, lead):
    maskb = mask_ref[...] > 0.5
    hc = _lrelu(jnp.dot(wc_ref[...],
                        _patches([itc_ref[0]], Wp=Wp, Lw=Lw, lead=lead),
                        preferred_element_type=jnp.float32) + bc_ref[...])
    hs = _lrelu(jnp.dot(ws_ref[...],
                        _patches([itsup_ref[0]], Wp=Wp, Lw=Lw, lead=lead),
                        preferred_element_type=jnp.float32) + bs_ref[...])
    _store(o_ref, (0, 0), hc, maskb, lead=lead, Lw=Lw)
    _store(o_ref, (0, 1), hs, maskb, lead=lead, Lw=Lw)
    # TODO(synk): avoid this passthrough copy via input_output_aliases.
    o_ref[0, 2, :, :] = htp_ref[0]


def _pfrb_kernel(x_ref, w0_ref, b0_ref, w1_ref, b1_ref, w2b_ref, w2x_ref,
                 b2_ref, mask_ref, o_ref, x1_ref, bpad_ref,
                 *, Wp, Lw, lead, bf):
    """Whole PFRB (conv0 x3 -> conv1 -> conv2 x3 -> residual) in one kernel;
    intermediates stay in bf16 VMEM scratch."""
    maskb = mask_ref[...] > 0.5
    # conv0 per branch (+ LeakyReLU) -> padded-flat bf16 scratch.
    for i in range(3):
        a = _lrelu(jnp.dot(w0_ref[i],
                           _patches([x_ref[0, i]], Wp=Wp, Lw=Lw, lead=lead),
                           preferred_element_type=jnp.float32) + b0_ref[i])
        _store(x1_ref, (i,), a, maskb, lead=lead, Lw=Lw)
    # 1x1 conv over the 3-branch concat: one (bf, 3*bf) @ (3*bf, Lw) GEMM.
    merge = jnp.concatenate(
        [x1_ref[i, :, lead:lead + Lw] for i in range(3)], axis=0)
    base = _lrelu(jnp.dot(w1_ref[...], merge,
                          preferred_element_type=jnp.float32) + b1_ref[...])
    _store(bpad_ref, (), base, maskb, lead=lead, Lw=Lw)
    # conv2: base contribution = ONE (3*bf, 9*bf) GEMM over a single patch
    # (patch extracted once, weights for the 3 branches stacked -> M=96).
    bpatch = _patches([bpad_ref[...]], Wp=Wp, Lw=Lw, lead=lead)
    base_c = jnp.dot(w2b_ref[...], bpatch, preferred_element_type=jnp.float32)
    for i in range(3):
        acc = base_c[i * bf:(i + 1) * bf] + b2_ref[i] + jnp.dot(
            w2x_ref[i], _patches([x1_ref[i]], Wp=Wp, Lw=Lw, lead=lead),
            preferred_element_type=jnp.float32)
        out = x_ref[0, i, :, lead:lead + Lw] + _lrelu(acc)    # residual (f32)
        _store(o_ref, (0, i), out, maskb, lead=lead, Lw=Lw)


def _merge_up_kernel(x_ref, wm_ref, bm_ref, wu_ref, bu_ref, mask_ref,
                     ht_ref, sr_ref, hpad_ref, *, Wp, Lw, lead):
    """merge conv (3*bf -> bf) as ONE 27*bf-deep GEMM + upscale conv
    (bf -> 48), fused; ht never leaves VMEM between the two convs."""
    maskb = mask_ref[...] > 0.5
    patch = _patches([x_ref[0, 0], x_ref[0, 1], x_ref[0, 2]],
                     Wp=Wp, Lw=Lw, lead=lead)
    ht = jnp.dot(wm_ref[...], patch,
                 preferred_element_type=jnp.float32) + bm_ref[...]
    ht = jnp.where(maskb, ht, 0.0)
    ht_ref[0, :, :] = ht.astype(ht_ref.dtype)
    hpad_ref[:, lead:lead + Lw] = ht.astype(hpad_ref.dtype)
    sr = jnp.dot(wu_ref[...],
                 _patches([hpad_ref[...]], Wp=Wp, Lw=Lw, lead=lead),
                 preferred_element_type=jnp.float32) + bu_ref[...]
    sr_ref[0, :, :] = jnp.where(maskb, sr, 0.0).astype(sr_ref.dtype)


# ----------------------------------------------------------------------------
# BlockSpec helpers and pallas_call wrappers (grid = (batch,), "parallel").
# ----------------------------------------------------------------------------
def _batch_spec(shape):
    nrest = len(shape) - 1
    return pl.BlockSpec((1,) + tuple(shape[1:]),
                        lambda n, _r=nrest: (n,) + (0,) * _r)


def _full_spec(shape):
    nd = len(shape)
    return pl.BlockSpec(tuple(shape), lambda n, _nd=nd: (0,) * _nd)


def _cparams():
    return pltpu.CompilerParams(dimension_semantics=("parallel",),
                                vmem_limit_bytes=_VMEM_LIMIT)


def _convc_call(it_pf, ht_pf, w, b, mask, *, bf, Wp, Lw, lead, Lext):
    B = it_pf.shape[0]
    kernel = functools.partial(_convc_kernel, Wp=Wp, Lw=Lw, lead=lead)
    return pl.pallas_call(
        kernel,
        out_shape=jax.ShapeDtypeStruct((B, 3, bf, Lext), jnp.bfloat16),
        grid=(B,),
        in_specs=[_batch_spec(it_pf.shape), _batch_spec(ht_pf.shape),
                  _full_spec(w.shape), _full_spec(b.shape),
                  _full_spec(mask.shape)],
        out_specs=_batch_spec((B, 3, bf, Lext)),
        compiler_params=_cparams(),
    )(it_pf, ht_pf, w, b, mask)


def _precursor_call(itc, itsup, htp, wc, bc, ws, bs, mask,
                    *, bf, Wp, Lw, lead, Lext):
    B = itc.shape[0]
    kernel = functools.partial(_precursor_kernel, Wp=Wp, Lw=Lw, lead=lead)
    return pl.pallas_call(
        kernel,
        out_shape=jax.ShapeDtypeStruct((B, 3, bf, Lext), jnp.bfloat16),
        grid=(B,),
        in_specs=[_batch_spec(itc.shape), _batch_spec(itsup.shape),
                  _batch_spec(htp.shape)]
                 + [_full_spec(a.shape) for a in (wc, bc, ws, bs, mask)],
        out_specs=_batch_spec((B, 3, bf, Lext)),
        compiler_params=_cparams(),
    )(itc, itsup, htp, wc, bc, ws, bs, mask)


def _pfrb_call(x, w0, b0, w1, b1, w2b, w2x, b2, mask,
               *, bf, Wp, Lw, lead, Lext):
    B = x.shape[0]
    kernel = functools.partial(_pfrb_kernel, Wp=Wp, Lw=Lw, lead=lead, bf=bf)
    return pl.pallas_call(
        kernel,
        out_shape=jax.ShapeDtypeStruct((B, 3, bf, Lext), jnp.bfloat16),
        grid=(B,),
        in_specs=[_batch_spec(x.shape)]
                 + [_full_spec(a.shape) for a in
                    (w0, b0, w1, b1, w2b, w2x, b2, mask)],
        out_specs=_batch_spec((B, 3, bf, Lext)),
        scratch_shapes=[pltpu.VMEM((3, bf, Lext), jnp.bfloat16),
                        pltpu.VMEM((bf, Lext), jnp.bfloat16)],
        compiler_params=_cparams(),
    )(x, w0, b0, w1, b1, w2b, w2x, b2, mask)


def _merge_up_call(x, wm, bm, wu, bu, mask, *, bf, Wp, Lw, lead, Lext):
    B = x.shape[0]
    kernel = functools.partial(_merge_up_kernel, Wp=Wp, Lw=Lw, lead=lead)
    return pl.pallas_call(
        kernel,
        out_shape=(jax.ShapeDtypeStruct((B, bf, Lw), jnp.bfloat16),
                   jax.ShapeDtypeStruct((B, 48, Lw), jnp.float32)),
        grid=(B,),
        in_specs=[_batch_spec(x.shape)]
                 + [_full_spec(a.shape) for a in (wm, bm, wu, bu, mask)],
        out_specs=(_batch_spec((B, bf, Lw)), _batch_spec((B, 48, Lw))),
        scratch_shapes=[pltpu.VMEM((bf, Lext), jnp.bfloat16)],
        compiler_params=_cparams(),
    )(x, wm, bm, wu, bu, mask)


# ----------------------------------------------------------------------------
# Host-side layout plumbing: padded-flat packing, one-time weight repacking,
# pixel shuffle.
# ----------------------------------------------------------------------------
def _to_flatpad(x_nchw, *, lead, Lext, c_to=None):
    """(B, C, H, W) f32 -> (B, C', Lext) bf16 padded-flat (zeroed margins)."""
    B, C, H, W = x_nchw.shape
    if c_to is not None and c_to > C:
        x_nchw = jnp.pad(x_nchw, ((0, 0), (0, c_to - C), (0, 0), (0, 0)))
        C = c_to
    xp = jnp.pad(x_nchw, ((0, 0), (0, 0), (1, 1), (1, 1)))
    Lp = (H + 2) * (W + 2)
    xf = xp.reshape(B, C, Lp)
    xf = jnp.pad(xf, ((0, 0), (0, 0), (lead, Lext - lead - Lp)))
    return xf.astype(jnp.bfloat16)


def _w_deep(w_oihw, cin_to=None):
    """Torch OIHW conv weight -> (Cout, 9*Cin) bf16 slab (tap-major ky,kx,ci)."""
    Cout, Cin, K, _ = w_oihw.shape
    if cin_to is not None and cin_to > Cin:
        w_oihw = jnp.pad(w_oihw, ((0, 0), (0, cin_to - Cin), (0, 0), (0, 0)))
        Cin = cin_to
    return jnp.transpose(w_oihw, (0, 2, 3, 1)).reshape(
        Cout, K * K * Cin).astype(jnp.bfloat16)


def _bias_col(b):
    return jnp.asarray(b, jnp.float32).reshape(-1, 1)


def pack_params(params, kind='successor'):
    """One-time weight repacking into deep-GEMM bf16 slabs (hoisted out of the
    per-frame forward pass)."""
    bf = params['merge']['w'].shape[0]
    pk = {'bf': bf, 'kind': kind}
    if kind == 'precursor':
        pk['wc'] = _w_deep(params['conv_c']['w'], cin_to=IT_CPAD)
        pk['bc'] = _bias_col(params['conv_c']['b'])
        pk['ws'] = _w_deep(params['conv_sup']['w'], cin_to=IT_CPAD)
        pk['bs'] = _bias_col(params['conv_sup']['b'])
    else:
        pk['wc'] = jnp.stack([
            jnp.concatenate([_w_deep(p['w'][:, :3], cin_to=IT_CPAD),
                             _w_deep(p['w'][:, 3:])], axis=1)
            for p in params['conv_c']])
        pk['bc'] = jnp.stack([_bias_col(p['b']) for p in params['conv_c']])
    blocks = []
    for bp in params['blocks']:
        blocks.append(dict(
            w0=jnp.stack([_w_deep(p['w']) for p in bp['conv0']]),
            b0=jnp.stack([_bias_col(p['b']) for p in bp['conv0']]),
            w1=bp['conv1']['w'].reshape(bf, 3 * bf).astype(jnp.bfloat16),
            b1=_bias_col(bp['conv1']['b']),
            w2b=jnp.concatenate([_w_deep(p['w'][:, :bf]) for p in bp['conv2']],
                                axis=0),
            w2x=jnp.stack([_w_deep(p['w'][:, bf:]) for p in bp['conv2']]),
            b2=jnp.stack([_bias_col(p['b']) for p in bp['conv2']]),
        ))
    pk['blocks'] = blocks
    pk['wm'] = jnp.concatenate(
        [_w_deep(params['merge']['w'][:, i * bf:(i + 1) * bf])
         for i in range(3)], axis=1)
    pk['bm'] = _bias_col(params['merge']['b'])
    pk['wu'] = _w_deep(params['upscale']['w'])
    pk['bu'] = _bias_col(params['upscale']['b'])
    return pk


def unit_forward(packed, it, ht_past, ht_now=None, ht_future=None):
    """it: (B, 3, T, H, W) f32; ht_*: (B, bf, H, W) f32.
    Returns (it_sr (B,3,4H,4W), ht (B,bf,H,W)), f32 NCHW."""
    B, C, T, H, W = it.shape
    bf = packed['bf']
    kind = packed['kind']
    Hp, Wp = H + 2, W + 2
    Lp = Hp * Wp
    lead = ((Wp + 1 + 127) // 128) * 128        # 128-aligned left margin
    Lw = ((Lp + 127) // 128) * 128              # 128-aligned stored/GEMM width
    Lext = lead + Lw + Wp + 1                   # + readable tail for +1 taps

    pp = np.arange(Lw)
    hpi, wpi = pp // Wp, pp % Wp
    valid = (pp < Lp) & (hpi >= 1) & (hpi <= H) & (wpi >= 1) & (wpi <= W)
    mask = jnp.asarray(valid.astype(np.float32).reshape(1, Lw))

    flat = functools.partial(_to_flatpad, lead=lead, Lext=Lext)
    dims = dict(bf=bf, Wp=Wp, Lw=Lw, lead=lead, Lext=Lext)

    if kind == 'precursor':
        itc = flat(it[:, :, T // 2], c_to=IT_CPAD)
        idx = [i for i in range(T) if i != T // 2]
        itsup = flat(it[:, :, idx].reshape(B, C * (T - 1), H, W), c_to=IT_CPAD)
        htp = flat(ht_past)
        inp = _precursor_call(itc, itsup, htp, packed['wc'], packed['bc'],
                              packed['ws'], packed['bs'], mask, **dims)
    else:  # 'successor' (module default)
        it_pf = jnp.stack([flat(it[:, :, i], c_to=IT_CPAD) for i in range(3)],
                          axis=1)
        ht_pf = jnp.stack([flat(h) for h in (ht_past, ht_now, ht_future)],
                          axis=1)
        inp = _convc_call(it_pf, ht_pf, packed['wc'], packed['bc'], mask, **dims)

    for blk in packed['blocks']:
        inp = _pfrb_call(inp, blk['w0'], blk['b0'], blk['w1'], blk['b1'],
                         blk['w2b'], blk['w2x'], blk['b2'], mask, **dims)

    ht_flat, sr_flat = _merge_up_call(inp, packed['wm'], packed['bm'],
                                      packed['wu'], packed['bu'], mask, **dims)

    ht_out = ht_flat[:, :, :Lp].reshape(B, bf, Hp, Wp)[:, :, 1:H + 1, 1:W + 1]
    sr48 = sr_flat[:, :, :Lp].reshape(B, 48, Hp, Wp)[:, :, 1:H + 1, 1:W + 1]
    r = 4
    it_sr = sr48.reshape(B, 3, r, r, H, W).transpose(0, 1, 4, 2, 5, 3) \
                .reshape(B, 3, H * r, W * r)
    return it_sr, ht_out.astype(jnp.float32)


# ----------------------------------------------------------------------------
# Deterministic synthetic parameters (shapes follow the nn.Module __init__;
# conv weights stored torch-style OIHW).
# ----------------------------------------------------------------------------
def init_params(key, bf, nf, num_b, kind):
    keys = iter(jax.random.split(key, 128))

    def conv_p(cin, cout, k):
        kw, kb = jax.random.split(next(keys))
        fan = k * k * cin
        w = jax.random.normal(kw, (cout, cin, k, k), jnp.float32) / math.sqrt(fan)
        b = jax.random.normal(kb, (cout,), jnp.float32) * 0.1
        return {'w': w, 'b': b}

    params = {}
    if kind == 'precursor':
        params['conv_c'] = conv_p(3, bf, 3)
        params['conv_sup'] = conv_p(3 * (nf - 1), bf, 3)
    else:
        params['conv_c'] = [conv_p(3 + bf, bf, 3) for _ in range(nf)]
    params['blocks'] = [{
        'conv0': [conv_p(bf, bf, 3) for _ in range(3)],
        'conv1': conv_p(3 * bf, bf, 1),
        'conv2': [conv_p(2 * bf, bf, 3) for _ in range(3)],
    } for _ in range(num_b)]
    params['merge'] = conv_p(3 * bf, bf, 3)
    params['upscale'] = conv_p(bf, 48, 3)   # UPSCALE: conv(bf->48) + PixelShuffle(4)
    return params


if __name__ == "__main__":
    B, H, W = 2, 16, 16
    bf, nf, num_b = 32, 3, 2          # small but structure-preserving config
    kind = 'successor'                # module default

    key = jax.random.PRNGKey(0)
    k1, k2, k3, k4, k5 = jax.random.split(key, 5)
    it = jax.random.normal(k1, (B, 3, nf, H, W), jnp.float32)
    ht_past = jax.random.normal(k2, (B, bf, H, W), jnp.float32)
    ht_now = jax.random.normal(k3, (B, bf, H, W), jnp.float32)
    ht_future = jax.random.normal(k4, (B, bf, H, W), jnp.float32)

    params = init_params(k5, bf, nf, num_b, kind)
    packed = pack_params(params, kind)          # one-time weight prepack

    it_sr, ht = unit_forward(packed, it, ht_past, ht_now, ht_future)
    it_sr, ht = jax.block_until_ready((it_sr, ht))

    assert it_sr.shape == (B, 3, H * 4, W * 4), it_sr.shape
    assert ht.shape == (B, bf, H, W), ht.shape
    assert np.all(np.isfinite(np.asarray(it_sr, dtype=np.float32)))
    assert np.all(np.isfinite(np.asarray(ht, dtype=np.float32)))
    print("KERNEL_OK")
</pallas_src>

<mosaic_0001>
module attributes {stable_mosaic.version = 11 : i64} {
  func.func @_convc_kernel(%arg0: i32, %arg1: memref<1x3x16x531xbf16, #tpu.memory_space<vmem>>, %arg2: memref<1x3x32x531xbf16, #tpu.memory_space<vmem>>, %arg3: memref<3x32x432xbf16, #tpu.memory_space<vmem>>, %arg4: memref<3x32x1xf32, #tpu.memory_space<vmem>>, %arg5: memref<1x384xf32, #tpu.memory_space<vmem>>, %arg6: memref<1x3x32x531xbf16, #tpu.memory_space<vmem>>) attributes {dimension_semantics = [#tpu.dimension_semantics<parallel>], iteration_bounds = array<i64: 2>, scalar_prefetch = 0 : i64, scratch_operands = 0 : i64, tpu.core_type = #tpu.core_type<tc>, window_params = [{transform_indices = @transform_0, window_bounds = array<i64: 1, 3, 16, 531>}, {transform_indices = @transform_1, window_bounds = array<i64: 1, 3, 32, 531>}, {pipeline_mode = #tpu.pipeline_mode<synchronous>, transform_indices = @transform_2, window_bounds = array<i64: 3, 32, 432>}, {pipeline_mode = #tpu.pipeline_mode<synchronous>, transform_indices = @transform_3, window_bounds = array<i64: 3, 32, 1>}, {pipeline_mode = #tpu.pipeline_mode<synchronous>, transform_indices = @transform_4, window_bounds = array<i64: 1, 384>}, {transform_indices = @transform_5, window_bounds = array<i64: 1, 3, 32, 531>}]} {
    %c0 = arith.constant 0 : index
    %c0_0 = arith.constant 0 : index
    %0 = vector.load %arg5[%c0, %c0_0] : memref<1x384xf32, #tpu.memory_space<vmem>>, vector<1x384xf32>
    %cst = arith.constant 5.000000e-01 : f32
    %1 = vector.broadcast %cst : f32 to vector<1x384xf32>
    %2 = arith.cmpf ogt, %0, %1 : vector<1x384xf32>
    %c0_1 = arith.constant 0 : index
    %c0_2 = arith.constant 0 : index
    %c0_3 = arith.constant 0 : index
    %c0_4 = arith.constant 0 : index
    %3 = vector.load %arg1[%c0_1, %c0_2, %c0_3, %c0_4] : memref<1x3x16x531xbf16, #tpu.memory_space<vmem>>, vector<1x1x16x531xbf16>
    %4 = vector.shape_cast %3 : vector<1x1x16x531xbf16> to vector<16x531xbf16>
    %c0_5 = arith.constant 0 : index
    %c0_6 = arith.constant 0 : index
    %c0_7 = arith.constant 0 : index
    %c0_8 = arith.constant 0 : index
    %5 = vector.load %arg2[%c0_5, %c0_6, %c0_7, %c0_8] : memref<1x3x32x531xbf16, #tpu.memory_space<vmem>>, vector<1x1x32x531xbf16>
    %6 = vector.shape_cast %5 : vector<1x1x32x531xbf16> to vector<32x531xbf16>
    %7 = vector.extract_strided_slice %4 {offsets = [0, 109], sizes = [16, 384], strides = [1, 1]} : vector<16x531xbf16> to vector<16x384xbf16>
    %8 = vector.extract_strided_slice %4 {offsets = [0, 110], sizes = [16, 384], strides = [1, 1]} : vector<16x531xbf16> to vector<16x384xbf16>
    %9 = vector.extract_strided_slice %4 {offsets = [0, 111], sizes = [16, 384], strides = [1, 1]} : vector<16x531xbf16> to vector<16x384xbf16>
    %10 = vector.extract_strided_slice %4 {offsets = [0, 127], sizes = [16, 384], strides = [1, 1]} : vector<16x531xbf16> to vector<16x384xbf16>
    %11 = vector.extract_strided_slice %4 {offsets = [0, 128], sizes = [16, 384], strides = [1, 1]} : vector<16x531xbf16> to vector<16x384xbf16>
    %12 = vector.extract_strided_slice %4 {offsets = [0, 129], sizes = [16, 384], strides = [1, 1]} : vector<16x531xbf16> to vector<16x384xbf16>
    %13 = vector.extract_strided_slice %4 {offsets = [0, 145], sizes = [16, 384], strides = [1, 1]} : vector<16x531xbf16> to vector<16x384xbf16>
    %14 = vector.extract_strided_slice %4 {offsets = [0, 146], sizes = [16, 384], strides = [1, 1]} : vector<16x531xbf16> to vector<16x384xbf16>
    %15 = vector.extract_strided_slice %4 {offsets = [0, 147], sizes = [16, 384], strides = [1, 1]} : vector<16x531xbf16> to vector<16x384xbf16>
    %16 = vector.extract_strided_slice %6 {offsets = [0, 109], sizes = [32, 384], strides = [1, 1]} : vector<32x531xbf16> to vector<32x384xbf16>
    %17 = vector.extract_strided_slice %6 {offsets = [0, 110], sizes = [32, 384], strides = [1, 1]} : vector<32x531xbf16> to vector<32x384xbf16>
    %18 = vector.extract_strided_slice %6 {offsets = [0, 111], sizes = [32, 384], strides = [1, 1]} : vector<32x531xbf16> to vector<32x384xbf16>
    %19 = vector.extract_strided_slice %6 {offsets = [0, 127], sizes = [32, 384], strides = [1, 1]} : vector<32x531xbf16> to vector<32x384xbf16>
    %20 = vector.extract_strided_slice %6 {offsets = [0, 128], sizes = [32, 384], strides = [1, 1]} : vector<32x531xbf16> to vector<32x384xbf16>
    %21 = vector.extract_strided_slice %6 {offsets = [0, 129], sizes = [32, 384], strides = [1, 1]} : vector<32x531xbf16> to vector<32x384xbf16>
    %22 = vector.extract_strided_slice %6 {offsets = [0, 145], sizes = [32, 384], strides = [1, 1]} : vector<32x531xbf16> to vector<32x384xbf16>
    %23 = vector.extract_strided_slice %6 {offsets = [0, 146], sizes = [32, 384], strides = [1, 1]} : vector<32x531xbf16> to vector<32x384xbf16>
    %24 = vector.extract_strided_slice %6 {offsets = [0, 147], sizes = [32, 384], strides = [1, 1]} : vector<32x531xbf16> to vector<32x384xbf16>
    %25 = tpu.concatenate %7, %8, %9, %10, %11, %12, %13, %14, %15, %16, %17, %18, %19, %20, %21, %22 in 0 : vector<16x384xbf16>, vector<16x384xbf16>, vector<16x384xbf16>, vector<16x384xbf16>, vector<16x384xbf16>, vector<16x384xbf16>, vector<16x384xbf16>, vector<16x384xbf16>, vector<16x384xbf16>, vector<32x384xbf16>, vector<32x384xbf16>, vector<32x384xbf16>, vector<32x384xbf16>, vector<32x384xbf16>, vector<32x384xbf16>, vector<32x384xbf16> -> vector<368x384xbf16>
    %26 = tpu.concatenate %23, %24 in 0 : vector<32x384xbf16>, vector<32x384xbf16> -> vector<64x384xbf16>
    %27 = tpu.concatenate %25, %26 in 0 : vector<368x384xbf16>, vector<64x384xbf16> -> vector<432x384xbf16>
    %c0_9 = arith.constant 0 : index
    %c0_10 = arith.constant 0 : index
    %c0_11 = arith.constant 0 : index
    %28 = vector.load %arg3[%c0_9, %c0_10, %c0_11] : memref<3x32x432xbf16, #tpu.memory_space<vmem>>, vector<1x32x432xbf16>
    %29 = vector.shape_cast %28 : vector<1x32x432xbf16> to vector<32x432xbf16>
    %cst_12 = arith.constant dense<0.000000e+00> : vector<32x384xf32>
    %30 = tpu.matmul %29, %27, %cst_12 {dimension_numbers = #tpu.dot_dimension_numbers<[1], [0], [0], [1], [0, 0, 1, 1], [], []>} : vector<32x432xbf16>, vector<432x384xbf16>, vector<32x384xf32> -> vector<32x384xf32>
    %c0_13 = arith.constant 0 : index
    %c0_14 = arith.constant 0 : index
    %c0_15 = arith.constant 0 : index
    %31 = vector.load %arg4[%c0_13, %c0_14, %c0_15] : memref<3x32x1xf32, #tpu.memory_space<vmem>>, vector<1x32x1xf32>
    %32 = vector.shape_cast %31 : vector<1x32x1xf32> to vector<32x1xf32>
    %33 = vector.broadcast %32 : vector<32x1xf32> to vector<32x384xf32>
    %34 = arith.addf %30, %33 : vector<32x384xf32>
    %cst_16 = arith.constant 2.000000e-01 : f32
    %35 = vector.broadcast %cst_16 : f32 to vector<32x384xf32>
    %36 = arith.mulf %34, %35 : vector<32x384xf32>
    %37 = arith.maximumf %34, %36 : vector<32x384xf32>
    %cst_17 = arith.constant 0.000000e+00 : f32
    %38 = vector.shape_cast %2 : vector<1x384xi1> to vector<1x384xi1>
    %39 = vector.broadcast %38 : vector<1x384xi1> to vector<32x384xi1>
    %40 = vector.broadcast %cst_17 : f32 to vector<32x384xf32>
    %41 = arith.select %39, %37, %40 : vector<32x384xi1>, vector<32x384xf32>
    %42 = arith.truncf %41 : vector<32x384xf32> to vector<32x384xbf16>
    %c0_18 = arith.constant 0 : index
    %c0_19 = arith.constant 0 : index
    %c0_20 = arith.constant 0 : index
    %c128 = arith.constant 128 : index
    %43 = vector.load %arg6[%c0_18, %c0_19, %c0_20, %c128] : memref<1x3x32x531xbf16, #tpu.memory_space<vmem>>, vector<1x1x32x384xbf16>
    %44 = vector.shape_cast %43 : vector<1x1x32x384xbf16> to vector<32x384xbf16>
    %45 = vector.shape_cast %42 : vector<32x384xbf16> to vector<1x1x32x384xbf16>
    tpu.vector_store %arg6[%c0_18, %c0_19, %c0_20, %c128], %45 {strides = array<i32>} : memref<1x3x32x531xbf16, #tpu.memory_space<vmem>>, vector<1x1x32x384xbf16>,
    %c0_21 = arith.constant 0 : index
    %c1 = arith.constant 1 : index
    %c0_22 = arith.constant 0 : index
    %c0_23 = arith.constant 0 : index
    %46 = vector.load %arg1[%c0_21, %c1, %c0_22, %c0_23] : memref<1x3x16x531xbf16, #tpu.memory_space<vmem>>, vector<1x1x16x531xbf16>
    %47 = vector.shape_cast %46 : vector<1x1x16x531xbf16> to vector<16x531xbf16>
    %c0_24 = arith.constant 0 : index
    %c1_25 = arith.constant 1 : index
    %c0_26 = arith.constant 0 : index
    %c0_27 = arith.constant 0 : index
    %48 = vector.load %arg2[%c0_24, %c1_25, %c0_26, %c0_27] : memref<1x3x32x531xbf16, #tpu.memory_space<vmem>>, vector<1x1x32x531xbf16>
    %49 = vector.shape_cast %48 : vector<1x1x32x531xbf16> to vector<32x531xbf16>
    %50 = vector.extract_strided_slice %47 {offsets = [0, 109], sizes = [16, 384], strides = [1, 1]} : vector<16x531xbf16> to vector<16x384xbf16>
    %51 = vector.extract_strided_slice %47 {offsets = [0, 110], sizes = [16, 384], strides = [1, 1]} : vector<16x531xbf16> to vector<16x384xbf16>
    %52 = vector.extract_strided_slice %47 {offsets = [0, 111], sizes = [16, 384], strides = [1, 1]} : vector<16x531xbf16> to vector<16x384xbf16>
    %53 = vector.extract_strided_slice %47 {offsets = [0, 127], sizes = [16, 384], strides = [1, 1]} : vector<16x531xbf16> to vector<16x384xbf16>
    %54 = vector.extract_strided_slice %47 {offsets = [0, 128], sizes = [16, 384], strides = [1, 1]} : vector<16x531xbf16> to vector<16x384xbf16>
    %55 = vector.extract_strided_slice %47 {offsets = [0, 129], sizes = [16, 384], strides = [1, 1]} : vector<16x531xbf16> to vector<16x384xbf16>
    %56 = vector.extract_strided_slice %47 {offsets = [0, 145], sizes = [16, 384], strides = [1, 1]} : vector<16x531xbf16> to vector<16x384xbf16>
    %57 = vector.extract_strided_slice %47 {offsets = [0, 146], sizes = [16, 384], strides = [1, 1]} : vector<16x531xbf16> to vector<16x384xbf16>
    %58 = vector.extract_strided_slice %47 {offsets = [0, 147], sizes = [16, 384], strides = [1, 1]} : vector<16x531xbf16> to vector<16x384xbf16>
    %59 = vector.extract_strided_slice %49 {offsets = [0, 109], sizes = [32, 384], strides = [1, 1]} : vector<32x531xbf16> to vector<32x384xbf16>
    %60 = vector.extract_strided_slice %49 {offsets = [0, 110], sizes = [32, 384], strides = [1, 1]} : vector<32x531xbf16> to vector<32x384xbf16>
    %61 = vector.extract_strided_slice %49 {offsets = [0, 111], sizes = [32, 384], strides = [1, 1]} : vector<32x531xbf16> to vector<32x384xbf16>
    %62 = vector.extract_strided_slice %49 {offsets = [0, 127], sizes = [32, 384], strides = [1, 1]} : vector<32x531xbf16> to vector<32x384xbf16>
    %63 = vector.extract_strided_slice %49 {offsets = [0, 128], sizes = [32, 384], strides = [1, 1]} : vector<32x531xbf16> to vector<32x384xbf16>
    %64 = vector.extract_strided_slice %49 {offsets = [0, 129], sizes = [32, 384], strides = [1, 1]} : vector<32x531xbf16> to vector<32x384xbf16>
    %65 = vector.extract_strided_slice %49 {offsets = [0, 145], sizes = [32, 384], strides = [1, 1]} : vector<32x531xbf16> to vector<32x384xbf16>
    %66 = vector.extract_strided_slice %49 {offsets = [0, 146], sizes = [32, 384], strides = [1, 1]} : vector<32x531xbf16> to vector<32x384xbf16>
    %67 = vector.extract_strided_slice %49 {offsets = [0, 147], sizes = [32, 384], strides = [1, 1]} : vector<32x531xbf16> to vector<32x384xbf16>
    %68 = tpu.concatenate %50, %51, %52, %53, %54, %55, %56, %57, %58, %59, %60, %61, %62, %63, %64, %65 in 0 : vector<16x384xbf16>, vector<16x384xbf16>, vector<16x384xbf16>, vector<16x384xbf16>, vector<16x384xbf16>, vector<16x384xbf16>, vector<16x384xbf16>, vector<16x384xbf16>, vector<16x384xbf16>, vector<32x384xbf16>, vector<32x384xbf16>, vector<32x384xbf16>, vector<32x384xbf16>, vector<32x384xbf16>, vector<32x384xbf16>, vector<32x384xbf16> -> vector<368x384xbf16>
    %69 = tpu.concatenate %66, %67 in 0 : vector<32x384xbf16>, vector<32x384xbf16> -> vector<64x384xbf16>
    %70 = tpu.concatenate %68, %69 in 0 : vector<368x384xbf16>, vector<64x384xbf16> -> vector<432x384xbf16>
    %c1_28 = arith.constant 1 : index
    %c0_29 = arith.constant 0 : index
    %c0_30 = arith.constant 0 : index
    %71 = vector.load %arg3[%c1_28, %c0_29, %c0_30] : memref<3x32x432xbf16, #tpu.memory_space<vmem>>, vector<1x32x432xbf16>
    %72 = vector.shape_cast %71 : vector<1x32x432xbf16> to vector<32x432xbf16>
    %cst_31 = arith.constant dense<0.000000e+00> : vector<32x384xf32>
    %73 = tpu.matmul %72, %70, %cst_31 {dimension_numbers = #tpu.dot_dimension_numbers<[1], [0], [0], [1], [0, 0, 1, 1], [], []>} : vector<32x432xbf16>, vector<432x384xbf16>, vector<32x384xf32> -> vector<32x384xf32>
    %c1_32 = arith.constant 1 : index
    %c0_33 = arith.constant 0 : index
    %c0_34 = arith.constant 0 : index
    %74 = vector.load %arg4[%c1_32, %c0_33, %c0_34] : memref<3x32x1xf32, #tpu.memory_space<vmem>>, vector<1x32x1xf32>
    %75 = vector.shape_cast %74 : vector<1x32x1xf32> to vector<32x1xf32>
    %76 = vector.broadcast %75 : vector<32x1xf32> to vector<32x384xf32>
    %77 = arith.addf %73, %76 : vector<32x384xf32>
    %cst_35 = arith.constant 2.000000e-01 : f32
    %78 = vector.broadcast %cst_35 : f32 to vector<32x384xf32>
    %79 = arith.mulf %77, %78 : vector<32x384xf32>
    %80 = arith.maximumf %77, %79 : vector<32x384xf32>
    %cst_36 = arith.constant 0.000000e+00 : f32
    %81 = vector.shape_cast %2 : vector<1x384xi1> to vector<1x384xi1>
    %82 = vector.broadcast %81 : vector<1x384xi1> to vector<32x384xi1>
    %83 = vector.broadcast %cst_36 : f32 to vector<32x384xf32>
    %84 = arith.select %82, %80, %83 : vector<32x384xi1>, vector<32x384xf32>
    %85 = arith.truncf %84 : vector<32x384xf32> to vector<32x384xbf16>
    %c0_37 = arith.constant 0 : index
    %c1_38 = arith.constant 1 : index
    %c0_39 = arith.constant 0 : index
    %c128_40 = arith.constant 128 : index
    %86 = vector.load %arg6[%c0_37, %c1_38, %c0_39, %c128_40] : memref<1x3x32x531xbf16, #tpu.memory_space<vmem>>, vector<1x1x32x384xbf16>
    %87 = vector.shape_cast %86 : vector<1x1x32x384xbf16> to vector<32x384xbf16>
    %88 = vector.shape_cast %85 : vector<32x384xbf16> to vector<1x1x32x384xbf16>
    tpu.vector_store %arg6[%c0_37, %c1_38, %c0_39, %c128_40], %88 {strides = array<i32>} : memref<1x3x32x531xbf16, #tpu.memory_space<vmem>>, vector<1x1x32x384xbf16>,
    %c0_41 = arith.constant 0 : index
    %c2 = arith.constant 2 : index
    %c0_42 = arith.constant 0 : index
    %c0_43 = arith.constant 0 : index
    %89 = vector.load %arg1[%c0_41, %c2, %c0_42, %c0_43] : memref<1x3x16x531xbf16, #tpu.memory_space<vmem>>, vector<1x1x16x531xbf16>
    %90 = vector.shape_cast %89 : vector<1x1x16x531xbf16> to vector<16x531xbf16>
    %c0_44 = arith.constant 0 : index
    %c2_45 = arith.constant 2 : index
    %c0_46 = arith.constant 0 : index
    %c0_47 = arith.constant 0 : index
    %91 = vector.load %arg2[%c0_44, %c2_45, %c0_46, %c0_47] : memref<1x3x32x531xbf16, #tpu.memory_space<vmem>>, vector<1x1x32x531xbf16>
    %92 = vector.shape_cast %91 : vector<1x1x32x531xbf16> to vector<32x531xbf16>
    %93 = vector.extract_strided_slice %90 {offsets = [0, 109], sizes = [16, 384], strides = [1, 1]} : vector<16x531xbf16> to vector<16x384xbf16>
    %94 = vector.extract_strided_slice %90 {offsets = [0, 110], sizes = [16, 384], strides = [1, 1]} : vector<16x531xbf16> to vector<16x384xbf16>
    %95 = vector.extract_strided_slice %90 {offsets = [0, 111], sizes = [16, 384], strides = [1, 1]} : vector<16x531xbf16> to vector<16x384xbf16>
    %96 = vector.extract_strided_slice %90 {offsets = [0, 127], sizes = [16, 384], strides = [1, 1]} : vector<16x531xbf16> to vector<16x384xbf16>
    %97 = vector.extract_strided_slice %90 {offsets = [0, 128], sizes = [16, 384], strides = [1, 1]} : vector<16x531xbf16> to vector<16x384xbf16>
    %98 = vector.extract_strided_slice %90 {offsets = [0, 129], sizes = [16, 384], strides = [1, 1]} : vector<16x531xbf16> to vector<16x384xbf16>
    %99 = vector.extract_strided_slice %90 {offsets = [0, 145], sizes = [16, 384], strides = [1, 1]} : vector<16x531xbf16> to vector<16x384xbf16>
    %100 = vector.extract_strided_slice %90 {offsets = [0, 146], sizes = [16, 384], strides = [1, 1]} : vector<16x531xbf16> to vector<16x384xbf16>
    %101 = vector.extract_strided_slice %90 {offsets = [0, 147], sizes = [16, 384], strides = [1, 1]} : vector<16x531xbf16> to vector<16x384xbf16>
    %102 = vector.extract_strided_slice %92 {offsets = [0, 109], sizes = [32, 384], strides = [1, 1]} : vector<32x531xbf16> to vector<32x384xbf16>
    %103 = vector.extract_strided_slice %92 {offsets = [0, 110], sizes = [32, 384], strides = [1, 1]} : vector<32x531xbf16> to vector<32x384xbf16>
    %104 = vector.extract_strided_slice %92 {offsets = [0, 111], sizes = [32, 384], strides = [1, 1]} : vector<32x531xbf16> to vector<32x384xbf16>
    %105 = vector.extract_strided_slice %92 {offsets = [0, 127], sizes = [32, 384], strides = [1, 1]} : vector<32x531xbf16> to vector<32x384xbf16>
    %106 = vector.extract_strided_slice %92 {offsets = [0, 128], sizes = [32, 384], strides = [1, 1]} : vector<32x531xbf16> to vector<32x384xbf16>
    %107 = vector.extract_strided_slice %92 {offsets = [0, 129], sizes = [32, 384], strides = [1, 1]} : vector<32x531xbf16> to vector<32x384xbf16>
    %108 = vector.extract_strided_slice %92 {offsets = [0, 145], sizes = [32, 384], strides = [1, 1]} : vector<32x531xbf16> to vector<32x384xbf16>
    %109 = vector.extract_strided_slice %92 {offsets = [0, 146], sizes = [32, 384], strides = [1, 1]} : vector<32x531xbf16> to vector<32x384xbf16>
    %110 = vector.extract_strided_slice %92 {offsets = [0, 147], sizes = [32, 384], strides = [1, 1]} : vector<32x531xbf16> to vector<32x384xbf16>
    %111 = tpu.concatenate %93, %94, %95, %96, %97, %98, %99, %100, %101, %102, %103, %104, %105, %106, %107, %108 in 0 : vector<16x384xbf16>, vector<16x384xbf16>, vector<16x384xbf16>, vector<16x384xbf16>, vector<16x384xbf16>, vector<16x384xbf16>, vector<16x384xbf16>, vector<16x384xbf16>, vector<16x384xbf16>, vector<32x384xbf16>, vector<32x384xbf16>, vector<32x384xbf16>, vector<32x384xbf16>, vector<32x384xbf16>, vector<32x384xbf16>, vector<32x384xbf16> -> vector<368x384xbf16>
    %112 = tpu.concatenate %109, %110 in 0 : vector<32x384xbf16>, vector<32x384xbf16> -> vector<64x384xbf16>
    %113 = tpu.concatenate %111, %112 in 0 : vector<368x384xbf16>, vector<64x384xbf16> -> vector<432x384xbf16>
    %c2_48 = arith.constant 2 : index
    %c0_49 = arith.constant 0 : index
    %c0_50 = arith.constant 0 : index
    %114 = vector.load %arg3[%c2_48, %c0_49, %c0_50] : memref<3x32x432xbf16, #tpu.memory_space<vmem>>, vector<1x32x432xbf16>
    %115 = vector.shape_cast %114 : vector<1x32x432xbf16> to vector<32x432xbf16>
    %cst_51 = arith.constant dense<0.000000e+00> : vector<32x384xf32>
    %116 = tpu.matmul %115, %113, %cst_51 {dimension_numbers = #tpu.dot_dimension_numbers<[1], [0], [0], [1], [0, 0, 1, 1], [], []>} : vector<32x432xbf16>, vector<432x384xbf16>, vector<32x384xf32> -> vector<32x384xf32>
    %c2_52 = arith.constant 2 : index
    %c0_53 = arith.constant 0 : index
    %c0_54 = arith.constant 0 : index
    %117 = vector.load %arg4[%c2_52, %c0_53, %c0_54] : memref<3x32x1xf32, #tpu.memory_space<vmem>>, vector<1x32x1xf32>
    %118 = vector.shape_cast %117 : vector<1x32x1xf32> to vector<32x1xf32>
    %119 = vector.broadcast %118 : vector<32x1xf32> to vector<32x384xf32>
    %120 = arith.addf %116, %119 : vector<32x384xf32>
    %cst_55 = arith.constant 2.000000e-01 : f32
    %121 = vector.broadcast %cst_55 : f32 to vector<32x384xf32>
    %122 = arith.mulf %120, %121 : vector<32x384xf32>
    %123 = arith.maximumf %120, %122 : vector<32x384xf32>
    %cst_56 = arith.constant 0.000000e+00 : f32
    %124 = vector.shape_cast %2 : vector<1x384xi1> to vector<1x384xi1>
    %125 = vector.broadcast %124 : vector<1x384xi1> to vector<32x384xi1>
    %126 = vector.broadcast %cst_56 : f32 to vector<32x384xf32>
    %127 = arith.select %125, %123, %126 : vector<32x384xi1>, vector<32x384xf32>
    %128 = arith.truncf %127 : vector<32x384xf32> to vector<32x384xbf16>
    %c0_57 = arith.constant 0 : index
    %c2_58 = arith.constant 2 : index
    %c0_59 = arith.constant 0 : index
    %c128_60 = arith.constant 128 : index
    %129 = vector.load %arg6[%c0_57, %c2_58, %c0_59, %c128_60] : memref<1x3x32x531xbf16, #tpu.memory_space<vmem>>, vector<1x1x32x384xbf16>
    %130 = vector.shape_cast %129 : vector<1x1x32x384xbf16> to vector<32x384xbf16>
    %131 = vector.shape_cast %128 : vector<32x384xbf16> to vector<1x1x32x384xbf16>
    tpu.vector_store %arg6[%c0_57, %c2_58, %c0_59, %c128_60], %131 {strides = array<i32>} : memref<1x3x32x531xbf16, #tpu.memory_space<vmem>>, vector<1x1x32x384xbf16>,
    return
  }
  func.func @transform_0(%arg0: i32) -> (i32, i32, i32, i32) {
    %c0_i32 = arith.constant 0 : i32
    %c0_i32_0 = arith.constant 0 : i32
    %c0_i32_1 = arith.constant 0 : i32
    %c0_i32_2 = arith.constant 0 : i32
    return %arg0, %c0_i32, %c0_i32_0, %c0_i32_1 : i32, i32, i32, i32
  }
  func.func @transform_1(%arg0: i32) -> (i32, i32, i32, i32) {
    %c0_i32 = arith.constant 0 : i32
    %c0_i32_0 = arith.constant 0 : i32
    %c0_i32_1 = arith.constant 0 : i32
    %c0_i32_2 = arith.constant 0 : i32
    return %arg0, %c0_i32, %c0_i32_0, %c0_i32_1 : i32, i32, i32, i32
  }
  func.func @transform_2(%arg0: i32) -> (i32, i32, i32) {
    %c0_i32 = arith.constant 0 : i32
    %c0_i32_0 = arith.constant 0 : i32
    %c0_i32_1 = arith.constant 0 : i32
    %c0_i32_2 = arith.constant 0 : i32
    return %c0_i32, %c0_i32_0, %c0_i32_1 : i32, i32, i32
  }
  func.func @transform_3(%arg0: i32) -> (i32, i32, i32) {
    %c0_i32 = arith.constant 0 : i32
    %c0_i32_0 = arith.constant 0 : i32
    %c0_i32_1 = arith.constant 0 : i32
    %c0_i32_2 = arith.constant 0 : i32
    return %c0_i32, %c0_i32_0, %c0_i32_1 : i32, i32, i32
  }
  func.func @transform_4(%arg0: i32) -> (i32, i32) {
    %c0_i32 = arith.constant 0 : i32
    %c0_i32_0 = arith.constant 0 : i32
    %c0_i32_1 = arith.constant 0 : i32
    return %c0_i32, %c0_i32_0 : i32, i32
  }
  func.func @transform_5(%arg0: i32) -> (i32, i32, i32, i32) {
    %c0_i32 = arith.constant 0 : i32
    %c0_i32_0 = arith.constant 0 : i32
    %c0_i32_1 = arith.constant 0 : i32
    %c0_i32_2 = arith.constant 0 : i32
    return %arg0, %c0_i32, %c0_i32_0, %c0_i32_1 : i32, i32, i32, i32
  }
}

</mosaic_0001>

<bundles_post_ra>
// kernel: tpu_custom_call.1
= control target key start
LH: loop header
LB: loop body
LE: loop exit
PB: predicated region body
PF: predicated region fallthrough
CT: control target
= control target key end

     0   :  { %s8469_s0 = inlined_call_operand.hbm [shape: bf16[2,3,16,531], index: 0, kind: input, shape index: {}]   ;;  %s8470_s1 = inlined_call_operand.hbm [shape: bf16[2,3,32,531], index: 1, kind: input, shape index: {}]   ;;  %s8471_s2 = inlined_call_operand.hbm [shape: bf16[3,32,432], index: 2, kind: input, shape index: {}]   ;;  %s8472_s3 = inlined_call_operand.vmem [shape: f32[3,32,1], index: 3, kind: input, shape index: {}]   ;;  %s8473_s4 = inlined_call_operand.vmem [shape: f32[1,384], index: 4, kind: input, shape index: {}]   ;;  %s8474_s5 = inlined_call_operand.hbm [shape: bf16[2,3,32,531], index: 5, kind: output, shape index: {}]  }
   0x1   :  { %8630 = sst [smem:[#allocation79_spill]] %s8469_s0 }
   0x2   :  { %8631 = sst [smem:[#allocation80_spill]] %s8471_s2 }
   0x3   :  { %10 = vsyncpa [#allocation3], 0 }
   0x4   :  { %12 = vsyncpa [#allocation3 + $0x1], 0 }
   0x5   :  { %13 = vsyncpa [#allocation6], 0 }
   0x6   :  { %15 = vsyncpa [#allocation6 + $0x1], 0 }
   0x7   :  { %16 = vsyncpa [#allocation4], 0 }
   0x8   :  { %18 = vsyncpa [#allocation4 + $0x1], 0  ;;  %s4407_s18 = smov 0   ;;  %s4409_s19 = smov 0  }
   0x9   :  { %s4411_s20 = smov 0   ;;  %s4413_s21 = smov 0  }
   0xa LB: > { %8632 = sst [smem:[#allocation13_spill]] %s4354_s20  ;;  %s4428_s22 = sadd.s32 4294967295, %s4358_s21   ;;  %s4358_s21 = sphi %s4413_s21, %s9031_s21   ;;  %s4354_s20 = sphi %s4411_s20, %s9033_s20   ;;  %s4350_s19 = sphi %s4409_s19, %s9035_s19   ;;  %s4346_s18 = sphi %s4407_s18, %s9034_s18  }
   0xb   : > { %s3664_s23 = sadd.s32 4294967294, %s4358_s21   ;;  %p44_p0 = scmp.ne.s32.totalorder %s4350_s19, %s4346_s18 }
   0xc   : > { %p45_p1 = scmp.eq.s32.totalorder %s4428_s22, 0  ;;  %p157_p2 = scmp.eq.s32.totalorder %s4428_s22, 1 }
   0xd   : > { %p163_p3 = scmp.eq.s32.totalorder %s3664_s23, 1  ;;  %p3665_p5 = scmp.ge.s32.totalorder %s4358_s21, 1 }
   0xe   : > { %p4437_p4 = por %p45_p1, %p44_p0  ;;  %p170_p7 = scmp.lt.s32.totalorder %s4358_s21, 3 }
   0xf   : > { %p4442_p6 = por %p163_p3, %p44_p0  ;;  %s8635_s2 = sld [smem:[#allocation80_spill]] }
  0x10   : > { %p4450_p8 = pnand %p3665_p5, %p170_p7  ;;  %s4360_s30 = smov [#allocation7]  }
  0x11   : > { %s183_s6 = sshll.u32 %s4360_s30, 4  ;;  %s4460_s7 = sadd.s32 1, %s4358_s21   ;;  %s184_s6 = int_to_ptr.vmem [resolvable:$true] %s183_s6 }
  0x12   : > { %p4123_p9 = pneg %p4450_p8  ;;  %8637 = sst [smem:[#allocation14_spill]] %s4460_s7 }
  0x13   : > { %s4361_s8 = smov 256   ;;  %s4362_s9 = smov 16  }
  0x14   : > { %p4124_p10 = pnand %p4123_p9, %p45_p1  ;;  %s28_s10 = ssub.s32 %s4358_s21, %s4460_s7 }
  0x15   : > { %s181_s28 = sshll.u32 %s8635_s2, 4  ;;  %s31_s11 = sadd.s32 1, %s4354_s20  ;;  %s182_s28 = int_to_ptr.hbm [resolvable:$true] %s181_s28 }
  0x16   : > { %4126 = dma.hbm_to_vmem [thread:$0]  (!%p4124_p10), %s182_s28, 3072, %s184_s6, [#allocation6], %s4361_s8, %s4361_s8, %s4362_s9  }
  0x17   : > { %p29_p12 = scmp.eq.s32.totalorder %s28_s10, 0  ;;  %p38_p13 = scmp.ne.s32.totalorder %s4354_s20, %s4350_s19 }
  0x18   : > { %p39_p0 = scmp.eq.s32.totalorder %s4358_s21, 0  ;;  %p4139_p3 = scmp.lt.s32.totalorder %s4358_s21, 2 }
  0x19   : > { %s4470_s12 = scalar_select %p29_p12, %s4354_s20, %s31_s11  }
  0x1a   : > { %p40_p5 = por %p39_p0, %p38_p13  ;;  %p4474_p7 = por %p157_p2, %p38_p13 }
  0x1b   : > { %8638 = sst [smem:[#allocation15_spill]] %s4470_s12  ;;  %s4479_s14 = sand.u32 1, %s4354_s20  }
  0x1c   : > { %s4107_s15 = smul.u32 120, %s4358_s21  ;;  %s8640_s0 = sld [smem:[#allocation79_spill]] }
  0x1d   : > { %s4106_s16 = smul.u32 120, %s4479_s14  ;;  %p4486_p9 = pnand %p4139_p3, %p40_p5 }
  0x1e   : > { %s204_s8 = scalar_lea.sflag [#allocation3], %s4479_s14 }
  0x1f   : > { %s207_s30 = scalar_lea.vmem [#allocation2], %s4106_s16  ;;  %p4228_p10 = pneg %p4486_p9 }
  0x20   : > { %s215_s6 = sshll.u32 %s207_s30, 4  ;;  %s216_s6 = int_to_ptr.vmem [resolvable:$true] %s215_s6 }
  0x22   : > { %s212_s26 = scalar_lea.hbm %s8640_s0, %s4107_s15  ;;  %s4231_s17 = scalar_lea.hbm %s8640_s0, 240 }
  0x23   : > { %s213_s28 = sshll.u32 %s212_s26, 4  ;;  %s214_s28 = int_to_ptr.hbm [resolvable:$true] %s213_s28 }
  0x24   : > { %s4224_s9 = sshra.s32 %s214_s28, 4  ;;  %s4225_s9 = int_to_ptr.hbm [resolvable:$true] %s4224_s9 }
  0x25   : > { %s4226_s10 = scalar_lea.hbm %s4225_s9, 120  ;;  %p4232_p0 = scmp.lt.s32.totalorder %s4225_s9, %s8640_s0 }
  0x26   : > { %p4227_p2 = scmp.ne.s32.totalorder %s4225_s9, %s4226_s10  ;;  %p4233_p3 = scmp.lt.s32.totalorder %s4231_s17, %s4226_s10 }
  0x28   : > { %p4229_p12 = pnand %p4228_p10, %p4227_p2  ;;  %p4234_p5 = por %p4233_p3, %p4232_p0 }
  0x2a   : > { %p4230_p13 = pneg %p4229_p12 }
  0x2c   : > { %p4235_p11 = pnand %p4234_p5, %p4230_p13 }
  0x2e   : > { %4238 = shalt.err (!%p4235_p11)
}
  0x2f   : > { %s4363_s16 = smov 320   ;;  %s4364_s30 = smov 20  }
  0x30   : > { %4130 = dma.hbm_to_vmem [thread:$0]  (!%p4486_p9), %s214_s28, 1920, %s216_s6, %s204_s8, %s4363_s16, %s4363_s16, %s4364_s30  }
  0x31   : > { %s225_s2 = sand.u32 1, %s4358_s21   ;;  %s4108_s11 = smul.u32 240, %s4479_s14 }
  0x32   : > { %s4109_s15 = smul.u32 240, %s4358_s21  ;;  %s226_s26 = scalar_lea.sflag [#allocation6], %s225_s2 }
  0x33   : > { %s229_s10 = scalar_lea.vmem [#allocation5], %s4108_s11  ;;  %s4261_s6 = scalar_lea.hbm %s8470_s1, 480 }
  0x34   : > { %s234_s9 = scalar_lea.hbm %s8470_s1, %s4109_s15  ;;  %s237_s17 = sshll.u32 %s229_s10, 4  ;;  %s238_s17 = int_to_ptr.vmem [resolvable:$true] %s237_s17 }
  0x35   : > { %s235_s23 = sshll.u32 %s234_s9, 4  ;;  %s236_s23 = int_to_ptr.hbm [resolvable:$true] %s235_s23 }
  0x36   : > { %s4254_s0 = sshra.s32 %s236_s23, 4  ;;  %s4255_s0 = int_to_ptr.hbm [resolvable:$true] %s4254_s0 }
  0x37   : > { %s4256_s7 = scalar_lea.hbm %s4255_s0, 240  ;;  %p4262_p13 = scmp.lt.s32.totalorder %s4255_s0, %s8470_s1 }
  0x38   : > { %p4257_p11 = scmp.ne.s32.totalorder %s4255_s0, %s4256_s7  ;;  %p4263_p0 = scmp.lt.s32.totalorder %s4261_s6, %s4256_s7 }
  0x3a   : > { %p4259_p2 = pnand %p4257_p11, %p4228_p10  ;;  %p4264_p3 = por %p4263_p0, %p4262_p13 }
  0x3c   : > { %p4260_p12 = pneg %p4259_p2 }
  0x3e   : > { %p4265_p5 = pnand %p4264_p3, %p4260_p12 }
  0x40   : > { %4268 = shalt.err (!%p4265_p5)
}
  0x41   : > { %4133 = dma.hbm_to_vmem [thread:$0]  (!%p4486_p9), %s236_s23, 3840, %s238_s17, %s226_s26, %s4363_s16, %s4363_s16, %s4364_s30  }
  0x42   : > { %249 = sbr.rel (%p4450_p8) target bundleno = 2236 (0x8bc), region = 40 }
  0x47   : > { %s4524_s2 = sand.u32 1, %s4350_s19  }
  0x48   : > { %s4110_s8 = smul.u32 120, %s4524_s2  ;;  %s252_s11 = scalar_lea.sflag [#allocation3], %s4524_s2 }
  0x4a   : > { %s4528_s15 = scalar_lea.vmem [#allocation2], %s4110_s8 }
  0x4b   : > { %4329 = dma.done.wait (%p4437_p4), %s252_s11, 1920  }
  0x4c   : > { %4331 = vsyncadd (%p4437_p4), %s252_s11, 4294965376  ;;  %s261_s0 = sand.u32 1, %s4428_s22   ;;  %s4111_s29 = smul.u32 240, %s4524_s2 }
  0x4d   : > { %s262_s7 = scalar_lea.sflag [#allocation6], %s261_s0 }
  0x4e   : > { %s4538_s27 = scalar_lea.vmem [#allocation5], %s4111_s29 }
  0x4f   : > { %4333 = dma.done.wait (%p4437_p4), %s262_s7, 3840  }
  0x50   : > { %4335 = vsyncadd (%p4437_p4), %s262_s7, 4294963456 }
  0x51   : > { %4337 = dma.done.wait (%p45_p1), [#allocation6], 3072  }
  0x52   : > { %4339 = vsyncadd (%p45_p1), [#allocation6], 4294964224  ;;  %v3682_v0 = vld [vmem:[%s4528_s15 + $0x8] sm:$0xf]  ;;  %v4032_v1 = vld [vmem:[%s4528_s15 + $0x18] sm:$0xf0] }
  0x53   : > { %v3674_v2 = vld [vmem:[%s4528_s15] sm:$0xf]  ;;  %v4551_v3 = vor.u32 %v4032_v1, %v3682_v0  ;;  %v4031_v4 = vld [vmem:[%s4528_s15 + $0x10] sm:$0xf0]  ;;  %s4365_s24 = smov 127   ;;  %s4366_s16 = smov 126  }
  0x54   : > { %v4554_v5 = vor.u32 %v4031_v4, %v3674_v2  ;;  %v4030_v6 = vld [vmem:[%s4528_s15 + $0xc] sm:$0xf]  ;;  %v3684_v7 = vld [vmem:[%s4528_s15 + $0x1c] sm:$0xf0]  ;;  %v4029_v8 = vld [vmem:[%s4528_s15 + $0x4] sm:$0xf] }
  0x55   : > { %344 = vrot.lane.b32.xlu1 %v4551_v3, %s4365_s24  ;;  %v3676_v9 = vld [vmem:[%s4528_s15 + $0x14] sm:$0xf0]  ;;  %v4566_v10 = vor.u32 %v4030_v6, %v3684_v7  ;;  %s4367_s30 = smov 110   ;;  %s4368_s9 = smov 109   ;;  %v3690_v12 = vld [vmem:[%s4528_s15 + $0x10] sm:$0xf] }
  0x56   : > { %352 = vrot.lane.b32.xlu2 %v4554_v5, %s4366_s16  ;;  %340 = vrot.lane.b32.xlu0 %v4554_v5, %s4365_s24  ;;  %v4568_v11 = vor.u32 %v4029_v8, %v3676_v9  ;;  %s4369_s10 = smov 108   ;;  %v4033_v13 = vld [vmem:[%s4528_s15 + $0x20] sm:$0xf0]  ;;  %s4370_s17 = smov 92   ;;  %v3694_v15 = vld [vmem:[%s4538_s27] sm:$0xf] }
  0x57   : > { %v3691_v14 = vor.u32 %v4033_v13, %v3690_v12  ;;  %s4371_s23 = smov 91   ;;  %s4372_s26 = smov 90   ;;  %v4036_v16 = vld [vmem:[%s4538_s27 + $0x10] sm:$0xf0]  ;;  %v4034_v17 = vld [vmem:[%s4538_s27 + $0x4] sm:$0xf] }
  0x58   : > { %v3696_v18 = vld [vmem:[%s4538_s27 + $0x14] sm:$0xf0]  ;;  %v4627_v19 = vor.u32 %v4036_v16, %v3694_v15  ;;  %v4035_v21 = vld [vmem:[%s4538_s27 + $0xc] sm:$0xf]  ;;  %v3704_v22 = vld [vmem:[%s4538_s27 + $0x1c] sm:$0xf0] }
  0x59   : > { %v4629_v20 = vor.u32 %v4034_v17, %v3696_v18  ;;  %v3710_v23 = vld [vmem:[%s4538_s27 + $0x28] sm:$0xf]  ;;  %v4041_v24 = vld [vmem:[%s4538_s27 + $0x38] sm:$0xf0]  ;;  %v4642_v27 = vor.u32 %v4035_v21, %v3704_v22  ;;  %v3718_v30 = vld [vmem:[%s4538_s27 + $0x30] sm:$0xf] }
  0x5a   : > { %8642 = vst [vmem:[#allocation16_spill] sm:$0xff] %v4627_v19  ;;  %v3702_v25 = vld [vmem:[%s4538_s27 + $0x8] sm:$0xf]  ;;  %v4037_v26 = vld [vmem:[%s4538_s27 + $0x18] sm:$0xf0]  ;;  %v4644_v28 = vor.u32 %v4041_v24, %v3710_v23  ;;  %vm372_vm0 = vcmask 900096  }
  0x5b   : > { %8643 = vst [vmem:[#allocation17_spill] sm:$0xff] %v4642_v27  ;;  %v4646_v29 = vor.u32 %v4037_v26, %v3702_v25  ;;  %v4042_v31 = vld [vmem:[%s4538_s27 + $0x40] sm:$0xf0]  ;;  %v4040_v32 = vld [vmem:[%s4538_s27 + $0x34] sm:$0xf]  ;;  %vm382_vm1 = vcmask 891904  }
  0x5c   : > { %v3720_v33 = vld [vmem:[%s4538_s27 + $0x44] sm:$0xf0]  ;;  %v4039_v34 = vld [vmem:[%s4538_s27 + $0x2c] sm:$0xf]  ;;  %v3712_v35 = vld [vmem:[%s4538_s27 + $0x3c] sm:$0xf0]  ;;  %v4662_v37 = vor.u32 %v4042_v31, %v3718_v30 }
  0x5d   : > { %346 = vrot.lane.b32.xlu1 %v4566_v10, %s4365_s24  ;;  %v4664_v38 = vor.u32 %v4040_v32, %v3720_v33  ;;  %v4666_v39 = vor.u32 %v4039_v34, %v3712_v35  ;;  %v3726_v60 = vld [vmem:[%s4538_s27 + $0x10] sm:$0xf]  ;;  %v4038_v61 = vld [vmem:[%s4538_s27 + $0x20] sm:$0xf0]  ;;  %v3730_v4 = vld [vmem:[%s4538_s27 + $0x38] sm:$0xf] }
  0x5e   : > { %354 = vrot.lane.b32.xlu2 %v4568_v11, %s4366_s16  ;;  %342 = vrot.lane.b32.xlu0 %v4568_v11, %s4365_s24  ;;  %8644 = vst [vmem:[#allocation18_spill] sm:$0xff] %v4662_v37  ;;  %v3727_v1 = vor.u32 %v4038_v61, %v3726_v60  ;;  %v4043_v6 = vld [vmem:[%s4538_s27 + $0x48] sm:$0xf0]  ;;  %s4374_s12 = smov 19   ;;  %vm348_vm2 = vcmask 1039360   ;;  %vm360_vm3 = vcmask 1031168  }
  0x5f   : > { %v3731_v9 = vor.u32 %v4043_v6, %v3730_v4  ;;  %vm398_vm4 = vcmask 883712   ;;  %vm410_vm5 = vcmask 752640   ;;  %vm422_vm6 = vcmask 744448   ;;  %s6278_s14 = scalar_lea.vmem [#allocation8], %s4111_s29  ;;  %s3544_s8 = scalar_lea.sflag [#allocation4], %s4524_s2 }
  0x60   : > { %vm434_vm7 = vcmask 736256   ;;  %vm936_vm8 = vcmask 154624   ;;  %vm1099_vm9 = vcmask 392192   ;;  %s4304_s28 = scalar_lea.hbm %s8474_s5, 480 }
  0x65   : > { %358 = vrot.lane.b32.xlu1 %v4566_v10, %s4366_s16 }
  0x66   : > { %364 = vrot.lane.b32.xlu2 %v4554_v5, %s4367_s30  ;;  %356 = vrot.lane.b32.xlu0 %v4551_v3, %s4366_s16 }
  0x6d   : > { %368 = vrot.lane.b32.xlu1 %v4551_v3, %s4367_s30 }
  0x6e   : > { %370 = vrot.lane.b32.xlu2 %v4566_v10, %s4367_s30  ;;  %366 = vrot.lane.b32.xlu0 %v4568_v11, %s4367_s30 }
  0x75   : > { %378 = vrot.lane.b32.xlu1 %v4551_v3, %s4368_s9 }
  0x76   : > { %380 = vrot.lane.b32.xlu2 %v4566_v10, %s4368_s9  ;;  %376 = vrot.lane.b32.xlu0 %v4568_v11, %s4368_s9 }
  0x7d   : > { %392 = vrot.lane.b32.xlu1 %v4551_v3, %s4369_s10 }
  0x7e   : > { %394 = vrot.lane.b32.xlu2 %v4566_v10, %s4369_s10  ;;  %390 = vrot.lane.b32.xlu0 %v4568_v11, %s4369_s10 }
  0x85   : > { %402 = vrot.lane.b32.xlu1 %v4568_v11, %s4370_s17 }
  0x86   : > { %404 = vrot.lane.b32.xlu2 %v4551_v3, %s4370_s17  ;;  %396 = vrot.lane.b32.xlu0 %v3691_v14, %s4369_s10 }
  0x8d   : > { %408 = vrot.lane.b32.xlu1 %v3691_v14, %s4370_s17 }
  0x8e   : > { %414 = vrot.lane.b32.xlu2 %v4568_v11, %s4371_s23  ;;  %406 = vrot.lane.b32.xlu0 %v4566_v10, %s4370_s17 }
  0x95   : > { %418 = vrot.lane.b32.xlu1 %v4566_v10, %s4371_s23 }
  0x96   : > { %420 = vrot.lane.b32.xlu2 %v3691_v14, %s4371_s23  ;;  %416 = vrot.lane.b32.xlu0 %v4551_v3, %s4371_s23 }
  0x9d   : > { %428 = vrot.lane.b32.xlu1 %v4551_v3, %s4372_s26 }
  0x9e   : > { %430 = vrot.lane.b32.xlu2 %v4566_v10, %s4372_s26  ;;  %426 = vrot.lane.b32.xlu0 %v4568_v11, %s4372_s26 }
  0xa5   : > { %470 = vrot.lane.b32.xlu1 %v4627_v19, %s4365_s24 }
  0xa6   : > { %472 = vrot.lane.b32.xlu2 %v4629_v20, %s4365_s24  ;;  %432 = vrot.lane.b32.xlu0 %v3691_v14, %s4372_s26 }
  0xad   : > { %476 = vrot.lane.b32.xlu1 %v4642_v27, %s4365_s24 }
  0xae   : > { %478 = vrot.lane.b32.xlu2 %v4644_v28, %s4365_s24  ;;  %474 = vrot.lane.b32.xlu0 %v4646_v29, %s4365_s24 }
  0xb0   : > { %v4660_v36 = vpop.permute.xlu2 %352 }
  0xb5   : > { %482 = vrot.lane.b32.xlu1 %v4662_v37, %s4365_s24 }
  0xb6   : > { %484 = vrot.lane.b32.xlu2 %v4664_v38, %s4365_s24  ;;  %480 = vrot.lane.b32.xlu0 %v4666_v39, %s4365_s24 }
  0xb8   : > { %v4674_v40 = vpop.permute.xlu2 %354 }
  0xbd   : > { %494 = vrot.lane.b32.xlu1 %v4629_v20, %s4366_s16 }
  0xbe   : > { %496 = vrot.lane.b32.xlu2 %v4646_v29, %s4366_s16  ;;  %492 = vrot.lane.b32.xlu0 %v4627_v19, %s4366_s16 }
  0xc0   : > { %v4682_v41 = vpop.permute.xlu2 %364 }
  0xc5   : > { %500 = vrot.lane.b32.xlu1 %v4644_v28, %s4366_s16 }
  0xc6   : > { %502 = vrot.lane.b32.xlu2 %v4666_v39, %s4366_s16  ;;  %498 = vrot.lane.b32.xlu0 %v4642_v27, %s4366_s16 }
  0xc7   : > { %v4690_v42 = vpop.permute.xlu1 %344 }
  0xc8   : > { %v4692_v43 = vpop.permute.xlu0 %340  ;;  %v4694_v44 = vpop.permute.xlu2 %370 }
  0xcd   : > { %506 = vrot.lane.b32.xlu1 %v4664_v38, %s4366_s16 }
  0xce   : > { %514 = vrot.lane.b32.xlu2 %v4627_v19, %s4367_s30  ;;  %504 = vrot.lane.b32.xlu0 %v4662_v37, %s4366_s16  ;;  %v8486_v19 = vmov 0  }
  0xcf   : > { %v4702_v45 = vpop.permute.xlu1 %346  ;;  %4191 = vset.pattern.permute.xlu0 %v8486_v19  ;;  %4192 = vset.pattern.permute.xlu1 %v8486_v19 }
  0xd0   : > { %v4704_v46 = vpop.permute.xlu2 %380  ;;  %v4706_v47 = vpop.permute.xlu0 %342  ;;  %4193 = vset.pattern.permute.xlu2 %v8486_v19 }
  0xd5   : > { %518 = vrot.lane.b32.xlu1 %v4646_v29, %s4367_s30 }
  0xd6   : > { %520 = vrot.lane.b32.xlu2 %v4642_v27, %s4367_s30  ;;  %516 = vrot.lane.b32.xlu0 %v4629_v20, %s4367_s30 }
  0xd7   : > { %v4714_v48 = vpop.permute.xlu1 %358 }
  0xd8   : > { %v4716_v49 = vpop.permute.xlu2 %394  ;;  %v4718_v50 = vpop.permute.xlu0 %356 }
  0xdd   : > { %524 = vrot.lane.b32.xlu1 %v4666_v39, %s4367_s30 }
  0xde   : > { %526 = vrot.lane.b32.xlu2 %v4662_v37, %s4367_s30  ;;  %522 = vrot.lane.b32.xlu0 %v4644_v28, %s4367_s30 }
  0xdf   : > { %v4726_v51 = vpop.permute.xlu1 %368 }
  0xe0   : > { %v4728_v52 = vpop.permute.xlu2 %404  ;;  %v4730_v53 = vpop.permute.xlu0 %366 }
  0xe5   : > { %536 = vrot.lane.b32.xlu1 %v4629_v20, %s4368_s9 }
  0xe6   : > { %538 = vrot.lane.b32.xlu2 %v4646_v29, %s4368_s9  ;;  %528 = vrot.lane.b32.xlu0 %v4664_v38, %s4367_s30 }
  0xe7   : > { %v4738_v54 = vpop.permute.xlu1 %378 }
  0xe8   : > { %v4740_v55 = vpop.permute.xlu2 %414  ;;  %v4742_v56 = vpop.permute.xlu0 %376 }
  0xed   : > { %542 = vrot.lane.b32.xlu1 %v4666_v39, %s4368_s9 }
  0xee   : > { %544 = vrot.lane.b32.xlu2 %v4662_v37, %s4368_s9  ;;  %540 = vrot.lane.b32.xlu0 %v4642_v27, %s4368_s9 }
  0xef   : > { %v4750_v57 = vpop.permute.xlu1 %392 }
  0xf0   : > { %v4752_v58 = vpop.permute.xlu2 %420  ;;  %v4754_v59 = vpop.permute.xlu0 %390 }
  0xf5   : > { %562 = vrot.lane.b32.xlu1 %v4629_v20, %s4369_s10 }
  0xf6   : > { %564 = vrot.lane.b32.xlu2 %v4646_v29, %s4369_s10  ;;  %546 = vrot.lane.b32.xlu0 %v4664_v38, %s4368_s9 }
  0xf7   : > { %v4764_v62 = vpop.permute.xlu1 %402 }
  0xf8   : > { %v4766_v63 = vpop.permute.xlu2 %430  ;;  %v4768_v0 = vpop.permute.xlu0 %396 }
  0xfd   : > { %568 = vrot.lane.b32.xlu1 %v3727_v1, %s4369_s10 }
  0xfe   : > { %570 = vrot.lane.b32.xlu2 %v4666_v39, %s4369_s10  ;;  %566 = vrot.lane.b32.xlu0 %v4642_v27, %s4369_s10 }
  0xff   : > { %v4775_v2 = vpop.permute.xlu1 %408 }
 0x100   : > { %v4779_v7 = vpop.permute.xlu2 %472  ;;  %v4781_v8 = vpop.permute.xlu0 %406 }
 0x105   : > { %574 = vrot.lane.b32.xlu1 %v4664_v38, %s4369_s10 }
 0x106   : > { %576 = vrot.lane.b32.xlu2 %v3731_v9, %s4369_s10  ;;  %572 = vrot.lane.b32.xlu0 %v4662_v37, %s4369_s10 }
 0x107   : > { %v4788_v12 = vpop.permute.xlu1 %418 }
 0x108   : > { %v4790_v13 = vpop.permute.xlu2 %478  ;;  %v4792_v14 = vpop.permute.xlu0 %416 }
 0x109   : > { %8645 = vst [vmem:[#allocation19_spill] sm:$0xff] %v4790_v13 }
 0x10d   : > { %586 = vrot.lane.b32.xlu1 %v4646_v29, %s4370_s17 }
 0x10e   : > { %588 = vrot.lane.b32.xlu2 %v4642_v27, %s4370_s17  ;;  %584 = vrot.lane.b32.xlu0 %v4629_v20, %s4370_s17 }
 0x10f   : > { %v4800_v15 = vpop.permute.xlu1 %428 }
 0x110   : > { %v4802_v16 = vpop.permute.xlu2 %484  ;;  %v4804_v17 = vpop.permute.xlu0 %426 }
 0x115   : > { %592 = vrot.lane.b32.xlu1 %v4666_v39, %s4370_s17 }
 0x116   : > { %594 = vrot.lane.b32.xlu2 %v4662_v37, %s4370_s17  ;;  %590 = vrot.lane.b32.xlu0 %v3727_v1, %s4370_s17 }
 0x117   : > { %v4811_v18 = vpop.permute.xlu1 %470 }
 0x118   : > { %v4813_v21 = vpop.permute.xlu2 %496  ;;  %v4815_v22 = vpop.permute.xlu0 %432 }
 0x119   : > { %8646 = vst [vmem:[#allocation20_spill] sm:$0xff] %v4813_v21 }
 0x11d   : > { %598 = vrot.lane.b32.xlu1 %v3731_v9, %s4370_s17 }
 0x11e   : > { %606 = vrot.lane.b32.xlu2 %v3727_v1, %s4367_s30  ;;  %596 = vrot.lane.b32.xlu0 %v4664_v38, %s4370_s17 }
 0x11f   : > { %v4821_v23 = vpop.permute.xlu1 %476 }
 0x120   : > { %v4823_v24 = vpop.permute.xlu2 %502  ;;  %v4825_v25 = vpop.permute.xlu0 %474 }
 0x121   : > { %8647 = vst [vmem:[#allocation21_spill] sm:$0xff] %v4823_v24 }
 0x125   : > { %612 = vrot.lane.b32.xlu1 %v3727_v1, %s4368_s9 }
 0x126   : > { %614 = vrot.lane.b32.xlu2 %v3731_v9, %s4368_s9  ;;  %608 = vrot.lane.b32.xlu0 %v3731_v9, %s4367_s30 }
 0x127   : > { %v4830_v26 = vpop.permute.xlu1 %482 }
 0x128   : > { %v4832_v30 = vpop.permute.xlu2 %514  ;;  %v4834_v31 = vpop.permute.xlu0 %480 }
 0x129   : > { %8648 = vst [vmem:[#allocation22_spill] sm:$0xff] %v4832_v30 }
 0x12f   : > { %v4836_v32 = vpop.permute.xlu1 %494 }
 0x130   : > { %v4838_v33 = vpop.permute.xlu2 %520  ;;  %v4840_v34 = vpop.permute.xlu0 %492 }
 0x131   : > { %8649 = vst [vmem:[#allocation23_spill] sm:$0xff] %v4838_v33 }
 0x137   : > { %v4842_v35 = vpop.permute.xlu1 %500 }
 0x138   : > { %8650 = vst [vmem:[#allocation24_spill] sm:$0xff] %v4842_v35  ;;  %v527_v60 = vpop.permute.xlu2 %526  ;;  %v4844_v61 = vpop.permute.xlu0 %498 }
 0x13f   : > { %v4846_v1 = vpop.permute.xlu1 %506 }
 0x140   : > { %v539_v4 = vpop.permute.xlu2 %538  ;;  %v4848_v6 = vpop.permute.xlu0 %504 }
 0x147   : > { %v519_v9 = vpop.permute.xlu1 %518 }
 0x148   : > { %v545_v30 = vpop.permute.xlu2 %544  ;;  %v4850_v13 = vpop.permute.xlu0 %516  ;;  %v4854_v37 = vsel %vm372_vm0, %v519_v9, %v4838_v33 }
 0x149   : > { %8651 = vst [vmem:[#allocation25_spill] sm:$0xff] %v4850_v13  ;;  %620 = vrot.lane.b32.xlu1 %v4854_v37, %s4368_s9  ;;  %v4860_v27 = vsel %vm372_vm0, %v4850_v13, %v519_v9 }
 0x14a   : > { %8652 = vst [vmem:[#allocation26_spill] sm:$0xff] %v4854_v37  ;;  %618 = vrot.lane.b32.xlu0 %v4860_v27, %s4368_s9 }
 0x14b   : > { %8653 = vst [vmem:[#allocation27_spill] sm:$0xff] %v4860_v27 }
 0x14f   : > { %v4867_v35 = vpop.permute.xlu1 %524 }
 0x150   : > { %8654 = vst [vmem:[#allocation28_spill] sm:$0xff] %v4867_v35  ;;  %v4869_v24 = vpop.permute.xlu2 %564  ;;  %v4871_v21 = vpop.permute.xlu0 %522  ;;  %v4875_v9 = vsel %vm372_vm0, %v4867_v35, %v527_v60 }
 0x151   : > { %8655 = vst [vmem:[#allocation29_spill] sm:$0xff] %v4869_v24 }
 0x152   : > { %8656 = vst [vmem:[#allocation30_spill] sm:$0xff] %v4871_v21  ;;  %624 = vrot.lane.b32.xlu0 %v4875_v9, %s4368_s9 }
 0x153   : > { %8657 = vst [vmem:[#allocation31_spill] sm:$0xff] %v4875_v9 }
 0x157   : > { %v4879_v13 = vpop.permute.xlu1 %536 }
 0x158   : > { %8658 = vst [vmem:[#allocation32_spill] sm:$0xff] %v4879_v13  ;;  %v4881_v37 = vpop.permute.xlu2 %570  ;;  %v4883_v27 = vpop.permute.xlu0 %528  ;;  %v4887_v19 = vsel %vm382_vm1, %v4879_v13, %v539_v4 }
 0x159   : > { %8659 = vst [vmem:[#allocation33_spill] sm:$0xff] %v4881_v37  ;;  %v4891_v24 = vsel %vm372_vm0, %v527_v60, %v4883_v27 }
 0x15a   : > { %8660 = vst [vmem:[#allocation34_spill] sm:$0xff] %v4887_v19  ;;  %630 = vrot.lane.b32.xlu0 %v4887_v19, %s4368_s9  ;;  %626 = vrot.lane.b32.xlu1 %v4891_v24, %s4368_s9 }
 0x15b   : > { %8661 = vst [vmem:[#allocation35_spill] sm:$0xff] %v4891_v24  ;;  %v658_v24 = vld [vmem:[%s8472_s3] sm:$0xff] }
 0x15f   : > { %v4897_v9 = vpop.permute.xlu1 %542 }
 0x160   : > { %8662 = vst [vmem:[#allocation36_spill] sm:$0xff] %v4897_v9  ;;  %v4899_v21 = vpop.permute.xlu2 %576  ;;  %v4901_v37 = vpop.permute.xlu0 %540  ;;  %v4905_v13 = vsel %vm382_vm1, %v4897_v9, %v545_v30 }
 0x161   : > { %8663 = vst [vmem:[#allocation37_spill] sm:$0xff] %v4899_v21  ;;  %v4909_v60 = vsel %vm382_vm1, %v539_v4, %v4901_v37 }
 0x162   : > { %8664 = vst [vmem:[#allocation38_spill] sm:$0xff] %v4905_v13  ;;  %636 = vrot.lane.b32.xlu0 %v4905_v13, %s4368_s9  ;;  %632 = vrot.lane.b32.xlu1 %v4909_v60, %s4368_s9 }
 0x163   : > { %8665 = vst [vmem:[#allocation39_spill] sm:$0xff] %v4909_v60 }
 0x167   : > { %v4915_v19 = vpop.permute.xlu1 %562 }
 0x168   : > { %8666 = vst [vmem:[#allocation40_spill] sm:$0xff] %v4915_v19  ;;  %v4920_v21 = vpop.permute.xlu2 %588  ;;  %v4922_v9 = vpop.permute.xlu0 %546  ;;  %v659_v19 = vld [vmem:[%s8472_s3 + $0x8] sm:$0xff] }
 0x169   : > { %8667 = vst [vmem:[#allocation41_spill] sm:$0xff] %v4920_v21  ;;  %v4926_v4 = vsel %vm382_vm1, %v545_v30, %v4922_v9 }
 0x16a   : > { %8668 = vst [vmem:[#allocation42_spill] sm:$0xff] %v4926_v4  ;;  %664 = vperm.xlu0 %4191, %v658_v24   ;;  %638 = vrot.lane.b32.xlu1 %v4926_v4, %s4368_s9  ;;  %v661_v4 = vld [vmem:[%s8472_s3 + $0x18] sm:$0xff] }
 0x16f   : > { %v4930_v13 = vpop.permute.xlu1 %568 }
 0x170   : > { %v4935_v60 = vpop.permute.xlu2 %594  ;;  %v4937_v35 = vpop.permute.xlu0 %566 }
 0x171   : > { %8669 = vst [vmem:[#allocation43_spill] sm:$0xff] %v4935_v60 }
 0x172   : > { %8670 = vst [vmem:[#allocation44_spill] sm:$0xff] %v4937_v35  ;;  %722 = vrot.lane.b32.xlu0 %v4568_v11, %s4374_s12  ;;  %669 = vperm.xlu1 %4192, %v659_v19   ;;  %v349_v35 = vsel %vm348_vm2, %v4692_v43, %v4706_v47  ;;  %v363_v43 = vsel %vm360_vm3, %v4718_v50, %v4714_v48 }
 0x177   : > { %v4941_v24 = vpop.permute.xlu1 %574 }
 0x178   : > { %v607_v30 = vpop.permute.xlu2 %606  ;;  %v4943_v21 = vpop.permute.xlu0 %572 }
 0x179   : > { %v610_v60 = vsel %vm372_vm0, %v4838_v33, %v607_v30 }
 0x17a   : > { %622 = vrot.lane.b32.xlu2 %v610_v60, %s4368_s9  ;;  %728 = vrot.lane.b32.xlu0 %v349_v35, %s4374_s12  ;;  %v350_v35 = vsel %vm348_vm2, %v4706_v47, %v4690_v42 }
 0x17b   : > { %679 = vperm.xlu1 %4192, %v661_v4  }
 0x17f   : > { %v4955_v11 = vpop.permute.xlu1 %586 }
 0x180   : > { %v4957_v19 = vpop.permute.xlu0 %584 }
 0x182   : > { %734 = vrot.lane.b32.xlu0 %v4702_v45, %s4374_s12 }
 0x183   : > { %724 = vrot.lane.b32.xlu1 %v4551_v3, %s4374_s12  ;;  %v374_v3 = vsel %vm372_vm0, %v4730_v53, %v4726_v51 }
 0x187   : > { %v4968_v60 = vpop.permute.xlu1 %592 }
 0x188   : > { %v4963_v30 = vpop.permute.xlu0 %590 }
 0x189   : > { %8671 = vst [vmem:[#allocation45_spill] sm:$0xff] %v4963_v30  ;;  %v361_v30 = vsel %vm360_vm3, %v4660_v36, %v4674_v40 }
 0x18a   : > { %740 = vrot.lane.b32.xlu0 %v363_v43, %s4374_s12 }
 0x18b   : > { %730 = vrot.lane.b32.xlu1 %v350_v35, %s4374_s12 }
 0x18f   : > { %v4985_v43 = vpop.permute.xlu1 %598 }
 0x190   : > { %v4975_v4 = vpop.permute.xlu0 %596 }
 0x192   : > { %746 = vrot.lane.b32.xlu0 %v374_v3, %s4374_s12 }
 0x193   : > { %736 = vrot.lane.b32.xlu1 %v361_v30, %s4374_s12  ;;  %v375_v30 = vsel %vm372_vm0, %v4726_v51, %v4694_v44  ;;  %v660_v51 = vld [vmem:[%s8472_s3 + $0x10] sm:$0xff] }
 0x197   : > { %v613_v35 = vpop.permute.xlu1 %612 }
 0x198   : > { %v609_v33 = vpop.permute.xlu0 %608  ;;  %v616_v36 = vsel %vm382_vm1, %v4901_v37, %v613_v35  ;;  %v411_v35 = vsel %vm410_vm5, %v4764_v62, %v4728_v52 }
 0x199   : > { %v611_v47 = vsel %vm372_vm0, %v4883_v27, %v609_v33  ;;  %v615_v33 = vpop.permute.xlu2 %614 }
 0x19a   : > { %752 = vrot.lane.b32.xlu0 %v4742_v56, %s4374_s12  ;;  %628 = vrot.lane.b32.xlu2 %v611_v47, %s4368_s9  ;;  %v617_v3 = vsel %vm382_vm1, %v4922_v9, %v615_v33  ;;  %v383_v47 = vsel %vm382_vm1, %v4742_v56, %v4738_v54  ;;  %v401_v56 = vsel %vm398_vm4, %v4716_v49, %v4768_v0 }
 0x19b   : > { %742 = vrot.lane.b32.xlu1 %v4714_v48, %s4374_s12  ;;  %v400_v48 = vsel %vm398_vm4, %v4750_v57, %v4716_v49  ;;  %v412_v33 = vsel %vm410_vm5, %v4728_v52, %v4781_v8  ;;  %v351_v0 = vsel %vm348_vm2, %v4690_v42, %v4702_v45 }
 0x1a2   : > { %758 = vrot.lane.b32.xlu0 %v4704_v46, %s4374_s12  ;;  %634 = vrot.lane.b32.xlu2 %v616_v36, %s4368_s9 }
 0x1a3   : > { %748 = vrot.lane.b32.xlu1 %v375_v30, %s4374_s12  ;;  %v425_v30 = vsel %vm422_vm6, %v4788_v12, %v4752_v58  ;;  %v436_v58 = vsel %vm434_vm7, %v4800_v15, %v4766_v63 }
 0x1aa   : > { %764 = vrot.lane.b32.xlu0 %v400_v48, %s4374_s12  ;;  %640 = vrot.lane.b32.xlu2 %v617_v3, %s4368_s9  ;;  %v362_v3 = vsel %vm360_vm3, %v4674_v40, %v4718_v50 }
 0x1ab   : > { %754 = vrot.lane.b32.xlu1 %v383_v47, %s4374_s12 }
 0x1b2   : > { %770 = vrot.lane.b32.xlu0 %v411_v35, %s4374_s12  ;;  %674 = vperm.xlu2 %4193, %v660_v51  }
 0x1b3   : > { %760 = vrot.lane.b32.xlu1 %v4754_v59, %s4374_s12 }
 0x1ba   : > { %776 = vrot.lane.b32.xlu0 %v4740_v55, %s4374_s12  ;;  %720 = vrot.lane.b32.xlu2 %v4554_v5, %s4374_s12 }
 0x1bb   : > { %766 = vrot.lane.b32.xlu1 %v401_v56, %s4374_s12  ;;  %v5043_v5 = vpop.permute.xlu1 %620  ;;  %v413_v56 = vsel %vm410_vm5, %v4781_v8, %v4775_v2  ;;  %v513_v2 = vsel %vm360_vm3, %v4848_v6, %v4846_v1  ;;  %v424_v8 = vsel %vm422_vm6, %v4792_v14, %v4788_v12  ;;  %v435_v12 = vsel %vm434_vm7, %v4804_v17, %v4800_v15 }
 0x1bc   : > { %v5031_v36 = vpop.permute.xlu0 %618 }
 0x1c2   : > { %782 = vrot.lane.b32.xlu0 %v425_v30, %s4374_s12  ;;  %726 = vrot.lane.b32.xlu2 %v4566_v10, %s4374_s12  ;;  %v423_v10 = vsel %vm422_vm6, %v4740_v55, %v4792_v14  ;;  %v373_v55 = vsel %vm372_vm0, %v4682_v41, %v4730_v53  ;;  %v488_v53 = vsel %vm348_vm2, %v4825_v25, %v4821_v23  ;;  %v8684_v14 = vld [vmem:[#allocation21_spill] sm:$0xff] }
 0x1c3   : > { %772 = vrot.lane.b32.xlu1 %v412_v33, %s4374_s12 }
 0x1c4   : > { %v5045_v49 = vpop.permute.xlu0 %624 }
 0x1ca   : > { %788 = vrot.lane.b32.xlu0 %v436_v58, %s4374_s12  ;;  %732 = vrot.lane.b32.xlu2 %v351_v0, %s4374_s12 }
 0x1cb   : > { %778 = vrot.lane.b32.xlu1 %v423_v10, %s4374_s12 }
 0x1cc   : > { %v5059_v52 = vpop.permute.xlu1 %626  ;;  %v5061_v48 = vpop.permute.xlu0 %630 }
 0x1d2   : > { %794 = vrot.lane.b32.xlu0 %v4629_v20, %s4374_s12  ;;  %738 = vrot.lane.b32.xlu2 %v362_v3, %s4374_s12  ;;  %v437_v20 = vsel %vm434_vm7, %v4766_v63, %v4815_v22  ;;  %v384_v63 = vsel %vm382_vm1, %v4738_v54, %v4704_v46  ;;  %v490_v22 = vsel %vm348_vm2, %v4834_v31, %v4830_v26  ;;  %v8685_v3 = vld [vmem:[#allocation24_spill] sm:$0xff] }
 0x1d3   : > { %784 = vrot.lane.b32.xlu1 %v4804_v17, %s4374_s12  ;;  %v399_v46 = vsel %vm398_vm4, %v4754_v59, %v4750_v57  ;;  %v508_v57 = vsel %vm360_vm3, %v4840_v34, %v4836_v32  ;;  %v8691_v17 = vld [vmem:[#allocation16_spill] sm:$0xff] }
 0x1d4   : > { %v5071_v42 = vpop.permute.xlu1 %632  ;;  %v5073_v45 = vpop.permute.xlu0 %636 }
 0x1da   : > { %800 = vrot.lane.b32.xlu0 %v4644_v28, %s4374_s12  ;;  %744 = vrot.lane.b32.xlu2 %v373_v55, %s4374_s12  ;;  %v511_v55 = vsel %vm360_vm3, %v8685_v3, %v8684_v14  ;;  %v8697_v3 = vld [vmem:[#allocation18_spill] sm:$0xff] }
 0x1db   : > { %790 = vrot.lane.b32.xlu1 %v437_v20, %s4374_s12 }
 0x1dc   : > { %v5085_v40 = vpop.permute.xlu1 %638  ;;  %v5087_v50 = vpop.permute.xlu0 %664 }
 0x1dd   : > { %8672 = vst [vmem:[#allocation46_spill] sm:$0xff] %v5087_v50 }
 0x1e2   : > { %806 = vrot.lane.b32.xlu0 %v4664_v38, %s4374_s12  ;;  %750 = vrot.lane.b32.xlu2 %v4694_v44, %s4374_s12 }
 0x1e3   : > { %796 = vrot.lane.b32.xlu1 %v4646_v29, %s4374_s12  ;;  %v5109_v29 = vpop.permute.xlu2 %622 }
 0x1e4   : > { %v5095_v28 = vpop.permute.xlu1 %669  ;;  %v5097_v41 = vpop.permute.xlu0 %722 }
 0x1e5   : > { %8673 = vst [vmem:[#allocation47_spill] sm:$0xff] %v5095_v28 }
 0x1e6   : > { %8674 = vst [vmem:[#allocation48_spill] sm:$0xff] %v5097_v41 }
 0x1ea   : > { %812 = vrot.lane.b32.xlu0 %v488_v53, %s4374_s12  ;;  %756 = vrot.lane.b32.xlu2 %v384_v63, %s4374_s12 }
 0x1eb   : > { %802 = vrot.lane.b32.xlu1 %v4666_v39, %s4374_s12  ;;  %v486_v39 = vsel %vm348_vm2, %v4811_v18, %v4779_v7 }
 0x1ec   : > { %v5113_v44 = vpop.permute.xlu0 %728 }
 0x1ed   : > { %v5111_v38 = vpop.permute.xlu1 %679 }
 0x1ee   : > { %8675 = vst [vmem:[#allocation49_spill] sm:$0xff] %v5111_v38  ;;  %v8705_v38 = vld [vmem:[#allocation40_spill] sm:$0xff] }
 0x1f2   : > { %818 = vrot.lane.b32.xlu0 %v490_v22, %s4374_s12  ;;  %762 = vrot.lane.b32.xlu2 %v399_v46, %s4374_s12  ;;  %v8689_v22 = vld [vmem:[#allocation28_spill] sm:$0xff]  ;;  %v8690_v46 = vld [vmem:[#allocation30_spill] sm:$0xff] }
 0x1f3   : > { %808 = vrot.lane.b32.xlu1 %v486_v39, %s4374_s12  ;;  %v533_v15 = vsel %vm372_vm0, %v8690_v46, %v8689_v22  ;;  %v487_v46 = vsel %vm348_vm2, %v4779_v7, %v4825_v25 }
 0x1f4   : > { %v5127_v54 = vpop.permute.xlu2 %628  ;;  %v5131_v51 = vpop.permute.xlu0 %734 }
 0x1f5   : > { %v5129_v47 = vpop.permute.xlu1 %724  ;;  %8677 = vst [vmem:[#allocation51_spill] sm:$0xff] %v5131_v51  ;;  %v8712_v51 = vld [vmem:[#allocation22_spill] sm:$0xff] }
 0x1f6   : > { %8676 = vst [vmem:[#allocation50_spill] sm:$0xff] %v5129_v47  ;;  %v3800_v47 = vld [vmem:[%s4528_s15 + $0x44] sm:$0xf0] }
 0x1fa   : > { %824 = vrot.lane.b32.xlu0 %v508_v57, %s4374_s12  ;;  %768 = vrot.lane.b32.xlu2 %v4764_v62, %s4374_s12  ;;  %v491_v62 = vsel %vm348_vm2, %v4830_v26, %v4802_v16  ;;  %v8681_v26 = vld [vmem:[#allocation20_spill] sm:$0xff] }
 0x1fb   : > { %814 = vrot.lane.b32.xlu1 %v4821_v23, %s4374_s12  ;;  %v509_v33 = vsel %vm360_vm3, %v4836_v32, %v8681_v26  ;;  %v8686_v32 = vld [vmem:[#allocation27_spill] sm:$0xff] }
 0x1fc   : > { %v5141_v59 = vpop.permute.xlu2 %634  ;;  %v5145_v35 = vpop.permute.xlu0 %740 }
 0x1fd   : > { %v5143_v18 = vpop.permute.xlu1 %730  ;;  %8679 = vst [vmem:[#allocation53_spill] sm:$0xff] %v5145_v35 }
 0x1fe   : > { %8678 = vst [vmem:[#allocation52_spill] sm:$0xff] %v5143_v18 }
 0x202   : > { %830 = vrot.lane.b32.xlu0 %v4844_v61, %s4374_s12  ;;  %774 = vrot.lane.b32.xlu2 %v413_v56, %s4374_s12 }
 0x203   : > { %820 = vrot.lane.b32.xlu1 %v491_v62, %s4374_s12  ;;  %v8693_v62 = vld [vmem:[#allocation17_spill] sm:$0xff] }
 0x204   : > { %v5157_v23 = vpop.permute.xlu2 %640  ;;  %v5161_v30 = vpop.permute.xlu0 %746 }
 0x205   : > { %v5159_v34 = vpop.permute.xlu1 %736  ;;  %8680 = vst [vmem:[#allocation54_spill] sm:$0xff] %v5161_v30 }
 0x20a   : > { %836 = vrot.lane.b32.xlu0 %v513_v2, %s4374_s12  ;;  %780 = vrot.lane.b32.xlu2 %v424_v8, %s4374_s12  ;;  %v8694_v2 = vld [vmem:[#allocation26_spill] sm:$0xff] }
 0x20b   : > { %826 = vrot.lane.b32.xlu1 %v509_v33, %s4374_s12 }
 0x20c   : > { %v5175_v58 = vpop.permute.xlu2 %674  ;;  %v5179_v10 = vpop.permute.xlu0 %752 }
 0x20d   : > { %8682 = vst [vmem:[#allocation20_spill] sm:$0xff] %v5175_v58  ;;  %v5177_v0 = vpop.permute.xlu1 %742 }
 0x20e   : > { %8683 = vst [vmem:[#allocation55_spill] sm:$0xff] %v5177_v0 }
 0x212   : > { %842 = vrot.lane.b32.xlu0 %v8686_v32, %s4374_s12  ;;  %786 = vrot.lane.b32.xlu2 %v435_v12, %s4374_s12 }
 0x213   : > { %832 = vrot.lane.b32.xlu1 %v511_v55, %s4374_s12  ;;  %v8698_v55 = vld [vmem:[#allocation31_spill] sm:$0xff] }
 0x214   : > { %v5191_v20 = vpop.permute.xlu2 %720  ;;  %v5195_v63 = vpop.permute.xlu0 %758 }
 0x215   : > { %v5193_v53 = vpop.permute.xlu1 %748  ;;  %8688 = vst [vmem:[#allocation24_spill] sm:$0xff] %v5195_v63 }
 0x216   : > { %8687 = vst [vmem:[#allocation21_spill] sm:$0xff] %v5193_v53 }
 0x21a   : > { %848 = vrot.lane.b32.xlu0 %v533_v15, %s4374_s12  ;;  %792 = vrot.lane.b32.xlu2 %v8691_v17, %s4374_s12  ;;  %v8701_v15 = vld [vmem:[#allocation38_spill] sm:$0xff]  ;;  %v8702_v17 = vld [vmem:[#allocation32_spill] sm:$0xff] }
 0x21b   : > { %838 = vrot.lane.b32.xlu1 %v4846_v1, %s4374_s12  ;;  %v8696_v1 = vld [vmem:[#allocation39_spill] sm:$0xff] }
 0x21c   : > { %v5205_v39 = vpop.permute.xlu2 %726  ;;  %v5209_v56 = vpop.permute.xlu0 %764 }
 0x21d   : > { %8692 = vst [vmem:[#allocation27_spill] sm:$0xff] %v5205_v39  ;;  %v5207_v57 = vpop.permute.xlu1 %754  ;;  %v8711_v39 = vld [vmem:[#allocation25_spill] sm:$0xff] }
 0x222   : > { %854 = vrot.lane.b32.xlu0 %v4883_v27, %s4374_s12  ;;  %798 = vrot.lane.b32.xlu2 %v8693_v62, %s4374_s12 }
 0x223   : > { %844 = vrot.lane.b32.xlu1 %v8694_v2, %s4374_s12 }
 0x224   : > { %v5217_v8 = vpop.permute.xlu2 %732  ;;  %v5219_v12 = vpop.permute.xlu0 %770 }
 0x225   : > { %8695 = vst [vmem:[#allocation28_spill] sm:$0xff] %v5217_v8  ;;  %v761_v33 = vpop.permute.xlu1 %760  ;;  %v4055_v8 = vld [vmem:[%s4528_s15 + $0x40] sm:$0xf0] }
 0x22a   : > { %860 = vrot.lane.b32.xlu0 %v8696_v1, %s4374_s12  ;;  %804 = vrot.lane.b32.xlu2 %v8697_v3, %s4374_s12  ;;  %v8704_v3 = vld [vmem:[#allocation19_spill] sm:$0xff] }
 0x22b   : > { %850 = vrot.lane.b32.xlu1 %v8698_v55, %s4374_s12  ;;  %v489_v55 = vsel %vm348_vm2, %v8704_v3, %v4834_v31  ;;  %v8707_v31 = vld [vmem:[#allocation44_spill] sm:$0xff] }
 0x22c   : > { %v5227_v27 = vpop.permute.xlu2 %738  ;;  %v777_v22 = vpop.permute.xlu0 %776 }
 0x22d   : > { %8699 = vst [vmem:[#allocation30_spill] sm:$0xff] %v5227_v27  ;;  %v5229_v32 = vpop.permute.xlu1 %766 }
 0x22e   : > { %8700 = vst [vmem:[#allocation16_spill] sm:$0xff] %v5229_v32 }
 0x232   : > { %866 = vrot.lane.b32.xlu0 %v8701_v15, %s4374_s12  ;;  %810 = vrot.lane.b32.xlu2 %v487_v46, %s4374_s12 }
 0x233   : > { %856 = vrot.lane.b32.xlu1 %v8702_v17, %s4374_s12  ;;  %v580_v17 = vsel %vm398_vm4, %v8707_v31, %v4930_v13  ;;  %v510_v13 = vsel %vm360_vm3, %v8681_v26, %v4844_v61  ;;  %v600_v61 = vsel %vm410_vm5, %v4957_v19, %v4955_v11  ;;  %v8710_v26 = vld [vmem:[#allocation33_spill] sm:$0xff] }
 0x234   : > { %v745_v62 = vpop.permute.xlu2 %744  ;;  %v5241_v1 = vpop.permute.xlu0 %782 }
 0x235   : > { %v5239_v2 = vpop.permute.xlu1 %772  ;;  %8703 = vst [vmem:[#allocation17_spill] sm:$0xff] %v5241_v1 }
 0x23a   : > { %872 = vrot.lane.b32.xlu0 %v8705_v38, %s4374_s12  ;;  %816 = vrot.lane.b32.xlu2 %v489_v55, %s4374_s12 }
 0x23b   : > { %862 = vrot.lane.b32.xlu1 %v4901_v37, %s4374_s12  ;;  %v8708_v37 = vld [vmem:[#allocation42_spill] sm:$0xff] }
 0x23c   : > { %v5251_v7 = vpop.permute.xlu2 %750  ;;  %v5255_v46 = vpop.permute.xlu0 %788 }
 0x23d   : > { %8706 = vst [vmem:[#allocation26_spill] sm:$0xff] %v5251_v7  ;;  %v5253_v25 = vpop.permute.xlu1 %778 }
 0x23e   : > { %v958_v15 = vsel %vm936_vm8, %v777_v22, %v5253_v25  ;;  %v582_v22 = vsel %vm398_vm4, %v4943_v21, %v4941_v24 }
 0x23f   : > { %1106 = vmatpush.bf16.msra.mxu0 %v958_v15  ;;  %v8709_v15 = vld [vmem:[#allocation29_spill] sm:$0xff] }
 0x242   : > { %878 = vrot.lane.b32.xlu0 %v580_v17, %s4374_s12  ;;  %822 = vrot.lane.b32.xlu2 %v4802_v16, %s4374_s12  ;;  %v578_v16 = vsel %vm398_vm4, %v8705_v38, %v8709_v15  ;;  %v512_v38 = vsel %vm360_vm3, %v8684_v14, %v4848_v6  ;;  %v530_v6 = vsel %vm372_vm0, %v8712_v51, %v8711_v39  ;;  %v8713_v14 = vld [vmem:[#allocation37_spill] sm:$0xff] }
 0x243   : > { %868 = vrot.lane.b32.xlu1 %v8708_v37, %s4374_s12  ;;  %v605_v39 = vsel %vm410_vm5, %v4975_v4, %v4985_v43 }
 0x244   : > { %v5267_v3 = vpop.permute.xlu2 %756  ;;  %v5271_v58 = vpop.permute.xlu0 %794 }
 0x245   : > { %v5269_v55 = vpop.permute.xlu1 %784 }
 0x24a   : > { %884 = vrot.lane.b32.xlu0 %v582_v22, %s4374_s12  ;;  %828 = vrot.lane.b32.xlu2 %v510_v13, %s4374_s12 }
 0x24b   : > { %874 = vrot.lane.b32.xlu1 %v578_v16, %s4374_s12 }
 0x24c   : > { %v5285_v17 = vpop.permute.xlu2 %762  ;;  %v5289_v28 = vpop.permute.xlu0 %800 }
 0x24d   : > { %v5287_v37 = vpop.permute.xlu1 %790 }
 0x252   : > { %890 = vrot.lane.b32.xlu0 %v600_v61, %s4374_s12  ;;  %834 = vrot.lane.b32.xlu2 %v512_v38, %s4374_s12  ;;  %v583_v61 = vsel %vm398_vm4, %v4941_v24, %v8713_v14  ;;  %v952_v38 = vsel %vm936_vm8, %v761_v33, %v5285_v17  ;;  %v949_v24 = vsel %vm936_vm8, %v5179_v10, %v5207_v57  ;;  %v8716_v14 = vld [vmem:[#allocation23_spill] sm:$0xff] }
 0x253   : > { %880 = vrot.lane.b32.xlu1 %v8710_v26, %s4374_s12 }
 0x254   : > { %v769_v22 = vpop.permute.xlu2 %768  ;;  %v5303_v16 = vpop.permute.xlu0 %806 }
 0x255   : > { %v5301_v13 = vpop.permute.xlu1 %796  ;;  %v955_v50 = vsel %vm936_vm8, %v769_v22, %v5219_v12 }
 0x256   : > { %1107 = vmatpush.bf16.msra.mxu0 %v955_v50 }
 0x25a   : > { %896 = vrot.lane.b32.xlu0 %v4968_v60, %s4374_s12  ;;  %840 = vrot.lane.b32.xlu2 %v530_v6, %s4374_s12  ;;  %v8715_v6 = vld [vmem:[#allocation41_spill] sm:$0xff] }
 0x25b   : > { %886 = vrot.lane.b32.xlu1 %v583_v61, %s4374_s12  ;;  %1108 = vmatpush.bf16.msra.mxu0 %v952_v38  ;;  %v601_v33 = vsel %vm410_vm5, %v4955_v11, %v8715_v6  ;;  %v946_v61 = vsel %vm936_vm8, %v745_v62, %v5161_v30  ;;  %v943_v11 = vsel %vm936_vm8, %v5159_v34, %v5227_v27  ;;  %v3734_v34 = vld [vmem:[#allocation7] sm:$0xf] }
 0x25c   : > { %v5319_v50 = vpop.permute.xlu2 %774  ;;  %v5323_v51 = vpop.permute.xlu0 %812  ;;  %v647_v30 = vsel %vm382_vm1, %v5071_v42, %v5141_v59 }
 0x25d   : > { %8714 = vst [vmem:[#allocation39_spill] sm:$0xff] %v5319_v50  ;;  %v5321_v22 = vpop.permute.xlu1 %802 }
 0x25f   : > { %1109 = vmatpush.bf16.msra.mxu0 %v949_v24  ;;  %v643_v24 = vsel %vm382_vm1, %v5043_v5, %v5109_v29 }
 0x262   : > { %902 = vrot.lane.b32.xlu0 %v605_v39, %s4374_s12  ;;  %846 = vrot.lane.b32.xlu2 %v8716_v14, %s4374_s12  ;;  %v8717_v39 = vld [vmem:[#allocation43_spill] sm:$0xff]  ;;  %v940_v14 = vsel %vm936_vm8, %v5113_v44, %v5143_v18  ;;  %v8720_v44 = vld [vmem:[#allocation34_spill] sm:$0xff] }
 0x263   : > { %892 = vrot.lane.b32.xlu1 %v601_v33, %s4374_s12  ;;  %1110 = vmatpush.bf16.msra.mxu0 %v946_v61  ;;  %v603_v62 = vsel %vm410_vm5, %v4968_v60, %v8717_v39  ;;  %v8718_v33 = vld [vmem:[#allocation35_spill] sm:$0xff]  ;;  %v4046_v61 = vld [vmem:[#allocation7 + $0xc] sm:$0xf0]  ;;  %v937_v60 = vsel %vm936_vm8, %v5191_v20, %v5097_v41 }
 0x264   : > { %v5340_v10 = vpop.permute.xlu2 %780  ;;  %v5344_v43 = vpop.permute.xlu0 %818  ;;  %v3798_v18 = vld [vmem:[%s4528_s15 + $0x30] sm:$0xf] }
 0x265   : > { %v5342_v38 = vpop.permute.xlu1 %808 }
 0x267   : > { %1111 = vmatpush.bf16.msra.mxu0 %v943_v11 }
 0x26a   : > { %908 = vrot.lane.b32.xlu0 %v643_v24, %s4374_s12  ;;  %852 = vrot.lane.b32.xlu2 %v8718_v33, %s4374_s12  ;;  %v5371_v24 = vor.u32 %v4046_v61, %v3734_v34  ;;  %v8721_v34 = vld [vmem:[#allocation36_spill] sm:$0xff] }
 0x26b   : > { %898 = vrot.lane.b32.xlu1 %v603_v62, %s4374_s12  ;;  %1112 = vmatpush.bf16.msra.mxu0 %v940_v14  ;;  %v644_v62 = vsel %vm382_vm1, %v5045_v49, %v5059_v52  ;;  %v3750_v61 = vld [vmem:[#allocation7 + $0x20] sm:$0xf] }
 0x26c   : > { %v5362_v11 = vpop.permute.xlu2 %786  ;;  %v5366_v7 = vpop.permute.xlu0 %824  ;;  %8719 = vst [vmem:[#allocation18_spill] sm:$0xff] %v5371_v24 }
 0x26d   : > { %v5364_v0 = vpop.permute.xlu1 %814 }
 0x26f   : > { %1113 = vmatpush.bf16.msra.mxu0 %v937_v60  ;;  %v4050_v60 = vld [vmem:[#allocation7 + $0x2c] sm:$0xf0] }
 0x270   : > { %v5400_v32 = vor.u32 %v4050_v60, %v3750_v61 }
 0x272   : > { %1114 = vmatmul.bf16.vlgmr.msra.gmra.mxu0 %v5371_v24  ;;  %858 = vrot.lane.b32.xlu2 %v8720_v44, %s4374_s12  ;;  %8722 = vst [vmem:[#allocation31_spill] sm:$0xff] %v5400_v32  ;;  %v4052_v24 = vld [vmem:[%s4528_s15 + $0x2c] sm:$0xf] }
 0x273   : > { %904 = vrot.lane.b32.xlu1 %v5031_v36, %s4374_s12  ;;  %914 = vrot.lane.b32.xlu0 %v644_v62, %s4374_s12 }
 0x274   : > { %v5382_v33 = vpop.permute.xlu2 %792  ;;  %v5386_v14 = vpop.permute.xlu0 %830 }
 0x275   : > { %v5384_v20 = vpop.permute.xlu1 %820 }
 0x27a   : > { %864 = vrot.lane.b32.xlu2 %v8721_v34, %s4374_s12 }
 0x27b   : > { %910 = vrot.lane.b32.xlu1 %v5109_v29, %s4374_s12  ;;  %920 = vrot.lane.b32.xlu0 %v5061_v48, %s4374_s12  ;;  %v645_v29 = vsel %vm382_vm1, %v5059_v52, %v5127_v54  ;;  %v649_v52 = vsel %vm382_vm1, %v5085_v40, %v5157_v23 }
 0x27c   : > { %v5394_v44 = vpop.permute.xlu2 %798  ;;  %v5398_v63 = vpop.permute.xlu0 %836 }
 0x27d   : > { %v5396_v62 = vpop.permute.xlu1 %826 }
 0x282   : > { %1119 = vmatmul.bf16.gmra.mxu0 %v5400_v32  ;;  %870 = vrot.lane.b32.xlu2 %v4922_v9, %s4374_s12  ;;  %v579_v32 = vsel %vm398_vm4, %v8709_v15, %v8707_v31  ;;  %v646_v9 = vsel %vm382_vm1, %v5061_v48, %v5071_v42  ;;  %v3792_v31 = vld [vmem:[%s4528_s15 + $0x3c] sm:$0xf0]  ;;  %v581_v48 = vsel %vm398_vm4, %v8710_v26, %v4943_v21 }
 0x283   : > { %916 = vrot.lane.b32.xlu1 %v645_v29, %s4374_s12  ;;  %926 = vrot.lane.b32.xlu0 %v5141_v59, %s4374_s12  ;;  %v5437_v50 = vor.u32 %v4052_v24, %v3792_v31  ;;  %v3790_v24 = vld [vmem:[%s4528_s15 + $0x28] sm:$0xf] }
 0x284   : > { %v5411_v34 = vpop.permute.xlu2 %804  ;;  %v5415_v60 = vpop.permute.xlu0 %842 }
 0x285   : > { %v5413_v61 = vpop.permute.xlu1 %832 }
 0x28a   : > { %876 = vrot.lane.b32.xlu2 %v579_v32, %s4374_s12 }
 0x28b   : > { %922 = vrot.lane.b32.xlu1 %v646_v9, %s4374_s12  ;;  %932 = vrot.lane.b32.xlu0 %v649_v52, %s4374_s12  ;;  %v4054_v52 = vld [vmem:[%s4528_s15 + $0x38] sm:$0xf0] }
 0x28c   : > { %v5429_v29 = vpop.permute.xlu2 %810  ;;  %v5435_v32 = vpop.permute.xlu0 %848  ;;  %v5458_v26 = vor.u32 %v4054_v52, %v3790_v24  ;;  %v5478_v52 = vor.u32 %v4055_v8, %v3798_v18  ;;  %v604_v18 = vsel %vm410_vm5, %v8717_v39, %v4975_v4  ;;  %v642_v4 = vsel %vm382_vm1, %v5031_v36, %v5043_v5 }
 0x28d   : > { %v5433_v15 = vpop.permute.xlu1 %838  ;;  %v974_v5 = vsel %vm936_vm8, %v5344_v43, %v5384_v20 }
 0x28e   : > { %8724 = vst [vmem:[#allocation32_spill] sm:$0xff] %v5458_v26 }
 0x292   : > { %882 = vrot.lane.b32.xlu2 %v581_v48, %s4374_s12  ;;  %v4053_v48 = vld [vmem:[%s4528_s15 + $0x34] sm:$0xf] }
 0x293   : > { %1431 = vrot.lane.b32.xlu0 %v5437_v50, %s4365_s24  ;;  %928 = vrot.lane.b32.xlu1 %v5073_v45, %s4374_s12  ;;  %v5476_v24 = vor.u32 %v4053_v48, %v3800_v47 }
 0x294   : > { %v5447_v9 = vpop.permute.xlu2 %816  ;;  %v5453_v1 = vpop.permute.xlu0 %854 }
 0x295   : > { %v5451_v31 = vpop.permute.xlu1 %844  ;;  %8723 = vst [vmem:[#allocation38_spill] sm:$0xff] %v5453_v1 }
 0x296   : > { %v983_v21 = vsel %vm936_vm8, %v5415_v60, %v5451_v31 }
 0x297   : > { %1201 = vmatpush.bf16.msrb.mxu0 %v983_v21 }
 0x29a   : > { %888 = vrot.lane.b32.xlu2 %v4957_v19, %s4374_s12  ;;  %v8725_v19 = vld [vmem:[#allocation45_spill] sm:$0xff] }
 0x29b   : > { %1440 = vrot.lane.b32.xlu0 %v5458_v26, %s4366_s16  ;;  %934 = vrot.lane.b32.xlu1 %v5157_v23, %s4374_s12  ;;  %v602_v35 = vsel %vm410_vm5, %v8715_v6, %v8725_v19 }
 0x29c   : > { %v5467_v41 = vpop.permute.xlu2 %822  ;;  %v5474_v21 = vpop.permute.xlu0 %860 }
 0x29d   : > { %v5472_v27 = vpop.permute.xlu1 %850 }
 0x2a2   : > { %894 = vrot.lane.b32.xlu2 %v602_v35, %s4374_s12 }
 0x2a3   : > { %1446 = vrot.lane.b32.xlu0 %v5476_v24, %s4366_s16  ;;  %1433 = vrot.lane.b32.xlu1 %v5478_v52, %s4365_s24 }
 0x2a4   : > { %v5488_v23 = vpop.permute.xlu2 %828  ;;  %v5492_v47 = vpop.permute.xlu0 %866 }
 0x2a5   : > { %v5490_v1 = vpop.permute.xlu1 %856  ;;  %v977_v39 = vsel %vm936_vm8, %v5396_v62, %v5488_v23 }
 0x2aa   : > { %900 = vrot.lane.b32.xlu2 %v604_v18, %s4374_s12 }
 0x2ab   : > { %1455 = vrot.lane.b32.xlu0 %v5478_v52, %s4367_s30  ;;  %1442 = vrot.lane.b32.xlu1 %v5437_v50, %s4366_s16 }
 0x2ac   : > { %v835_v35 = vpop.permute.xlu2 %834  ;;  %v5504_v6 = vpop.permute.xlu0 %872 }
 0x2ad   : > { %v5502_v8 = vpop.permute.xlu1 %862  ;;  %v980_v48 = vsel %vm936_vm8, %v835_v35, %v5398_v63 }
 0x2ae   : > { %1202 = vmatpush.bf16.msrb.mxu0 %v980_v48 }
 0x2b2   : > { %906 = vrot.lane.b32.xlu2 %v642_v4, %s4374_s12  ;;  %1203 = vmatpush.bf16.msrb.mxu0 %v977_v39  ;;  %v979_v4 = vsel %vm936_vm8, %v5413_v61, %v835_v35  ;;  %v968_v35 = vsel %vm936_vm8, %v5321_v22, %v5411_v34 }
 0x2b3   : > { %1464 = vrot.lane.b32.xlu0 %v5478_v52, %s4368_s9  ;;  %1451 = vrot.lane.b32.xlu1 %v5458_v26, %s4367_s30 }
 0x2b4   : > { %v841_v19 = vpop.permute.xlu2 %840  ;;  %v5521_v48 = vpop.permute.xlu0 %878 }
 0x2b5   : > { %v5519_v18 = vpop.permute.xlu1 %868  ;;  %v982_v36 = vsel %vm936_vm8, %v841_v19, %v5415_v60  ;;  %v971_v60 = vsel %vm936_vm8, %v5429_v29, %v5323_v51 }
 0x2b6   : > { %1125 = vmatpush.bf16.msra.mxu1 %v982_v36  ;;  %1204 = vmatpush.bf16.msrb.mxu0 %v974_v5  ;;  %v973_v36 = vsel %vm936_vm8, %v5447_v9, %v5344_v43  ;;  %v3806_v5 = vld [vmem:[%s4528_s15 + $0x38] sm:$0xf] }
 0x2ba   : > { %912 = vrot.lane.b32.xlu2 %v5045_v49, %s4374_s12  ;;  %1126 = vmatpush.bf16.msra.mxu1 %v979_v4  ;;  %v976_v49 = vsel %vm936_vm8, %v5366_v7, %v5396_v62  ;;  %v965_v7 = vsel %vm936_vm8, %v5271_v58, %v5301_v13  ;;  %v4056_v4 = vld [vmem:[%s4528_s15 + $0x48] sm:$0xf0] }
 0x2bb   : > { %1477 = vrot.lane.b32.xlu0 %v5478_v52, %s4369_s10  ;;  %1457 = vrot.lane.b32.xlu1 %v5476_v24, %s4367_s30 }
 0x2bc   : > { %1205 = vmatpush.bf16.msrb.mxu0 %v971_v60  ;;  %v847_v39 = vpop.permute.xlu2 %846  ;;  %v5541_v61 = vpop.permute.xlu0 %884  ;;  %v962_v60 = vsel %vm936_vm8, %v5362_v11, %v5255_v46 }
 0x2bd   : > { %v5539_v19 = vpop.permute.xlu1 %874 }
 0x2be   : > { %1127 = vmatpush.bf16.msra.mxu1 %v976_v49  ;;  %v5575_v49 = vor.u32 %v4056_v4, %v3806_v5 }
 0x2c0   : > { %1206 = vmatpush.bf16.msrb.mxu0 %v968_v35  ;;  %v4044_v35 = vld [vmem:[#allocation7 + $0x4] sm:$0xf] }
 0x2c2   : > { %918 = vrot.lane.b32.xlu2 %v5127_v54, %s4374_s12  ;;  %1128 = vmatpush.bf16.msra.mxu1 %v973_v36  ;;  %v970_v54 = vsel %vm936_vm8, %v5342_v38, %v5429_v29  ;;  %v3736_v36 = vld [vmem:[#allocation7 + $0x10] sm:$0xf0]  ;;  %v967_v38 = vsel %vm936_vm8, %v5289_v28, %v5321_v22  ;;  %v978_v22 = vsel %vm936_vm8, %v5488_v23, %v5386_v14 }
 0x2c3   : > { %1486 = vrot.lane.b32.xlu0 %v5437_v50, %s4370_s17  ;;  %1466 = vrot.lane.b32.xlu1 %v5476_v24, %s4368_s9  ;;  %v5586_v29 = vor.u32 %v4044_v35, %v3736_v36  ;;  %v972_v14 = vsel %vm936_vm8, %v5323_v51, %v5364_v0  ;;  %v3810_v0 = vld [vmem:[%s4538_s27 + $0x50] sm:$0xf]  ;;  %v4059_v51 = vld [vmem:[%s4538_s27 + $0x60] sm:$0xf0] }
 0x2c4   : > { %1207 = vmatpush.bf16.msrb.mxu0 %v965_v7  ;;  %v5561_v62 = vpop.permute.xlu2 %852  ;;  %v5567_v9 = vpop.permute.xlu0 %890  ;;  %v984_v7 = vsel %vm936_vm8, %v5451_v31, %v847_v39  ;;  %v981_v31 = vsel %vm936_vm8, %v5398_v63, %v5433_v15  ;;  %v648_v63 = vsel %vm382_vm1, %v5073_v45, %v5085_v40  ;;  %v961_v15 = vsel %vm936_vm8, %v5269_v55, %v5362_v11  ;;  %v4048_v55 = vld [vmem:[#allocation7 + $0x24] sm:$0xf]  ;;  %v3752_v11 = vld [vmem:[#allocation7 + $0x30] sm:$0xf0] }
 0x2c5   : > { %v5565_v43 = vpop.permute.xlu1 %880  ;;  %v5649_v4 = vor.u32 %v4059_v51, %v3810_v0  ;;  %v4063_v51 = vld [vmem:[%s4538_s27 + $0x84] sm:$0xf] }
 0x2c6   : > { %1129 = vmatpush.bf16.msra.mxu1 %v970_v54  ;;  %v966_v54 = vsel %vm936_vm8, %v5301_v13, %v5394_v44  ;;  %v4058_v13 = vld [vmem:[%s4538_s27 + $0x5c] sm:$0xf]  ;;  %v3820_v44 = vld [vmem:[%s4538_s27 + $0x6c] sm:$0xf0] }
 0x2c7   : > { %8726 = vst [vmem:[#allocation19_spill] sm:$0xff] %v5649_v4  ;;  %v5669_v36 = vor.u32 %v4058_v13, %v3820_v44 }
 0x2c8   : > { %1208 = vmatpush.bf16.msrb.mxu0 %v962_v60 }
 0x2c9   : > { %8727 = vst [vmem:[#allocation40_spill] sm:$0xff] %v5669_v36 }
 0x2ca   : > { %924 = vrot.lane.b32.xlu2 %v647_v30, %s4374_s12  ;;  %1130 = vmatpush.bf16.msra.mxu1 %v967_v38  ;;  %v964_v30 = vsel %vm936_vm8, %v5382_v33, %v5271_v58  ;;  %v975_v58 = vsel %vm936_vm8, %v5384_v20, %v5467_v41  ;;  %v3755_v41 = vor.u32 %v4048_v55, %v3752_v11  ;;  %v3834_v38 = vld [vmem:[%s4538_s27 + $0x80] sm:$0xf]  ;;  %v4064_v55 = vld [vmem:[%s4538_s27 + $0x88] sm:$0xf0] }
 0x2cb   : > { %1492 = vrot.lane.b32.xlu0 %v5575_v49, %s4370_s17  ;;  %1479 = vrot.lane.b32.xlu1 %v5476_v24, %s4369_s10  ;;  %v969_v20 = vsel %vm936_vm8, %v5411_v34, %v5303_v16  ;;  %v963_v16 = vsel %vm936_vm8, %v5255_v46, %v5287_v37  ;;  %v4057_v46 = vld [vmem:[%s4538_s27 + $0x54] sm:$0xf] }
 0x2cc   : > { %1277 = vmatpush.bf16.msra.mxu0 %v984_v7  ;;  %v5595_v42 = vpop.permute.xlu2 %858  ;;  %v5600_v59 = vpop.permute.xlu0 %896  ;;  %v3812_v7 = vld [vmem:[%s4538_s27 + $0x64] sm:$0xf0] }
 0x2cd   : > { %1209 = vmatmul.bf16.vlgmr.msrb.gmra.mxu0 %v5586_v29  ;;  %v5598_v28 = vpop.permute.xlu1 %886 }
 0x2ce   : > { %1131 = vmatpush.bf16.msra.mxu1 %v964_v30 }
 0x2d0   : > { %1278 = vmatpush.bf16.msra.mxu0 %v981_v31  ;;  %v4065_v31 = vld [vmem:[%s4538_s27 + $0x90] sm:$0xf0] }
 0x2d2   : > { %930 = vrot.lane.b32.xlu2 %v648_v63, %s4374_s12  ;;  %1132 = vmatpush.bf16.msra.mxu1 %v961_v15  ;;  %v5688_v63 = vor.u32 %v4057_v46, %v3812_v7  ;;  %v5690_v15 = vor.u32 %v4065_v31, %v3834_v38  ;;  %v4060_v7 = vld [vmem:[%s4538_s27 + $0x68] sm:$0xf0] }
 0x2d3   : > { %1501 = vrot.lane.b32.xlu0 %v5476_v24, %s4371_s23  ;;  %1488 = vrot.lane.b32.xlu1 %v5478_v52, %s4370_s17 }
 0x2d4   : > { %1279 = vmatpush.bf16.msra.mxu0 %v978_v22  ;;  %v5622_v33 = vpop.permute.xlu2 %864  ;;  %v5626_v40 = vpop.permute.xlu0 %902  ;;  %8728 = vst [vmem:[#allocation44_spill] sm:$0xff] %v5688_v63 }
 0x2d5   : > { %v5624_v45 = vpop.permute.xlu1 %892  ;;  %1133 = vmatmul.bf16.vlgmr.msra.gmra.mxu1 %v5586_v29  ;;  %8729 = vst [vmem:[#allocation42_spill] sm:$0xff] %v5690_v15 }
 0x2d8   : > { %1280 = vmatpush.bf16.msra.mxu0 %v975_v58  ;;  %v3826_v58 = vld [vmem:[%s4538_s27 + $0x78] sm:$0xf] }
 0x2da   : > { %1429 = vrot.lane.b32.xlu2 %v5458_v26, %s4365_s24 }
 0x2db   : > { %1510 = vrot.lane.b32.xlu0 %v5478_v52, %s4372_s26  ;;  %1497 = vrot.lane.b32.xlu1 %v5437_v50, %s4371_s23 }
 0x2dc   : > { %1281 = vmatpush.bf16.msra.mxu0 %v972_v14  ;;  %v5641_v23 = vpop.permute.xlu2 %870  ;;  %v5647_v5 = vpop.permute.xlu0 %908 }
 0x2dd   : > { %1214 = vmatmul.bf16.gmra.mxu0 %v3755_v41  ;;  %v5645_v39 = vpop.permute.xlu1 %898 }
 0x2de   : > { %v1003_v53 = vsel %vm936_vm8, %v5600_v59, %v5645_v39 }
 0x2e0   : > { %1282 = vmatpush.bf16.msra.mxu0 %v969_v20  ;;  %v5704_v20 = vor.u32 %v4064_v55, %v3826_v58 }
 0x2e2   : > { %1435 = vrot.lane.b32.xlu2 %v5476_v24, %s4365_s24  ;;  %8730 = vst [vmem:[#allocation29_spill] sm:$0xff] %v5704_v20 }
 0x2e3   : > { %1551 = vrot.lane.b32.xlu0 %v5649_v4, %s4365_s24  ;;  %1503 = vrot.lane.b32.xlu1 %v5575_v49, %s4371_s23 }
 0x2e4   : > { %1283 = vmatpush.bf16.msra.mxu0 %v966_v54  ;;  %v5663_v34 = vpop.permute.xlu2 %876  ;;  %v3836_v54 = vld [vmem:[%s4538_s27 + $0x94] sm:$0xf0] }
 0x2e5   : > { %v905_v60 = vpop.permute.xlu1 %904  ;;  %v5667_v35 = vpop.permute.xlu0 %914  ;;  %1138 = vmatmul.bf16.gmra.mxu1 %v3755_v41  ;;  %v5720_v44 = vor.u32 %v4063_v51, %v3836_v54  ;;  %v4062_v51 = vld [vmem:[%s4538_s27 + $0x7c] sm:$0xf]  ;;  %v3828_v54 = vld [vmem:[%s4538_s27 + $0x8c] sm:$0xf0] }
 0x2e7   : > { %8731 = vst [vmem:[#allocation33_spill] sm:$0xff] %v5720_v44 }
 0x2e8   : > { %1284 = vmatpush.bf16.msra.mxu0 %v963_v16 }
 0x2ea   : > { %1444 = vrot.lane.b32.xlu2 %v5478_v52, %s4366_s16 }
 0x2eb   : > { %1557 = vrot.lane.b32.xlu0 %v5669_v36, %s4365_s24  ;;  %1512 = vrot.lane.b32.xlu1 %v5476_v24, %s4372_s26 }
 0x2ec   : > { %v5678_v37 = vpop.permute.xlu2 %882 }
 0x2ed   : > { %1285 = vmatmul.bf16.vlgmr.msra.gmra.mxu0 %v5586_v29  ;;  %v5684_v30 = vpop.permute.xlu1 %910  ;;  %v5686_v22 = vpop.permute.xlu0 %920 }
 0x2f2   : > { %1453 = vrot.lane.b32.xlu2 %v5437_v50, %s4367_s30 }
 0x2f3   : > { %1553 = vrot.lane.b32.xlu1 %v5688_v63, %s4365_s24  ;;  %1563 = vrot.lane.b32.xlu0 %v5690_v15, %s4365_s24 }
 0x2f4   : > { %v889_v29 = vpop.permute.xlu2 %888 }
 0x2f5   : > { %v5700_v11 = vpop.permute.xlu1 %916  ;;  %v5702_v14 = vpop.permute.xlu0 %926 }
 0x2fa   : > { %1462 = vrot.lane.b32.xlu2 %v5437_v50, %s4368_s9 }
 0x2fb   : > { %1559 = vrot.lane.b32.xlu1 %v5704_v20, %s4365_s24  ;;  %1575 = vrot.lane.b32.xlu0 %v5688_v63, %s4366_s16 }
 0x2fc   : > { %v5712_v0 = vpop.permute.xlu2 %894 }
 0x2fd   : > { %1290 = vmatmul.bf16.gmra.mxu0 %v3755_v41  ;;  %v5716_v16 = vpop.permute.xlu1 %922  ;;  %v5718_v13 = vpop.permute.xlu0 %932  ;;  %v3818_v41 = vld [vmem:[%s4538_s27 + $0x58] sm:$0xf] }
 0x2fe   : > { %v5736_v58 = vor.u32 %v4060_v7, %v3818_v41  ;;  %v5753_v7 = vor.u32 %v4062_v51, %v3828_v54  ;;  %v1001_v51 = vsel %vm936_vm8, %v5567_v9, %v5624_v45 }
 0x300   : > { %8733 = vst [vmem:[#allocation22_spill] sm:$0xff] %v5736_v58 }
 0x301   : > { %8734 = vst [vmem:[#allocation37_spill] sm:$0xff] %v5753_v7 }
 0x302   : > { %1475 = vrot.lane.b32.xlu2 %v5437_v50, %s4369_s10 }
 0x303   : > { %1565 = vrot.lane.b32.xlu1 %v5720_v44, %s4365_s24  ;;  %1581 = vrot.lane.b32.xlu0 %v5704_v20, %s4366_s16 }
 0x304   : > { %v5728_v46 = vpop.permute.xlu2 %900 }
 0x305   : > { %v5732_v38 = vpop.permute.xlu1 %928  ;;  %v5734_v31 = vpop.permute.xlu0 %1431 }
 0x306   : > { %8732 = vst [vmem:[#allocation25_spill] sm:$0xff] %v5734_v31 }
 0x30a   : > { %1481 = vrot.lane.b32.xlu2 %v5575_v49, %s4369_s10 }
 0x30b   : > { %1577 = vrot.lane.b32.xlu1 %v5736_v58, %s4366_s16  ;;  %1587 = vrot.lane.b32.xlu0 %v5720_v44, %s4366_s16 }
 0x30c   : > { %v907_v55 = vpop.permute.xlu2 %906 }
 0x30d   : > { %v5746_v26 = vpop.permute.xlu1 %934  ;;  %v5748_v20 = vpop.permute.xlu0 %1440  ;;  %v1006_v31 = vsel %vm936_vm8, %v905_v60, %v907_v55  ;;  %v1007_v41 = vsel %vm936_vm8, %v907_v55, %v5647_v5  ;;  %v1004_v60 = vsel %vm936_vm8, %v5645_v39, %v5728_v46  ;;  %v997_v39 = vsel %vm936_vm8, %v5565_v43, %v5678_v37 }
 0x30e   : > { %1144 = vmatpush.bf16.msra.mxu2 %v1006_v31  ;;  %1220 = vmatpush.bf16.msrb.mxu1 %v1007_v41  ;;  %v994_v41 = vsel %vm936_vm8, %v5504_v6, %v5539_v19  ;;  %v992_v6 = vsel %vm936_vm8, %v5492_v47, %v5519_v18 }
 0x312   : > { %1490 = vrot.lane.b32.xlu2 %v5476_v24, %s4370_s17  ;;  %1145 = vmatpush.bf16.msra.mxu2 %v1003_v53  ;;  %v1000_v53 = vsel %vm936_vm8, %v889_v29, %v5567_v9  ;;  %v998_v29 = vsel %vm936_vm8, %v5678_v37, %v5541_v61  ;;  %v991_v37 = vsel %vm936_vm8, %v5622_v33, %v5492_v47 }
 0x313   : > { %1583 = vrot.lane.b32.xlu1 %v5753_v7, %s4366_s16  ;;  %1599 = vrot.lane.b32.xlu0 %v5736_v58, %s4367_s30  ;;  %v985_v47 = vsel %vm936_vm8, %v5435_v32, %v5472_v27  ;;  %v1008_v32 = vsel %vm936_vm8, %v5647_v5, %v5684_v30  ;;  %v1012_v5 = vsel %vm936_vm8, %v5686_v22, %v5716_v16 }
 0x314   : > { %1221 = vmatpush.bf16.msrb.mxu1 %v1004_v60  ;;  %v5767_v31 = vpop.permute.xlu2 %912  ;;  %v995_v60 = vsel %vm936_vm8, %v5539_v19, %v5663_v34  ;;  %v1002_v22 = vsel %vm936_vm8, %v5624_v45, %v5712_v0  ;;  %v1010_v45 = vsel %vm936_vm8, %v5667_v35, %v5700_v11 }
 0x315   : > { %v5769_v55 = vpop.permute.xlu1 %1433  ;;  %v5771_v59 = vpop.permute.xlu0 %1446 }
 0x316   : > { %1146 = vmatpush.bf16.msra.mxu2 %v1000_v53 }
 0x318   : > { %1222 = vmatpush.bf16.msrb.mxu1 %v1001_v51  ;;  %v988_v51 = vsel %vm936_vm8, %v5490_v1, %v5595_v42  ;;  %v986_v1 = vsel %vm936_vm8, %v5472_v27, %v5561_v62  ;;  %v1005_v27 = vsel %vm936_vm8, %v5728_v46, %v5626_v40  ;;  %v4045_v40 = vld [vmem:[#allocation7 + $0xc] sm:$0xf]  ;;  %v3744_v46 = vld [vmem:[#allocation7 + $0x18] sm:$0xf0] }
 0x31a   : > { %1499 = vrot.lane.b32.xlu2 %v5478_v52, %s4371_s23  ;;  %1147 = vmatpush.bf16.msra.mxu2 %v997_v39  ;;  %v3742_v39 = vld [vmem:[#allocation7 + $0x8] sm:$0xf] }
 0x31b   : > { %1595 = vrot.lane.b32.xlu1 %v5649_v4, %s4367_s30  ;;  %1605 = vrot.lane.b32.xlu0 %v5753_v7, %s4367_s30 }
 0x31c   : > { %1223 = vmatpush.bf16.msrb.mxu1 %v998_v29  ;;  %v5790_v9 = vpop.permute.xlu2 %918  ;;  %v4047_v29 = vld [vmem:[#allocation7 + $0x14] sm:$0xf0] }
 0x31d   : > { %v5792_v54 = vpop.permute.xlu1 %1442  ;;  %v5794_v43 = vpop.permute.xlu0 %1455 }
 0x31e   : > { %1148 = vmatpush.bf16.msra.mxu2 %v994_v41  ;;  %v989_v41 = vsel %vm936_vm8, %v5595_v42, %v5474_v21 }
 0x320   : > { %1224 = vmatpush.bf16.msrb.mxu1 %v995_v60  ;;  %v5829_v60 = vor.u32 %v4047_v29, %v3742_v39  ;;  %v3842_v39 = vld [vmem:[%s4538_s27 + $0x60] sm:$0xf]  ;;  %v4061_v29 = vld [vmem:[%s4538_s27 + $0x70] sm:$0xf0] }
 0x321   : > { %v5890_v0 = vor.u32 %v4061_v29, %v3842_v39 }
 0x322   : > { %1508 = vrot.lane.b32.xlu2 %v5437_v50, %s4372_s26  ;;  %1149 = vmatpush.bf16.msra.mxu2 %v991_v37 }
 0x323   : > { %1601 = vrot.lane.b32.xlu1 %v5669_v36, %s4367_s30  ;;  %1617 = vrot.lane.b32.xlu0 %v5688_v63, %s4368_s9 }
 0x324   : > { %1225 = vmatpush.bf16.msrb.mxu1 %v992_v6  ;;  %v5814_v19 = vpop.permute.xlu2 %924 }
 0x325   : > { %v5816_v53 = vpop.permute.xlu1 %1451  ;;  %v5818_v33 = vpop.permute.xlu0 %1464  ;;  %v1013_v30 = vsel %vm936_vm8, %v5716_v16, %v5814_v19  ;;  %v1009_v16 = vsel %vm936_vm8, %v5767_v31, %v5667_v35  ;;  %v1017_v31 = vsel %vm936_vm8, %v5718_v13, %v5746_v26  ;;  %v956_v26 = vsel %vm936_vm8, %v5219_v12, %v5239_v2 }
 0x326   : > { %1150 = vmatpush.bf16.msra.mxu2 %v988_v51  ;;  %v953_v12 = vsel %vm936_vm8, %v5285_v17, %v5209_v56  ;;  %v950_v17 = vsel %vm936_vm8, %v5207_v57, %v5267_v3  ;;  %v8738_v57 = vld [vmem:[#allocation54_spill] sm:$0xff] }
 0x328   : > { %1226 = vmatpush.bf16.msrb.mxu1 %v989_v41 }
 0x32a   : > { %1514 = vrot.lane.b32.xlu2 %v5575_v49, %s4372_s26  ;;  %1151 = vmatpush.bf16.msra.mxu2 %v985_v47 }
 0x32b   : > { %1607 = vrot.lane.b32.xlu1 %v5690_v15, %s4367_s30  ;;  %1623 = vrot.lane.b32.xlu0 %v5753_v7, %s4368_s9 }
 0x32c   : > { %1227 = vmatpush.bf16.msrb.mxu1 %v986_v1  ;;  %v931_v42 = vpop.permute.xlu2 %930  ;;  %v959_v1 = vsel %vm936_vm8, %v5253_v25, %v5340_v10  ;;  %v999_v25 = vsel %vm936_vm8, %v5541_v61, %v5598_v28  ;;  %v996_v61 = vsel %vm936_vm8, %v5663_v34, %v5521_v48  ;;  %v1014_v28 = vsel %vm936_vm8, %v5814_v19, %v5702_v14 }
 0x32d   : > { %v5843_v37 = vpop.permute.xlu1 %1457  ;;  %v5845_v49 = vpop.permute.xlu0 %1477  ;;  %1152 = vmatmul.bf16.vlgmr.msra.gmra.mxu2 %v5829_v60  ;;  %v1015_v6 = vsel %vm936_vm8, %v5732_v38, %v931_v42  ;;  %v1016_v51 = vsel %vm936_vm8, %v931_v42, %v5718_v13  ;;  %v3758_v42 = vld [vmem:[#allocation7 + $0x28] sm:$0xf]  ;;  %v993_v48 = vsel %vm936_vm8, %v5519_v18, %v5641_v23  ;;  %v1011_v34 = vsel %vm936_vm8, %v5700_v11, %v5790_v9  ;;  %v4049_v18 = vld [vmem:[#allocation7 + $0x2c] sm:$0xf]  ;;  %v3760_v23 = vld [vmem:[#allocation7 + $0x38] sm:$0xf0] }
 0x32e   : > { %1168 = vmatpush.bf16.msra.mxu3 %v1015_v6  ;;  %1244 = vmatpush.bf16.msrb.mxu2 %v1016_v51  ;;  %v4051_v6 = vld [vmem:[#allocation7 + $0x34] sm:$0xf0]  ;;  %v990_v11 = vsel %vm936_vm8, %v5474_v21, %v5502_v8  ;;  %v8740_v8 = vld [vmem:[#allocation53_spill] sm:$0xff] }
 0x32f   : > { %1228 = vmatmul.bf16.vlgmr.msrb.gmra.mxu1 %v5829_v60  ;;  %v5902_v35 = vor.u32 %v4051_v6, %v3758_v42  ;;  %v8744_v42 = vld [vmem:[#allocation28_spill] sm:$0xff] }
 0x330   : > { %1296 = vmatpush.bf16.msra.mxu1 %v1008_v32  ;;  %v5885_v32 = vor.u32 %v4045_v40, %v3744_v46  ;;  %v8739_v46 = vld [vmem:[#allocation38_spill] sm:$0xff]  ;;  %v8745_v6 = vld [vmem:[#allocation52_spill] sm:$0xff] }
 0x331   : > { %v987_v21 = vsel %vm936_vm8, %v5561_v62, %v8739_v46  ;;  %v3846_v62 = vld [vmem:[%s4538_s27 + $0x88] sm:$0xf]  ;;  %v8755_v46 = vld [vmem:[#allocation24_spill] sm:$0xff] }
 0x332   : > { %1555 = vrot.lane.b32.xlu2 %v5736_v58, %s4365_s24  ;;  %1169 = vmatpush.bf16.msra.mxu3 %v1012_v5  ;;  %v5952_v5 = vor.u32 %v4049_v18, %v3760_v23 }
 0x333   : > { %1619 = vrot.lane.b32.xlu1 %v5736_v58, %s4368_s9  ;;  %1643 = vrot.lane.b32.xlu0 %v5688_v63, %s4369_s10 }
 0x334   : > { %1297 = vmatpush.bf16.msra.mxu1 %v1005_v27  ;;  %1245 = vmatpush.bf16.msrb.mxu2 %v1013_v30  ;;  %v5871_v38 = vpop.permute.xlu2 %1429  ;;  %v8737_v30 = vld [vmem:[#allocation21_spill] sm:$0xff] }
 0x335   : > { %v5875_v41 = vpop.permute.xlu1 %1466  ;;  %v5877_v47 = vpop.permute.xlu0 %1486  ;;  %v947_v40 = vsel %vm936_vm8, %v8738_v57, %v8737_v30  ;;  %v8753_v57 = vld [vmem:[#allocation16_spill] sm:$0xff] }
 0x336   : > { %1170 = vmatpush.bf16.msra.mxu3 %v1009_v16  ;;  %v4066_v16 = vld [vmem:[%s4538_s27 + $0x98] sm:$0xf0] }
 0x338   : > { %1298 = vmatpush.bf16.msra.mxu1 %v1002_v22  ;;  %1246 = vmatpush.bf16.msrb.mxu2 %v1010_v45  ;;  %v8741_v22 = vld [vmem:[#allocation30_spill] sm:$0xff] }
 0x339   : > { %3764 = vmatmul.msk.bf16.vlgmr.msra.gmra.mxu3 %vm1099_vm9, %v5885_v32  ;;  %v944_v39 = vsel %vm936_vm8, %v8741_v22, %v8740_v8  ;;  %v8756_v22 = vld [vmem:[#allocation29_spill] sm:$0xff] }
 0x33a   : > { %1182 = vmatpush.bf16.msrb.mxu3 %v959_v1  ;;  %1561 = vrot.lane.b32.xlu2 %v5753_v7, %s4365_s24 }
 0x33b   : > { %1625 = vrot.lane.b32.xlu1 %v5690_v15, %s4368_s9  ;;  %1649 = vrot.lane.b32.xlu0 %v5890_v0, %s4369_s10 }
 0x33c   : > { %1299 = vmatpush.bf16.msra.mxu1 %v999_v25  ;;  %1320 = vmatpush.bf16.msra.mxu2 %v1017_v31  ;;  %v5917_v13 = vpop.permute.xlu2 %1435  ;;  %v941_v31 = vsel %vm936_vm8, %v8745_v6, %v8744_v42  ;;  %v5984_v25 = vor.u32 %v4066_v16, %v3846_v62  ;;  %v8758_v62 = vld [vmem:[#allocation26_spill] sm:$0xff] }
 0x33d   : > { %v5919_v51 = vpop.permute.xlu1 %1479  ;;  %v5921_v27 = vpop.permute.xlu0 %1492  ;;  %1157 = vmatmul.bf16.gmra.mxu2 %v5902_v35 }
 0x33e   : > { %1183 = vmatpush.bf16.msrb.mxu3 %v956_v26  ;;  %8735 = vst [vmem:[#allocation41_spill] sm:$0xff] %v5921_v27  ;;  %v8746_v26 = vld [vmem:[#allocation50_spill] sm:$0xff] }
 0x33f   : > { %1233 = vmatmul.bf16.gmra.mxu1 %v5902_v35 }
 0x340   : > { %1300 = vmatpush.bf16.msra.mxu1 %v996_v61  ;;  %1321 = vmatpush.bf16.msra.mxu2 %v1014_v28  ;;  %v8747_v61 = vld [vmem:[#allocation48_spill] sm:$0xff] }
 0x341   : > { %v938_v28 = vsel %vm936_vm8, %v8747_v61, %v8746_v26 }
 0x342   : > { %1184 = vmatpush.bf16.msrb.mxu3 %v953_v12  ;;  %1573 = vrot.lane.b32.xlu2 %v5649_v4, %s4366_s16  ;;  %v304_v4 = vld [vmem:[%s8473_s4] sm:$0x7] }
 0x343   : > { %1645 = vrot.lane.b32.xlu1 %v5736_v58, %s4369_s10  ;;  %1655 = vrot.lane.b32.xlu0 %v5720_v44, %s4369_s10  ;;  %vm305_vm10 = vcmp.gt.f32.partialorder %v304_v4, 0.5 }
 0x344   : > { %1301 = vmatpush.bf16.msra.mxu1 %v993_v48  ;;  %1322 = vmatpush.bf16.msra.mxu2 %v1011_v34  ;;  %v5946_v14 = vpop.permute.xlu2 %1444  ;;  %v8748_v48 = vld [vmem:[#allocation17_spill] sm:$0xff] }
 0x345   : > { %v5948_v9 = vpop.permute.xlu1 %1488  ;;  %v5950_v19 = vpop.permute.xlu0 %1501 }
 0x346   : > { %1185 = vmatpush.bf16.msrb.mxu3 %v950_v17  ;;  %8736 = vst [vmem:[#allocation23_spill] sm:$0xff] %v5950_v19  ;;  %v8750_v17 = vld [vmem:[#allocation39_spill] sm:$0xff]  ;;  %v8804_v19 = vmov 0  }
 0x347   : > { %v957_v18 = vsel %vm936_vm8, %v5239_v2, %v8750_v17  ;;  %v954_v2 = vsel %vm936_vm8, %v5209_v56, %v8753_v57 }
 0x348   : > { %1302 = vmatpush.bf16.msra.mxu1 %v990_v11  ;;  %v8752_v11 = vld [vmem:[#allocation18_spill] sm:$0xff] }
 0x349   : > { %3765 = vmatmul.msk.bf16.gmra.mxu3 %vm1099_vm9, %v5952_v5 }
 0x34a   : > { %1186 = vmatpush.bf16.msrb.mxu3 %v947_v40  ;;  %1579 = vrot.lane.b32.xlu2 %v5669_v36, %s4366_s16 }
 0x34b   : > { %1651 = vrot.lane.b32.xlu1 %v5753_v7, %s4369_s10  ;;  %1667 = vrot.lane.b32.xlu0 %v5736_v58, %s4370_s17 }
 0x34c   : > { %1303 = vmatpush.bf16.msra.mxu1 %v987_v21  ;;  %v5971_v29 = vpop.permute.xlu2 %1453  ;;  %v951_v21 = vsel %vm936_vm8, %v5267_v3, %v8755_v46  ;;  %v8760_v3 = vld [vmem:[#allocation55_spill] sm:$0xff] }
 0x34d   : > { %v5975_v1 = vpop.permute.xlu1 %1497  ;;  %3766 = vmatmul.msk.bf16.vlgmr.msrb.gmra.mxu2 %vm1099_vm9, %v5885_v32  ;;  %v5979_v45 = vpop.permute.xlu0 %1510  ;;  %v945_v6 = vsel %vm936_vm8, %v8740_v8, %v8760_v3  ;;  %v8765_v8 = vld [vmem:[#allocation27_spill] sm:$0xff] }
 0x34e   : > { %1187 = vmatpush.bf16.msrb.mxu3 %v944_v39  ;;  %8742 = vst [vmem:[#allocation43_spill] sm:$0xff] %v5975_v1  ;;  %v939_v17 = vsel %vm936_vm8, %v8746_v26, %v8765_v8  ;;  %v6239_v1 = vsel %vm305_vm10, 1, %v8804_v19 }
 0x34f   : > { %8743 = vst [vmem:[#allocation35_spill] sm:$0xff] %v5979_v45  ;;  %1304 = vmatmul.bf16.vlgmr.msra.gmra.mxu1 %v5829_v60  ;;  %v960_v60 = vsel %vm936_vm8, %v5340_v10, %v8748_v48 }
 0x352   : > { %1188 = vmatpush.bf16.msrb.mxu3 %v941_v31  ;;  %1585 = vrot.lane.b32.xlu2 %v5690_v15, %s4366_s16  ;;  %v8761_v31 = vld [vmem:[#allocation31_spill] sm:$0xff] }
 0x353   : > { %1657 = vrot.lane.b32.xlu1 %v5984_v25, %s4369_s10  ;;  %1673 = vrot.lane.b32.xlu0 %v5753_v7, %s4370_s17 }
 0x354   : > { %v5996_v12 = vpop.permute.xlu2 %1462 }
 0x355   : > { %v6001_v34 = vpop.permute.xlu1 %1503  ;;  %v6006_v23 = vpop.permute.xlu0 %1551 }
 0x356   : > { %1189 = vmatpush.bf16.msrb.mxu3 %v938_v28  ;;  %8749 = vst [vmem:[#allocation34_spill] sm:$0xff] %v6001_v34  ;;  %v8762_v28 = vld [vmem:[#allocation51_spill] sm:$0xff] }
 0x357   : > { %8751 = vst [vmem:[#allocation36_spill] sm:$0xff] %v6006_v23 }
 0x359   : > { %1190 = vmatmul.bf16.vlgmr.msrb.gmra.mxu3 %v8752_v11 }
 0x35a   : > { %1258 = vmatpush.bf16.msra.mxu3 %v960_v60  ;;  %1597 = vrot.lane.b32.xlu2 %v5688_v63, %s4367_s30 }
 0x35b   : > { %1669 = vrot.lane.b32.xlu1 %v5669_v36, %s4370_s17  ;;  %1679 = vrot.lane.b32.xlu0 %v5984_v25, %s4370_s17 }
 0x35c   : > { %v6015_v10 = vpop.permute.xlu2 %1475 }
 0x35d   : > { %v6020_v40 = vpop.permute.xlu1 %1512  ;;  %3767 = vmatmul.msk.bf16.gmra.mxu2 %vm1099_vm9, %v5952_v5  ;;  %v6030_v39 = vpop.permute.xlu0 %1557 }
 0x35e   : > { %1259 = vmatpush.bf16.msra.mxu3 %v957_v18  ;;  %8754 = vst [vmem:[#allocation45_spill] sm:$0xff] %v6020_v40  ;;  %v3849_v40 = vld [vmem:[%s8472_s3 + $0x28] sm:$0xff] }
 0x35f   : > { %1309 = vmatmul.bf16.gmra.mxu1 %v5902_v35  ;;  %8757 = vst [vmem:[#allocation21_spill] sm:$0xff] %v6030_v39  ;;  %v948_v35 = vsel %vm936_vm8, %v8737_v30, %v8758_v62  ;;  %v942_v30 = vsel %vm936_vm8, %v8744_v42, %v8762_v28 }
 0x362   : > { %1260 = vmatpush.bf16.msra.mxu3 %v954_v2  ;;  %1603 = vrot.lane.b32.xlu2 %v8756_v22, %s4367_s30  ;;  %v1115_v22 = vpop.f32.mrf.mxu0 }
 0x363   : > { %1675 = vrot.lane.b32.xlu1 %v5690_v15, %s4370_s17  ;;  %1693 = vrot.lane.b32.xlu0 %v5890_v0, %s4368_s9 }
 0x364   : > { %v6036_v56 = vpop.permute.xlu2 %1481 }
 0x365   : > { %v6041_v16 = vpop.permute.xlu1 %1553  ;;  %v6056_v48 = vpop.permute.xlu0 %1563 }
 0x366   : > { %1261 = vmatpush.bf16.msra.mxu3 %v951_v21  ;;  %8759 = vst [vmem:[#allocation54_spill] sm:$0xff] %v6041_v16 }
 0x367   : > { %8763 = vst [vmem:[#allocation38_spill] sm:$0xff] %v6056_v48 }
 0x369   : > { %1195 = vmatmul.bf16.gmra.mxu3 %v8761_v31 }
 0x36a   : > { %1262 = vmatpush.bf16.msra.mxu3 %v948_v35  ;;  %1609 = vrot.lane.b32.xlu2 %v5720_v44, %s4367_s30 }
 0x36b   : > { %1687 = vrot.lane.b32.xlu1 %v5890_v0, %s4367_s30 }
 0x36c   : > { %v6051_v61 = vpop.permute.xlu2 %1490 }
 0x36d   : > { %v6058_v60 = vpop.permute.xlu1 %1559  ;;  %3768 = vmatmul.msk.bf16.vlgmr.msra.gmra.mxu2 %vm1099_vm9, %v5885_v32  ;;  %v6073_v57 = vpop.permute.xlu0 %1575 }
 0x36e   : > { %1263 = vmatpush.bf16.msra.mxu3 %v945_v6  ;;  %8764 = vst [vmem:[#allocation53_spill] sm:$0xff] %v6058_v60 }
 0x36f   : > { %8768 = vst [vmem:[#allocation52_spill] sm:$0xff] %v6073_v57 }
 0x372   : > { %1264 = vmatpush.bf16.msra.mxu3 %v942_v30  ;;  %1621 = vrot.lane.b32.xlu2 %v5669_v36, %s4368_s9 }
 0x373   : > { %1695 = vrot.lane.b32.xlu1 %v5984_v25, %s4368_s9 }
 0x374   : > { %v6069_v42 = vpop.permute.xlu2 %1499 }
 0x375   : > { %8766 = vst [vmem:[#allocation30_spill] sm:$0xff] %v6069_v42  ;;  %v6071_v18 = vpop.permute.xlu1 %1565  ;;  %v6084_v2 = vpop.permute.xlu0 %1581 }
 0x376   : > { %1265 = vmatpush.bf16.msra.mxu3 %v939_v17  ;;  %8767 = vst [vmem:[#allocation28_spill] sm:$0xff] %v6071_v18 }
 0x377   : > { %8771 = vst [vmem:[#allocation17_spill] sm:$0xff] %v6084_v2  ;;  %v6127_v2 = vpop.f32.mrf.mxu0 }
 0x379   : > { %1266 = vmatmul.bf16.vlgmr.msra.gmra.mxu3 %v8752_v11 }
 0x37a   : > { %1627 = vrot.lane.b32.xlu2 %v5720_v44, %s4368_s9 }
 0x37c   : > { %v6078_v32 = vpop.permute.xlu2 %1508 }
 0x37d   : > { %8769 = vst [vmem:[#allocation50_spill] sm:$0xff] %v6078_v32  ;;  %v6080_v26 = vpop.permute.xlu1 %1577  ;;  %3769 = vmatmul.msk.bf16.gmra.mxu2 %vm1099_vm9, %v5952_v5  ;;  %v6095_v11 = vpop.permute.xlu0 %1587 }
 0x37e   : > { %8770 = vst [vmem:[#allocation48_spill] sm:$0xff] %v6080_v26 }
 0x37f   : > { %8774 = vst [vmem:[#allocation16_spill] sm:$0xff] %v6095_v11  ;;  %v6149_v57 = vpop.f32.mrf.mxu0 }
 0x382   : > { %1647 = vrot.lane.b32.xlu2 %v5669_v36, %s4369_s10 }
 0x384   : > { %v6088_v46 = vpop.permute.xlu2 %1514 }
 0x385   : > { %8772 = vst [vmem:[#allocation39_spill] sm:$0xff] %v6088_v46  ;;  %v6090_v21 = vpop.permute.xlu1 %1583  ;;  %v1600_v3 = vpop.permute.xlu0 %1599 }
 0x386   : > { %8773 = vst [vmem:[#allocation18_spill] sm:$0xff] %v6090_v21 }
 0x389   : > { %1271 = vmatmul.bf16.gmra.mxu3 %v8761_v31 }
 0x38a   : > { %1653 = vrot.lane.b32.xlu2 %v5690_v15, %s4369_s10 }
 0x38c   : > { %v6097_v62 = vpop.permute.xlu2 %1555 }
 0x38d   : > { %8775 = vst [vmem:[#allocation24_spill] sm:$0xff] %v6097_v62  ;;  %v6099_v35 = vpop.permute.xlu1 %1595  ;;  %v6125_v11 = vpop.permute.xlu0 %1605 }
 0x38e   : > { %8776 = vst [vmem:[#allocation26_spill] sm:$0xff] %v6099_v35 }
 0x38f   : > { %8783 = vst [vmem:[#allocation58_spill] sm:$0xff] %v6125_v11 }
 0x392   : > { %1665 = vrot.lane.b32.xlu2 %v5688_v63, %s4370_s17  ;;  %v1134_v63 = vpop.f32.mrf.mxu1 }
 0x394   : > { %v6103_v5 = vpop.permute.xlu2 %1561 }
 0x395   : > { %8777 = vst [vmem:[#allocation55_spill] sm:$0xff] %v6103_v5  ;;  %v6105_v6 = vpop.permute.xlu1 %1601 }
 0x396   : > { %8778 = vst [vmem:[#allocation31_spill] sm:$0xff] %v6105_v6  ;;  %v6109_v31 = vsel %vm372_vm0, %v1600_v3, %v6105_v6 }
 0x397   : > { %8779 = vst [vmem:[#allocation51_spill] sm:$0xff] %v6109_v31  ;;  %1701 = vrot.lane.b32.xlu0 %v6109_v31, %s4368_s9 }
 0x39a   : > { %1671 = vrot.lane.b32.xlu2 %v5890_v0, %s4370_s17  ;;  %v6131_v21 = vpop.f32.mrf.mxu1 }
 0x39c   : > { %v6115_v28 = vpop.permute.xlu2 %1573 }
 0x39d   : > { %8780 = vst [vmem:[#allocation27_spill] sm:$0xff] %v6115_v28  ;;  %v1608_v30 = vpop.permute.xlu1 %1607 }
 0x39e   : > { %v6147_v34 = vsel %vm372_vm0, %v6125_v11, %v1608_v30 }
 0x39f   : > { %8788 = vst [vmem:[#allocation63_spill] sm:$0xff] %v6147_v34 }
 0x3a2   : > { %1677 = vrot.lane.b32.xlu2 %v5720_v44, %s4370_s17 }
 0x3a4   : > { %v6119_v8 = vpop.permute.xlu2 %1579 }
 0x3a5   : > { %8781 = vst [vmem:[#allocation56_spill] sm:$0xff] %v6119_v8  ;;  %v1620_v17 = vpop.permute.xlu1 %1619 }
 0x3aa   : > { %1689 = vrot.lane.b32.xlu2 %v5984_v25, %s4367_s30 }
 0x3ac   : > { %v6123_v35 = vpop.permute.xlu2 %1585 }
 0x3ad   : > { %8782 = vst [vmem:[#allocation57_spill] sm:$0xff] %v6123_v35  ;;  %v1626_v31 = vpop.permute.xlu1 %1625  ;;  %v6143_v35 = vpop.permute.xlu0 %1617 }
 0x3ae   : > { %8787 = vst [vmem:[#allocation62_spill] sm:$0xff] %v6143_v35 }
 0x3b0   : > { %v1153_v0 = vpop.f32.mrf.mxu2 }
 0x3b4   : > { %v6129_v28 = vpop.permute.xlu2 %1597 }
 0x3b5   : > { %8784 = vst [vmem:[#allocation59_spill] sm:$0xff] %v6129_v28  ;;  %v6133_v44 = vpop.permute.xlu1 %1645  ;;  %v6137_v8 = vsel %vm372_vm0, %v6129_v28, %v1600_v3  ;;  %v6157_v3 = vpop.f32.mrf.mxu1  ;;  %v6163_v28 = vsel %vm382_vm1, %v6143_v35, %v1620_v17 }
 0x3b6   : > { %8785 = vst [vmem:[#allocation60_spill] sm:$0xff] %v6133_v44  ;;  %1699 = vrot.lane.b32.xlu2 %v6137_v8, %s4368_s9  ;;  %v6165_v11 = vpop.permute.xlu0 %1623 }
 0x3b7   : > { %8786 = vst [vmem:[#allocation61_spill] sm:$0xff] %v6137_v8 }
 0x3b8   : > { %v6141_v25 = vpop.f32.mrf.mxu2  ;;  %8791 = vst [vmem:[#allocation66_spill] sm:$0xff] %v6163_v28 }
 0x3b9   : > { %8792 = vst [vmem:[#allocation67_spill] sm:$0xff] %v6165_v11 }
 0x3bc   : > { %v6151_v26 = vpop.permute.xlu2 %1603  ;;  %v1172_v48 = vpop.f32.mrf.mxu3 }
 0x3bd   : > { %8789 = vst [vmem:[#allocation64_spill] sm:$0xff] %v6151_v26  ;;  %v6153_v44 = vpop.permute.xlu1 %1651  ;;  %v6181_v35 = vpop.f32.mrf.mxu1 }
 0x3be   : > { %8790 = vst [vmem:[#allocation65_spill] sm:$0xff] %v6153_v44  ;;  %1705 = vrot.lane.b32.xlu2 %v6147_v34, %s4368_s9  ;;  %v6179_v34 = vpop.f32.mrf.mxu0 }
 0x3c0   : > { %v6159_v8 = vpop.f32.mrf.mxu2 }
 0x3c4   : > { %v6167_v18 = vpop.permute.xlu2 %1609  ;;  %v1174_v26 = vpop.f32.mrf.mxu3 }
 0x3c5   : > { %v6169_v60 = vpop.permute.xlu1 %1657  ;;  %v6173_v44 = vsel %vm372_vm0, %v1608_v30, %v6167_v18  ;;  %v1229_v23 = vpop.f32.mrf.mxu1 }
 0x3c6   : > { %8793 = vst [vmem:[#allocation68_spill] sm:$0xff] %v6169_v60  ;;  %1707 = vrot.lane.b32.xlu0 %v6173_v44, %s4368_s9  ;;  %1711 = vrot.lane.b32.xlu2 %v6163_v28, %s4368_s9  ;;  %v6187_v60 = vsel %vm382_vm1, %v6165_v11, %v1626_v31  ;;  %v6199_v28 = vpop.permute.xlu0 %1643  ;;  %v1210_v11 = vpop.f32.mrf.mxu0 }
 0x3c7   : > { %8794 = vst [vmem:[#allocation69_spill] sm:$0xff] %v6173_v44 }
 0x3c8   : > { %v6183_v5 = vpop.f32.mrf.mxu2  ;;  %8795 = vst [vmem:[#allocation70_spill] sm:$0xff] %v6187_v60 }
 0x3c9   : > { %8798 = vst [vmem:[#allocation73_spill] sm:$0xff] %v6199_v28 }
 0x3cc   : > { %v6189_v39 = vpop.permute.xlu2 %1621  ;;  %v6193_v62 = vpop.f32.mrf.mxu3 }
 0x3cd   : > { %v6191_v30 = vpop.permute.xlu1 %1669  ;;  %v6197_v44 = vsel %vm382_vm1, %v1620_v17, %v6189_v39 }
 0x3ce   : > { %8796 = vst [vmem:[#allocation71_spill] sm:$0xff] %v6191_v30  ;;  %1713 = vrot.lane.b32.xlu0 %v6197_v44, %s4368_s9  ;;  %1717 = vrot.lane.b32.xlu2 %v6187_v60, %s4368_s9  ;;  %v3848_v30 = vld [vmem:[%s8472_s3 + $0x20] sm:$0xff]  ;;  %v6221_v36 = vpop.permute.xlu0 %1649  ;;  %v1212_v58 = vpop.f32.mrf.mxu0 }
 0x3cf   : > { %8797 = vst [vmem:[#allocation72_spill] sm:$0xff] %v6197_v44  ;;  %v8801_v60 = vld [vmem:[#allocation46_spill] sm:$0xff] }
 0x3d0   : > { %v1248_v16 = vpop.f32.mrf.mxu2  ;;  %v1116_v44 = vadd.f32 %v1115_v22, %v8801_v60  ;;  %8802 = vst [vmem:[#allocation46_spill] sm:$0xff] %v6221_v36 }
 0x3d4   : > { %v6208_v15 = vpop.permute.xlu2 %1627  ;;  %v6212_v17 = vpop.f32.mrf.mxu3 }
 0x3d5   : > { %v6210_v7 = vpop.permute.xlu1 %1675  ;;  %v6216_v28 = vsel %vm382_vm1, %v1626_v31, %v6208_v15  ;;  %v3851_v31 = vld [vmem:[%s8472_s3 + $0x38] sm:$0xff] }
 0x3d6   : > { %8799 = vst [vmem:[#allocation74_spill] sm:$0xff] %v6210_v7  ;;  %1719 = vrot.lane.b32.xlu0 %v6216_v28, %s4368_s9  ;;  %1747 = vperm.xlu2 %4193, %v3848_v30   ;;  %v1135_v7 = vadd.f32 %v1134_v63, %v1116_v44  ;;  %v6244_v42 = vpop.permute.xlu0 %1655 }
 0x3d7   : > { %8800 = vst [vmem:[#allocation75_spill] sm:$0xff] %v6216_v28  ;;  %v1231_v28 = vpop.f32.mrf.mxu1 }
 0x3d8   : > { %v1154_v30 = vadd.f32 %v1153_v0, %v1135_v7  ;;  %v1250_v22 = vpop.f32.mrf.mxu2  ;;  %v8805_v7 = vld [vmem:[#allocation47_spill] sm:$0xff] }
 0x3d9   : > { %v1118_v0 = vadd.f32 %v6127_v2, %v8805_v7  ;;  %8806 = vst [vmem:[#allocation47_spill] sm:$0xff] %v6244_v42 }
 0x3da   : > { %v1173_v32 = vadd.f32 %v1172_v48, %v1154_v30 }
 0x3db   : > { %v1137_v4 = vadd.f32 %v6131_v21, %v1118_v0  ;;  %v8807_v0 = vld [vmem:[#allocation32_spill] sm:$0xff] }
 0x3dc   : > { %v6232_v46 = vpop.permute.xlu2 %1647  ;;  %v1191_v45 = vpop.f32.mrf.mxu3  ;;  %v1334_v48 = vmul.f32 0.2, %v1173_v32 }
 0x3dd   : > { %8803 = vst [vmem:[#allocation76_spill] sm:$0xff] %v6232_v46  ;;  %v1688_v36 = vpop.permute.xlu1 %1687  ;;  %v1192_v44 = vadd.f32 %v1191_v45, %v8801_v60  ;;  %v1360_v45 = vperm.slane %v6239_v1, 1 }
 0x3de   : > { %v1691_v63 = vsel %vm372_vm0, %v6105_v6, %v1688_v36  ;;  %1752 = vperm.xlu0 %4191, %v3849_v40   ;;  %1762 = vperm.xlu2 %4193, %v3851_v31   ;;  %v1359_v36 = vperm.slane %v6239_v1, 0  ;;  %v1215_v40 = vpop.f32.mrf.mxu0  ;;  %v1156_v31 = vadd.f32 %v6141_v25, %v1137_v4  ;;  %v1346_v2 = vmax.f32 %v1173_v32, %v1334_v48  ;;  %v8814_v32 = vld [vmem:[#allocation20_spill] sm:$0xff] }
 0x3df   : > { %1703 = vrot.lane.b32.xlu1 %v1691_v63, %s4368_s9  ;;  %v1211_v46 = vadd.f32 %v1210_v11, %v1192_v44  ;;  %v1234_v27 = vpop.f32.mrf.mxu1  ;;  %vm6260_vm12 = vcmp.eq.s32.totalorder %v1360_v45, 1 }
 0x3e0   : > { %v1175_v11 = vadd.f32 %v1174_v26, %v1156_v31  ;;  %vm6256_vm11 = vcmp.eq.s32.totalorder %v1359_v36, 1  ;;  %v1121_v26 = vadd.f32 %v6149_v57, %v8814_v32  ;;  %v6271_v31 = vpop.permute.xlu0 %1667 }
 0x3e1   : > { %v1230_v30 = vadd.f32 %v1229_v23, %v1211_v46  ;;  %v8808_v23 = vmov 0  ;;  %v1253_v46 = vpop.f32.mrf.mxu2 }
 0x3e2   : > { %v8809_v23 = vsel %vm6256_vm11, 4294967295, %v8808_v23  ;;  %v1140_v4 = vadd.f32 %v6157_v3, %v1121_v26  ;;  %v1337_v48 = vmul.f32 0.2, %v1175_v11  ;;  %v8815_v3 = vld [vmem:[#allocation25_spill] sm:$0xff] }
 0x3e3   : > { %v1249_v63 = vadd.f32 %v1248_v16, %v1230_v30  ;;  %8810 = vst [vmem:[#allocation32_spill] sm:$0xff] %v8809_v23  ;;  %v8811_v16 = vmov 0 }
 0x3e4   : > { %v6249_v19 = vpop.permute.xlu2 %1653  ;;  %v1193_v6 = vpop.f32.mrf.mxu3  ;;  %v8812_v16 = vsel %vm6260_vm12, 4294967295, %v8811_v16 }
 0x3e5   : > { %v1335_v44 = vmul.f32 0.2, %v1249_v63  ;;  %v1194_v21 = vadd.f32 %v1193_v6, %v8805_v7  ;;  %8813 = vst [vmem:[#allocation77_spill] sm:$0xff] %v8812_v16 }
 0x3e6   : > { %1803 = vrot.lane.b32.xlu0 %v8807_v0, %s4374_s12  ;;  %1807 = vrot.lane.b32.xlu2 %v5478_v52, %s4374_s12  ;;  %v1365_v52 = vsel %vm6256_vm11, %v1346_v2, 0.0  ;;  %v1159_v0 = vadd.f32 %v6159_v8, %v1140_v4  ;;  %v1217_v2 = vpop.f32.mrf.mxu0 }
 0x3e7   : > { %v1347_v6 = vmax.f32 %v1249_v63, %v1335_v44  ;;  %v1213_v25 = vadd.f32 %v1212_v58, %v1194_v21  ;;  %v1438_v63 = vsel %vm348_vm2, %v8815_v3, %v5769_v55 }
 0x3e8   : > { %v1178_v44 = vadd.f32 %v6193_v62, %v1159_v0 }
 0x3e9   : > { %v1366_v30 = vsel %vm6260_vm12, %v1347_v6, 0.0  ;;  %v1232_v36 = vadd.f32 %v1231_v28, %v1213_v25  ;;  %v1349_v28 = vmax.f32 %v1175_v11, %v1337_v48  ;;  %v1236_v6 = vpop.f32.mrf.mxu1  ;;  %v1255_v11 = vpop.f32.mrf.mxu2 }
 0x3ea   : > { %v1377_v45 = vpack.c.bf16 %v1366_v30, %v1365_v52  ;;  %v1340_v48 = vmul.f32 0.2, %v1178_v44 }
 0x3eb   : > { %v1251_v42 = vadd.f32 %v1250_v22, %v1232_v36  ;;  %v8816_v22 = vld [vmem:[#allocation49_spill] sm:$0xff]  ;;  %v1368_v62 = vsel %vm6256_vm11, %v1349_v28, 0.0 }
 0x3ec   : > { %v6274_v57 = vpop.permute.xlu2 %1665  ;;  %1385 = vst [vmem:[%s6278_s14 + $0x4] sm:$0xff] %v1377_v45  ;;  %v1196_v58 = vpop.f32.mrf.mxu3  ;;  %v1123_v26 = vadd.f32 %v6179_v34, %v8816_v22 }
 0x3ed   : > { %v1338_v21 = vmul.f32 0.2, %v1251_v42  ;;  %v1197_v8 = vadd.f32 %v1196_v58, %v8814_v32 }
 0x3ee   : > { %1809 = vrot.lane.b32.xlu0 %v5476_v24, %s4374_s12  ;;  %1813 = vrot.lane.b32.xlu2 %v1438_v63, %s4374_s12  ;;  %v1142_v52 = vadd.f32 %v6181_v35, %v1123_v26  ;;  %v1448_v35 = vsel %vm360_vm3, %v5748_v20, %v5792_v54  ;;  %v1352_v63 = vmax.f32 %v1178_v44, %v1340_v48 }
 0x3ef   : > { %v1350_v25 = vmax.f32 %v1251_v42, %v1338_v21  ;;  %v1216_v4 = vadd.f32 %v1215_v40, %v1197_v8  ;;  %v1439_v42 = vsel %vm348_vm2, %v5769_v55, %v5917_v13  ;;  %v6306_v40 = vpop.permute.xlu0 %1673 }
 0x3f0   : > { %v1161_v45 = vadd.f32 %v6183_v5, %v1142_v52  ;;  %v1371_v20 = vsel %vm6256_vm11, %v1352_v63, 0.0 }
 0x3f1   : > { %v1369_v30 = vsel %vm6260_vm12, %v1350_v25, 0.0  ;;  %v1235_v24 = vadd.f32 %v1234_v27, %v1216_v4  ;;  %v1305_v8 = vpop.f32.mrf.mxu1  ;;  %v1324_v4 = vpop.f32.mrf.mxu2 }
 0x3f2   : > { %v1379_v36 = vpack.c.bf16 %v1369_v30, %v1368_v62  ;;  %v1180_v27 = vadd.f32 %v6212_v17, %v1161_v45 }
 0x3f3   : > { %v1254_v0 = vadd.f32 %v1253_v46, %v1235_v24  ;;  %v1286_v46 = vpop.f32.mrf.mxu0 }
 0x3f4   : > { %v6297_v58 = vpop.permute.xlu2 %1671  ;;  %1387 = vst [vmem:[%s6278_s14 + $0x18] sm:$0xff] %v1379_v36  ;;  %v1198_v34 = vpop.f32.mrf.mxu3  ;;  %v1343_v26 = vmul.f32 0.2, %v1180_v27 }
 0x3f5   : > { %v1341_v28 = vmul.f32 0.2, %v1254_v0  ;;  %v1199_v5 = vadd.f32 %v1198_v34, %v8816_v22 }
 0x3f6   : > { %1815 = vrot.lane.b32.xlu0 %v1439_v42, %s4374_s12  ;;  %1819 = vrot.lane.b32.xlu2 %v1448_v35, %s4374_s12  ;;  %v1355_v30 = vmax.f32 %v1180_v27, %v1343_v26  ;;  %v1361_v35 = vperm.slane %v6239_v1, 2  ;;  %v1461_v1 = vsel %vm372_vm0, %v5794_v43, %v5843_v37  ;;  %v8817_v26 = vmov 0 }
 0x3f7   : > { %v1353_v21 = vmax.f32 %v1254_v0, %v1341_v28  ;;  %v1218_v55 = vadd.f32 %v1217_v2, %v1199_v5  ;;  %v1449_v2 = vsel %vm360_vm3, %v5792_v54, %v5946_v14 }
 0x3f8   : > { %v1374_v34 = vsel %vm6256_vm11, %v1355_v30, 0.0  ;;  %vm6345_vm13 = vcmp.eq.s32.totalorder %v1361_v35, 1  ;;  %v1696_v35 = vpop.permute.xlu1 %1695 }
 0x3f9   : > { %v1372_v44 = vsel %vm6260_vm12, %v1353_v21, 0.0  ;;  %v1237_v17 = vadd.f32 %v1236_v6, %v1218_v55  ;;  %v6326_v6 = vpop.permute.xlu0 %1679  ;;  %v1307_v63 = vpop.f32.mrf.mxu1  ;;  %v8818_v26 = vsel %vm6345_vm13, 4294967295, %v8817_v26 }
 0x3fa   : > { %v1381_v25 = vpack.c.bf16 %v1372_v44, %v1371_v20  ;;  %v1326_v55 = vpop.f32.mrf.mxu2  ;;  %8819 = vst [vmem:[#allocation20_spill] sm:$0xff] %v8818_v26 }
 0x3fb   : > { %v1256_v52 = vadd.f32 %v1255_v11, %v1237_v17  ;;  %v1288_v0 = vpop.f32.mrf.mxu0 }
 0x3fc   : > { %v6316_v62 = vpop.permute.xlu2 %1677  ;;  %1389 = vst [vmem:[%s6278_s14 + $0x2c] sm:$0xff] %v1381_v25  ;;  %v1267_v48 = vpop.f32.mrf.mxu3 }
 0x3fd   : > { %v1344_v24 = vmul.f32 0.2, %v1256_v52  ;;  %v1268_v36 = vadd.f32 %v1267_v48, %v8801_v60 }
 0x3fe   : > { %1821 = vrot.lane.b32.xlu0 %v1449_v2, %s4374_s12  ;;  %1825 = vrot.lane.b32.xlu2 %v5771_v59, %s4374_s12 }
 0x3ff   : > { %v1356_v11 = vmax.f32 %v1256_v52, %v1344_v24  ;;  %v1287_v45 = vadd.f32 %v1286_v46, %v1268_v36  ;;  %v1459_v46 = vsel %vm372_vm0, %v5816_v53, %v5971_v29 }
 0x401   : > { %v1375_v54 = vsel %vm6260_vm12, %v1356_v11, 0.0  ;;  %v1306_v42 = vadd.f32 %v1305_v8, %v1287_v45  ;;  %v1694_v17 = vpop.permute.xlu0 %1693  ;;  %v1310_v24 = vpop.f32.mrf.mxu1  ;;  %v1468_v45 = vsel %vm382_vm1, %v5996_v12, %v5818_v33 }
 0x402   : > { %v1383_v60 = vpack.c.bf16 %v1375_v54, %v1374_v34  ;;  %v1697_v2 = vsel %vm382_vm1, %v6189_v39, %v1694_v17 }
 0x403   : > { %v1325_v27 = vadd.f32 %v1324_v4, %v1306_v42  ;;  %v1291_v52 = vpop.f32.mrf.mxu0 }
 0x404   : > { %v1690_v28 = vpop.permute.xlu2 %1689  ;;  %1391 = vst [vmem:[%s6278_s14 + $0x40] sm:$0xff] %v1383_v60  ;;  %v1269_v21 = vpop.f32.mrf.mxu3 }
 0x405   : > { %v1692_v5 = vsel %vm372_vm0, %v6167_v18, %v1690_v28  ;;  %v1336_v20 = vmul.f32 0.2, %v1325_v27  ;;  %v1270_v8 = vadd.f32 %v1269_v21, %v8805_v7  ;;  %v1469_v21 = vsel %vm382_vm1, %v5818_v33, %v5875_v41 }
 0x406   : > { %1709 = vrot.lane.b32.xlu1 %v1692_v5, %s4368_s9  ;;  %1827 = vrot.lane.b32.xlu0 %v1459_v46, %s4374_s12 }
 0x407   : > { %1831 = vrot.lane.b32.xlu2 %v1461_v1, %s4374_s12  ;;  %v1348_v53 = vmax.f32 %v1325_v27, %v1336_v20  ;;  %v1289_v44 = vadd.f32 %v1288_v0, %v1270_v8  ;;  %v1329_v0 = vpop.f32.mrf.mxu2  ;;  %v1698_v27 = vsel %vm382_vm1, %v6208_v15, %v1696_v35 }
 0x409   : > { %v1367_v7 = vsel %vm6345_vm13, %v1348_v53, 0.0  ;;  %v1308_v25 = vadd.f32 %v1307_v63, %v1289_v44  ;;  %v1312_v20 = vpop.f32.mrf.mxu1 }
 0x40a   : > { %v1378_v4 = vpack.c.bf16 %v1367_v7, %v1367_v7 }
 0x40b   : > { %v1327_v48 = vadd.f32 %v1326_v55, %v1308_v25  ;;  %v1293_v5 = vpop.f32.mrf.mxu0 }
 0x40c   : > { %1386 = vst [vmem:[%s6278_s14 + $0xc] sm:$0xf] %v1378_v4  ;;  %v1272_v30 = vpop.f32.mrf.mxu3  ;;  %v1483_v4 = vsel %vm398_vm4, %v6015_v10, %v5845_v49 }
 0x40d   : > { %v1339_v36 = vmul.f32 0.2, %v1327_v48  ;;  %v1273_v11 = vadd.f32 %v1272_v30, %v8814_v32 }
 0x40e   : > { %1833 = vrot.lane.b32.xlu0 %v5843_v37, %s4374_s12  ;;  %1715 = vrot.lane.b32.xlu1 %v1697_v2, %s4368_s9 }
 0x40f   : > { %1837 = vrot.lane.b32.xlu2 %v1468_v45, %s4374_s12  ;;  %v1351_v34 = vmax.f32 %v1327_v48, %v1339_v36  ;;  %v1292_v54 = vadd.f32 %v1291_v52, %v1273_v11  ;;  %v1331_v44 = vpop.f32.mrf.mxu2  ;;  %v1485_v52 = vsel %vm398_vm4, %v5919_v51, %v6036_v56  ;;  %v1437_v11 = vsel %vm348_vm2, %v5871_v38, %v8815_v3  ;;  %v8820_v45 = vld [vmem:[#allocation41_spill] sm:$0xff] }
 0x410   : > { %v6363_v42 = vpop.permute.xlu2 %1699 }
 0x411   : > { %v1370_v32 = vsel %vm6345_vm13, %v1351_v34, 0.0  ;;  %v1311_v60 = vadd.f32 %v1310_v24, %v1292_v54  ;;  %v8821_v34 = vld [vmem:[#allocation30_spill] sm:$0xff]  ;;  %v8822_v54 = vld [vmem:[#allocation43_spill] sm:$0xff] }
 0x412   : > { %v1380_v63 = vpack.c.bf16 %v1370_v32, %v1370_v32  ;;  %v1505_v35 = vsel %vm422_vm6, %v8822_v54, %v8821_v34 }
 0x413   : > { %v1330_v37 = vadd.f32 %v1329_v0, %v1311_v60  ;;  %v1496_v0 = vsel %vm410_vm5, %v6051_v61, %v8820_v45  ;;  %v8824_v60 = vld [vmem:[#allocation23_spill] sm:$0xff] }
 0x414   : > { %1388 = vst [vmem:[%s6278_s14 + $0x20] sm:$0xf] %v1380_v63  ;;  %v1274_v28 = vpop.f32.mrf.mxu3  ;;  %v1506_v38 = vsel %vm422_vm6, %v8821_v34, %v8824_v60 }
 0x415   : > { %v1342_v46 = vmul.f32 0.2, %v1330_v37  ;;  %v1275_v55 = vadd.f32 %v1274_v28, %v8816_v22  ;;  %v3850_v22 = vld [vmem:[%s8472_s3 + $0x30] sm:$0xff]  ;;  %v1450_v28 = vsel %vm360_vm3, %v5946_v14, %v5771_v59  ;;  %v8830_v59 = vld [vmem:[#allocation19_spill] sm:$0xff]  ;;  %v8831_v14 = vld [vmem:[#allocation22_spill] sm:$0xff] }
 0x416   : > { %1839 = vrot.lane.b32.xlu0 %v1469_v21, %s4374_s12  ;;  %1721 = vrot.lane.b32.xlu1 %v1698_v27, %s4368_s9  ;;  %v8829_v21 = vld [vmem:[#allocation45_spill] sm:$0xff] }
 0x417   : > { %1843 = vrot.lane.b32.xlu2 %v6015_v10, %s4374_s12  ;;  %v1354_v8 = vmax.f32 %v1330_v37, %v1342_v46  ;;  %v1294_v1 = vadd.f32 %v1293_v5, %v1275_v55  ;;  %v1495_v10 = vsel %vm410_vm5, %v5948_v9, %v6051_v61  ;;  %v8825_v61 = vld [vmem:[#allocation50_spill] sm:$0xff]  ;;  %v8827_v37 = vld [vmem:[#allocation35_spill] sm:$0xff] }
 0x418   : > { %v6378_v53 = vpop.permute.xlu2 %1705  ;;  %v1516_v27 = vsel %vm434_vm7, %v8825_v61, %v8827_v37  ;;  %v8828_v5 = vld [vmem:[#allocation39_spill] sm:$0xff] }
 0x419   : > { %v1373_v33 = vsel %vm6345_vm13, %v1354_v8, 0.0  ;;  %v1313_v17 = vadd.f32 %v1312_v20, %v1294_v1  ;;  %v1518_v46 = vsel %vm434_vm7, %v8829_v21, %v8828_v5  ;;  %v1460_v20 = vsel %vm372_vm0, %v5971_v29, %v5794_v43  ;;  %v8833_v43 = vld [vmem:[#allocation37_spill] sm:$0xff] }
 0x41a   : > { %v1382_v7 = vpack.c.bf16 %v1373_v33, %v1373_v33 }
 0x41b   : > { %v1332_v25 = vadd.f32 %v1331_v44, %v1313_v17  ;;  %v8832_v44 = vld [vmem:[#allocation40_spill] sm:$0xff]  ;;  %v8835_v17 = vld [vmem:[#allocation42_spill] sm:$0xff] }
 0x41c   : > { %1390 = vst [vmem:[%s6278_s14 + $0x34] sm:$0xf] %v1382_v7  ;;  %v8836_v7 = vld [vmem:[#allocation54_spill] sm:$0xff] }
 0x41d   : > { %v1345_v48 = vmul.f32 0.2, %v1332_v25 }
 0x41e   : > { %1845 = vrot.lane.b32.xlu0 %v1483_v4, %s4374_s12  ;;  %1757 = vperm.xlu1 %4192, %v3850_v22   ;;  %v8837_v22 = vld [vmem:[#allocation36_spill] sm:$0xff] }
 0x41f   : > { %1849 = vrot.lane.b32.xlu2 %v1485_v52, %s4374_s12  ;;  %v1357_v2 = vmax.f32 %v1332_v25, %v1345_v48  ;;  %v1567_v25 = vsel %vm348_vm2, %v8837_v22, %v8836_v7  ;;  %v8838_v52 = vld [vmem:[#allocation24_spill] sm:$0xff] }
 0x420   : > { %v6394_v30 = vpop.permute.xlu2 %1711  ;;  %v1568_v48 = vsel %vm348_vm2, %v8836_v7, %v8838_v52 }
 0x421   : > { %v1376_v24 = vsel %vm6345_vm13, %v1357_v2, 0.0  ;;  %v1484_v2 = vsel %vm398_vm4, %v5845_v49, %v5919_v51  ;;  %v8842_v49 = vld [vmem:[#allocation28_spill] sm:$0xff]  ;;  %v8843_v51 = vld [vmem:[#allocation38_spill] sm:$0xff] }
 0x422   : > { %v1384_v36 = vpack.c.bf16 %v1376_v24, %v1376_v24  ;;  %v1572_v34 = vsel %vm348_vm2, %v8843_v51, %v8842_v49 }
 0x424   : > { %1392 = vst [vmem:[%s6278_s14 + $0x48] sm:$0xf] %v1384_v36 }
 0x426   : > { %1851 = vrot.lane.b32.xlu0 %v5877_v47, %s4374_s12  ;;  %1805 = vrot.lane.b32.xlu1 %v5437_v50, %s4374_s12  ;;  %v6421_v50 = vpop.permute.xlu0 %1701 }
 0x427   : > { %1855 = vrot.lane.b32.xlu2 %v1495_v10, %s4374_s12  ;;  %v8840_v10 = vld [vmem:[#allocation55_spill] sm:$0xff] }
 0x428   : > { %v6407_v56 = vpop.permute.xlu2 %1717  ;;  %v1571_v26 = vsel %vm348_vm2, %v8840_v10, %v8843_v51  ;;  %v8871_v51 = vld [vmem:[#allocation73_spill] sm:$0xff] }
 0x42e   : > { %1857 = vrot.lane.b32.xlu0 %v1496_v0, %s4374_s12  ;;  %1811 = vrot.lane.b32.xlu1 %v1437_v11, %s4374_s12  ;;  %v8841_v11 = vld [vmem:[#allocation53_spill] sm:$0xff]  ;;  %v1494_v0 = vsel %vm410_vm5, %v5877_v47, %v5948_v9 }
 0x42f   : > { %1861 = vrot.lane.b32.xlu2 %v1505_v35, %s4374_s12  ;;  %v1570_v45 = vsel %vm348_vm2, %v8841_v11, %v8840_v10  ;;  %v8870_v10 = vld [vmem:[#allocation60_spill] sm:$0xff] }
 0x430   : > { %v6423_v32 = vpop.permute.xlu2 %1747 }
 0x431   : > { %8823 = vst [vmem:[#allocation25_spill] sm:$0xff] %v6423_v32  ;;  %v8878_v32 = vld [vmem:[#allocation47_spill] sm:$0xff] }
 0x436   : > { %1863 = vrot.lane.b32.xlu0 %v1506_v38, %s4374_s12  ;;  %1817 = vrot.lane.b32.xlu1 %v5917_v13, %s4374_s12 }
 0x437   : > { %1867 = vrot.lane.b32.xlu2 %v8825_v61, %s4374_s12  ;;  %v8844_v61 = vld [vmem:[#allocation48_spill] sm:$0xff] }
 0x438   : > { %v6433_v3 = vpop.permute.xlu2 %1762  ;;  %v6435_v63 = vpop.permute.xlu0 %1707 }
 0x439   : > { %8826 = vst [vmem:[#allocation49_spill] sm:$0xff] %v6433_v3  ;;  %v8869_v3 = vld [vmem:[#allocation27_spill] sm:$0xff] }
 0x43e   : > { %1869 = vrot.lane.b32.xlu0 %v1516_v27, %s4374_s12  ;;  %1823 = vrot.lane.b32.xlu1 %v1450_v28, %s4374_s12  ;;  %v8845_v27 = vld [vmem:[#allocation52_spill] sm:$0xff] }
 0x43f   : > { %1873 = vrot.lane.b32.xlu2 %v1518_v46, %s4374_s12  ;;  %v1590_v47 = vsel %vm360_vm3, %v8845_v27, %v8844_v61  ;;  %v8846_v46 = vld [vmem:[#allocation34_spill] sm:$0xff]  ;;  %v1589_v16 = vsel %vm360_vm3, %v8869_v3, %v8845_v27 }
 0x440   : > { %v6449_v13 = vpop.permute.xlu2 %1807  ;;  %v6451_v55 = vpop.permute.xlu0 %1713 }
 0x446   : > { %1875 = vrot.lane.b32.xlu0 %v8830_v59, %s4374_s12  ;;  %1829 = vrot.lane.b32.xlu1 %v1460_v20, %s4374_s12  ;;  %v1507_v20 = vsel %vm422_vm6, %v8824_v60, %v8846_v46  ;;  %v8847_v59 = vld [vmem:[#allocation56_spill] sm:$0xff]  ;;  %v8850_v60 = vld [vmem:[#allocation57_spill] sm:$0xff] }
 0x447   : > { %1879 = vrot.lane.b32.xlu2 %v8831_v14, %s4374_s12  ;;  %v1591_v14 = vsel %vm360_vm3, %v8844_v61, %v8847_v59 }
 0x448   : > { %v6461_v8 = vpop.permute.xlu2 %1813  ;;  %v6463_v1 = vpop.permute.xlu0 %1719 }
 0x44e   : > { %1881 = vrot.lane.b32.xlu0 %v8832_v44, %s4374_s12  ;;  %1835 = vrot.lane.b32.xlu1 %v5996_v12, %s4374_s12  ;;  %v8848_v44 = vld [vmem:[#allocation18_spill] sm:$0xff] }
 0x44f   : > { %1885 = vrot.lane.b32.xlu2 %v8833_v43, %s4374_s12 }
 0x450   : > { %v6471_v29 = vpop.permute.xlu2 %1819  ;;  %v6473_v33 = vpop.permute.xlu0 %1752 }
 0x451   : > { %8834 = vst [vmem:[#allocation41_spill] sm:$0xff] %v6473_v33  ;;  %v6525_v9 = vpop.permute.xlu1 %1703 }
 0x456   : > { %1887 = vrot.lane.b32.xlu0 %v8835_v17, %s4374_s12  ;;  %1841 = vrot.lane.b32.xlu1 %v5875_v41, %s4374_s12  ;;  %v8839_v41 = vld [vmem:[#allocation21_spill] sm:$0xff] }
 0x457   : > { %1891 = vrot.lane.b32.xlu2 %v1567_v25, %s4374_s12  ;;  %v1593_v25 = vsel %vm360_vm3, %v8848_v44, %v8850_v60 }
 0x458   : > { %v6483_v12 = vpop.permute.xlu2 %1825  ;;  %v6485_v4 = vpop.permute.xlu0 %1803 }
 0x45e   : > { %1893 = vrot.lane.b32.xlu0 %v1568_v48, %s4374_s12  ;;  %1847 = vrot.lane.b32.xlu1 %v1484_v2, %s4374_s12  ;;  %v1517_v48 = vsel %vm434_vm7, %v8827_v37, %v8829_v21  ;;  %v8851_v2 = vld [vmem:[#allocation16_spill] sm:$0xff]  ;;  %v8855_v21 = vld [vmem:[#allocation51_spill] sm:$0xff] }
 0x45f   : > { %1897 = vrot.lane.b32.xlu2 %v8839_v41, %s4374_s12  ;;  %v8854_v37 = vld [vmem:[#allocation44_spill] sm:$0xff] }
 0x460   : > { %v6497_v24 = vpop.permute.xlu0 %1809 }
 0x461   : > { %v6499_v36 = vpop.permute.xlu2 %1831 }
 0x466   : > { %1899 = vrot.lane.b32.xlu0 %v1570_v45, %s4374_s12  ;;  %1853 = vrot.lane.b32.xlu1 %v1494_v0, %s4374_s12 }
 0x467   : > { %1903 = vrot.lane.b32.xlu2 %v1572_v34, %s4374_s12  ;;  %v8853_v34 = vld [vmem:[#allocation26_spill] sm:$0xff] }
 0x468   : > { %v6513_v35 = vpop.permute.xlu0 %1815 }
 0x469   : > { %v6515_v38 = vpop.permute.xlu2 %1837 }
 0x46e   : > { %1905 = vrot.lane.b32.xlu0 %v8842_v49, %s4374_s12  ;;  %1859 = vrot.lane.b32.xlu1 %v8822_v54, %s4374_s12  ;;  %v8849_v54 = vld [vmem:[#allocation17_spill] sm:$0xff]  ;;  %v8852_v49 = vld [vmem:[#allocation59_spill] sm:$0xff] }
 0x46f   : > { %1909 = vrot.lane.b32.xlu2 %v1590_v47, %s4374_s12  ;;  %v1592_v43 = vsel %vm360_vm3, %v8849_v54, %v8848_v44  ;;  %v1611_v61 = vsel %vm372_vm0, %v8853_v34, %v8852_v49  ;;  %v8857_v44 = vld [vmem:[#allocation29_spill] sm:$0xff]  ;;  %v8858_v54 = vld [vmem:[#allocation63_spill] sm:$0xff] }
 0x470   : > { %v6527_v28 = vpop.permute.xlu0 %1821  ;;  %v8861_v49 = vld [vmem:[#allocation69_spill] sm:$0xff] }
 0x471   : > { %v6529_v5 = vpop.permute.xlu2 %1843  ;;  %v8862_v34 = vld [vmem:[#allocation33_spill] sm:$0xff] }
 0x476   : > { %1911 = vrot.lane.b32.xlu0 %v1591_v14, %s4374_s12  ;;  %1865 = vrot.lane.b32.xlu1 %v1507_v20, %s4374_s12  ;;  %v8856_v14 = vld [vmem:[#allocation31_spill] sm:$0xff] }
 0x477   : > { %1915 = vrot.lane.b32.xlu2 %v1592_v43, %s4374_s12 }
 0x478   : > { %v6543_v17 = vpop.permute.xlu1 %1709  ;;  %v6545_v7 = vpop.permute.xlu0 %1827 }
 0x479   : > { %v6547_v22 = vpop.permute.xlu2 %1849 }
 0x47e   : > { %1917 = vrot.lane.b32.xlu0 %v1593_v25, %s4374_s12  ;;  %1871 = vrot.lane.b32.xlu1 %v1517_v48, %s4374_s12 }
 0x47f   : > { %1921 = vrot.lane.b32.xlu2 %v8851_v2, %s4374_s12 }
 0x480   : > { %v6559_v11 = vpop.permute.xlu1 %1715  ;;  %v6561_v45 = vpop.permute.xlu0 %1833 }
 0x481   : > { %v6563_v0 = vpop.permute.xlu2 %1855 }
 0x486   : > { %1923 = vrot.lane.b32.xlu0 %v1611_v61, %s4374_s12  ;;  %1877 = vrot.lane.b32.xlu1 %v8854_v37, %s4374_s12  ;;  %v8863_v61 = vld [vmem:[#allocation62_spill] sm:$0xff] }
 0x487   : > { %1927 = vrot.lane.b32.xlu2 %v8855_v21, %s4374_s12 }
 0x488   : > { %v6573_v47 = vpop.permute.xlu1 %1721  ;;  %v6575_v46 = vpop.permute.xlu0 %1839 }
 0x489   : > { %v6577_v20 = vpop.permute.xlu2 %1861 }
 0x48e   : > { %1929 = vrot.lane.b32.xlu0 %v8856_v14, %s4374_s12  ;;  %1883 = vrot.lane.b32.xlu1 %v8857_v44, %s4374_s12  ;;  %v1569_v44 = vsel %vm348_vm2, %v8838_v52, %v8839_v41  ;;  %v8867_v52 = vld [vmem:[#allocation67_spill] sm:$0xff] }
 0x48f   : > { %1933 = vrot.lane.b32.xlu2 %v8858_v54, %s4374_s12  ;;  %v8865_v54 = vld [vmem:[#allocation66_spill] sm:$0xff]  ;;  %v8868_v41 = vld [vmem:[#allocation75_spill] sm:$0xff] }
 0x490   : > { %v6585_v43 = vpop.permute.xlu1 %1757  ;;  %v6587_v25 = vpop.permute.xlu0 %1845 }
 0x491   : > { %8859 = vst [vmem:[#allocation30_spill] sm:$0xff] %v6585_v43  ;;  %v6589_v48 = vpop.permute.xlu2 %1867  ;;  %v8873_v43 = vld [vmem:[#allocation76_spill] sm:$0xff] }
 0x492   : > { %8860 = vst [vmem:[#allocation43_spill] sm:$0xff] %v6589_v48  ;;  %v1660_v3 = vsel %vm398_vm4, %v8870_v10, %v8873_v43 }
 0x496   : > { %1935 = vrot.lane.b32.xlu0 %v8861_v49, %s4374_s12  ;;  %1889 = vrot.lane.b32.xlu1 %v8862_v34, %s4374_s12 }
 0x497   : > { %1939 = vrot.lane.b32.xlu2 %v8863_v61, %s4374_s12 }
 0x498   : > { %v6597_v37 = vpop.permute.xlu1 %1805  ;;  %v6599_v21 = vpop.permute.xlu0 %1851 }
 0x499   : > { %v6601_v14 = vpop.permute.xlu2 %1873 }
 0x49a   : > { %8864 = vst [vmem:[#allocation23_spill] sm:$0xff] %v6601_v14 }
 0x49e   : > { %1941 = vrot.lane.b32.xlu0 %v8865_v54, %s4374_s12  ;;  %1895 = vrot.lane.b32.xlu1 %v1569_v44, %s4374_s12 }
 0x49f   : > { %1945 = vrot.lane.b32.xlu2 %v6189_v39, %s4374_s12 }
 0x4a0   : > { %v6611_v49 = vpop.permute.xlu1 %1811  ;;  %v6613_v34 = vpop.permute.xlu0 %1857 }
 0x4a1   : > { %v6615_v61 = vpop.permute.xlu2 %1879 }
 0x4a2   : > { %8866 = vst [vmem:[#allocation50_spill] sm:$0xff] %v6615_v61 }
 0x4a6   : > { %1947 = vrot.lane.b32.xlu0 %v8867_v52, %s4374_s12  ;;  %1901 = vrot.lane.b32.xlu1 %v1571_v26, %s4374_s12  ;;  %v1659_v26 = vsel %vm398_vm4, %v8871_v51, %v8870_v10  ;;  %v1594_v10 = vsel %vm360_vm3, %v8850_v60, %v8851_v2  ;;  %v8882_v2 = vld [vmem:[#allocation61_spill] sm:$0xff] }
 0x4a7   : > { %1951 = vrot.lane.b32.xlu2 %v8868_v41, %s4374_s12 }
 0x4a8   : > { %v6625_v44 = vpop.permute.xlu1 %1817  ;;  %v6627_v39 = vpop.permute.xlu0 %1863 }
 0x4a9   : > { %v6629_v54 = vpop.permute.xlu2 %1885 }
 0x4ae   : > { %1953 = vrot.lane.b32.xlu0 %v6208_v15, %s4374_s12  ;;  %1907 = vrot.lane.b32.xlu1 %v1589_v16, %s4374_s12  ;;  %v8874_v15 = vld [vmem:[#allocation65_spill] sm:$0xff] }
 0x4af   : > { %1957 = vrot.lane.b32.xlu2 %v1659_v26, %s4374_s12  ;;  %v1662_v33 = vsel %vm398_vm4, %v8874_v15, %v6249_v19 }
 0x4b0   : > { %v6641_v52 = vpop.permute.xlu1 %1823  ;;  %v6643_v41 = vpop.permute.xlu0 %1869 }
 0x4b1   : > { %8872 = vst [vmem:[#allocation35_spill] sm:$0xff] %v6643_v41  ;;  %v6645_v23 = vpop.permute.xlu2 %1891  ;;  %v8886_v41 = vld [vmem:[#allocation74_spill] sm:$0xff] }
 0x4b6   : > { %1959 = vrot.lane.b32.xlu0 %v1660_v3, %s4374_s12  ;;  %1913 = vrot.lane.b32.xlu1 %v8847_v59, %s4374_s12  ;;  %v8877_v3 = vld [vmem:[#allocation68_spill] sm:$0xff] }
 0x4b7   : > { %1963 = vrot.lane.b32.xlu2 %v8874_v15, %s4374_s12  ;;  %v1664_v59 = vsel %vm398_vm4, %v8878_v32, %v8877_v3  ;;  %v8881_v15 = vld [vmem:[#allocation71_spill] sm:$0xff] }
 0x4b8   : > { %v6655_v16 = vpop.permute.xlu1 %1829  ;;  %v6657_v27 = vpop.permute.xlu0 %1875  ;;  %v1682_v60 = vsel %vm410_vm5, %v6271_v31, %v8881_v15  ;;  %v1683_v48 = vsel %vm410_vm5, %v8881_v15, %v6297_v58  ;;  %v1685_v58 = vsel %vm410_vm5, %v8886_v41, %v6316_v62  ;;  %v1723_v15 = vsel %vm382_vm1, %v6363_v42, %v6421_v50 }
 0x4b9   : > { %8875 = vst [vmem:[#allocation39_spill] sm:$0xff] %v6657_v27  ;;  %v6659_v26 = vpop.permute.xlu2 %1897 }
 0x4ba   : > { %8876 = vst [vmem:[#allocation45_spill] sm:$0xff] %v6659_v26 }
 0x4be   : > { %1965 = vrot.lane.b32.xlu0 %v1662_v33, %s4374_s12  ;;  %1919 = vrot.lane.b32.xlu1 %v1594_v10, %s4374_s12 }
 0x4bf   : > { %1969 = vrot.lane.b32.xlu2 %v1664_v59, %s4374_s12  ;;  %v8884_v59 = vld [vmem:[#allocation58_spill] sm:$0xff] }
 0x4c0   : > { %v1836_v14 = vpop.permute.xlu1 %1835  ;;  %v6673_v26 = vpop.permute.xlu0 %1881 }
 0x4c1   : > { %8879 = vst [vmem:[#allocation19_spill] sm:$0xff] %v6673_v26  ;;  %v6675_v61 = vpop.permute.xlu2 %1903  ;;  %v8885_v26 = vld [vmem:[#allocation64_spill] sm:$0xff] }
 0x4c2   : > { %8880 = vst [vmem:[#allocation22_spill] sm:$0xff] %v6675_v61  ;;  %v1614_v61 = vsel %vm372_vm0, %v8885_v26, %v8884_v59 }
 0x4c6   : > { %1971 = vrot.lane.b32.xlu0 %v6274_v57, %s4374_s12  ;;  %1925 = vrot.lane.b32.xlu1 %v8882_v2, %s4374_s12 }
 0x4c7   : > { %1975 = vrot.lane.b32.xlu2 %v1682_v60, %s4374_s12  ;;  %v1684_v60 = vsel %vm410_vm5, %v6306_v40, %v8886_v41  ;;  %v8888_v41 = vld [vmem:[#allocation72_spill] sm:$0xff] }
 0x4c8   : > { %v6685_v33 = vpop.permute.xlu1 %1841  ;;  %v6687_v10 = vpop.permute.xlu0 %1887 }
 0x4c9   : > { %8883 = vst [vmem:[#allocation40_spill] sm:$0xff] %v6687_v10  ;;  %v6689_v3 = vpop.permute.xlu2 %1909 }
 0x4ce   : > { %1977 = vrot.lane.b32.xlu0 %v1683_v48, %s4374_s12  ;;  %1931 = vrot.lane.b32.xlu1 %v1614_v61, %s4374_s12 }
 0x4cf   : > { %1981 = vrot.lane.b32.xlu2 %v1684_v60, %s4374_s12 }
 0x4d0   : > { %v6703_v2 = vpop.permute.xlu1 %1847  ;;  %v6705_v10 = vpop.permute.xlu0 %1893 }
 0x4d1   : > { %v6707_v27 = vpop.permute.xlu2 %1915 }
 0x4d6   : > { %1983 = vrot.lane.b32.xlu0 %v1685_v58, %s4374_s12  ;;  %1937 = vrot.lane.b32.xlu1 %v6167_v18, %s4374_s12 }
 0x4d7   : > { %1987 = vrot.lane.b32.xlu2 %v6363_v42, %s4374_s12  ;;  %v1726_v42 = vsel %vm382_vm1, %v6435_v63, %v6543_v17 }
 0x4d8   : > { %v6717_v48 = vpop.permute.xlu1 %1853  ;;  %v6719_v61 = vpop.permute.xlu0 %1899 }
 0x4d9   : > { %v6721_v26 = vpop.permute.xlu2 %1921 }
 0x4da   : > { %8887 = vst [vmem:[#allocation37_spill] sm:$0xff] %v6721_v26  ;;  %v8889_v26 = vld [vmem:[#allocation70_spill] sm:$0xff] }
 0x4de   : > { %1943 = vrot.lane.b32.xlu1 %v8888_v41, %s4374_s12  ;;  %1989 = vrot.lane.b32.xlu0 %v1723_v15, %s4374_s12  ;;  %v2037_v15 = vsel %vm936_vm8, %v6599_v21, %v6717_v48  ;;  %v1727_v21 = vsel %vm382_vm1, %v6394_v30, %v6451_v55 }
 0x4df   : > { %1993 = vrot.lane.b32.xlu2 %v6525_v9, %s4374_s12 }
 0x4e0   : > { %v1860_v18 = vpop.permute.xlu1 %1859  ;;  %v6731_v59 = vpop.permute.xlu0 %1905 }
 0x4e1   : > { %v6733_v60 = vpop.permute.xlu2 %1927  ;;  %v2040_v58 = vsel %vm936_vm8, %v1860_v18, %v6577_v20 }
 0x4e2   : > { %2187 = vmatpush.bf16.msrb.mxu3 %v2040_v58 }
 0x4e6   : > { %1949 = vrot.lane.b32.xlu1 %v8889_v26, %s4374_s12  ;;  %1995 = vrot.lane.b32.xlu0 %v6378_v53, %s4374_s12  ;;  %v2034_v26 = vsel %vm936_vm8, %v6529_v5, %v6587_v25 }
 0x4e7   : > { %1999 = vrot.lane.b32.xlu2 %v1726_v42, %s4374_s12  ;;  %2188 = vmatpush.bf16.msrb.mxu3 %v2037_v15  ;;  %v2031_v42 = vsel %vm936_vm8, %v1836_v14, %v6515_v38  ;;  %v1728_v14 = vsel %vm382_vm1, %v6451_v55, %v6559_v11  ;;  %v2022_v55 = vsel %vm936_vm8, %v6611_v49, %v6461_v8 }
 0x4e8   : > { %v6748_v41 = vpop.permute.xlu1 %1865  ;;  %v6750_v18 = vpop.permute.xlu0 %1911  ;;  %v2019_v49 = vsel %vm936_vm8, %v6485_v4, %v6597_v37  ;;  %v3926_v4 = vld [vmem:[%s4528_s15 + $0x58] sm:$0xf] }
 0x4e9   : > { %v6752_v58 = vpop.permute.xlu2 %1933 }
 0x4ea   : > { %8890 = vst [vmem:[#allocation42_spill] sm:$0xff] %v6752_v58 }
 0x4eb   : > { %2189 = vmatpush.bf16.msrb.mxu3 %v2034_v26 }
 0x4ee   : > { %1955 = vrot.lane.b32.xlu1 %v8871_v51, %s4374_s12  ;;  %2001 = vrot.lane.b32.xlu0 %v6543_v17, %s4374_s12  ;;  %v2028_v17 = vsel %vm936_vm8, %v6545_v7, %v6655_v16  ;;  %v8891_v51 = vld [vmem:[#allocation46_spill] sm:$0xff] }
 0x4ef   : > { %2005 = vrot.lane.b32.xlu2 %v1727_v21, %s4374_s12  ;;  %2190 = vmatpush.bf16.msrb.mxu3 %v2031_v42  ;;  %v1661_v58 = vsel %vm398_vm4, %v8873_v43, %v8891_v51  ;;  %v2025_v21 = vsel %vm936_vm8, %v6471_v29, %v6527_v28  ;;  %v4069_v29 = vld [vmem:[#allocation7 + $0x4c] sm:$0xf0]  ;;  %v1729_v51 = vsel %vm382_vm1, %v6407_v56, %v6463_v1 }
 0x4f0   : > { %v6767_v15 = vpop.permute.xlu1 %1871  ;;  %v6769_v5 = vpop.permute.xlu0 %1917 }
 0x4f1   : > { %v6771_v26 = vpop.permute.xlu2 %1939 }
 0x4f3   : > { %2191 = vmatpush.bf16.msrb.mxu3 %v2028_v17  ;;  %v1663_v17 = vsel %vm398_vm4, %v6249_v19, %v8878_v32  ;;  %v2041_v19 = vsel %vm936_vm8, %v6577_v20, %v6627_v39  ;;  %v3918_v32 = vld [vmem:[%s4528_s15 + $0x50] sm:$0xf]  ;;  %v2038_v20 = vsel %vm936_vm8, %v6717_v48, %v6563_v0  ;;  %v4076_v48 = vld [vmem:[%s4528_s15 + $0x5c] sm:$0xf] }
 0x4f6   : > { %1961 = vrot.lane.b32.xlu1 %v1661_v58, %s4374_s12  ;;  %2007 = vrot.lane.b32.xlu0 %v1728_v14, %s4374_s12  ;;  %v3854_v58 = vld [vmem:[#allocation7 + $0x40] sm:$0xf] }
 0x4f7   : > { %2011 = vrot.lane.b32.xlu2 %v6407_v56, %s4374_s12  ;;  %2192 = vmatpush.bf16.msrb.mxu3 %v2025_v21  ;;  %v6809_v14 = vor.u32 %v4069_v29, %v3854_v58  ;;  %v4077_v56 = vld [vmem:[%s4528_s15 + $0x60] sm:$0xf0]  ;;  %v4078_v58 = vld [vmem:[%s4528_s15 + $0x68] sm:$0xf0] }
 0x4f8   : > { %v6789_v7 = vpop.permute.xlu1 %1877  ;;  %v6791_v43 = vpop.permute.xlu0 %1923 }
 0x4f9   : > { %v6793_v42 = vpop.permute.xlu2 %1945 }
 0x4fa   : > { %8892 = vst [vmem:[#allocation54_spill] sm:$0xff] %v6793_v42  ;;  %v4073_v42 = vld [vmem:[#allocation7 + $0x6c] sm:$0xf0] }
 0x4fb   : > { %2193 = vmatpush.bf16.msrb.mxu3 %v2022_v55 }
 0x4fe   : > { %1967 = vrot.lane.b32.xlu1 %v1663_v17, %s4374_s12  ;;  %2013 = vrot.lane.b32.xlu0 %v1729_v51, %s4374_s12  ;;  %v6827_v17 = vor.u32 %v4077_v56, %v3918_v32  ;;  %v6832_v51 = vor.u32 %v4078_v58, %v3926_v4  ;;  %v3928_v32 = vld [vmem:[%s4528_s15 + $0x6c] sm:$0xf0] }
 0x4ff   : > { %2017 = vrot.lane.b32.xlu2 %v6573_v47, %s4374_s12  ;;  %2194 = vmatpush.bf16.msrb.mxu3 %v2019_v49  ;;  %v1681_v49 = vsel %vm410_vm5, %v6274_v57, %v6271_v31  ;;  %v4075_v31 = vld [vmem:[%s4528_s15 + $0x54] sm:$0xf]  ;;  %v3920_v57 = vld [vmem:[%s4528_s15 + $0x64] sm:$0xf0] }
 0x500   : > { %v6818_v21 = vpop.permute.xlu1 %1883  ;;  %v6820_v55 = vpop.permute.xlu0 %1929  ;;  %8894 = vst [vmem:[#allocation24_spill] sm:$0xff] %v6827_v17 }
 0x501   : > { %v6824_v29 = vpop.permute.xlu2 %1951  ;;  %8895 = vst [vmem:[#allocation21_spill] sm:$0xff] %v6832_v51 }
 0x502   : > { %8893 = vst [vmem:[#allocation36_spill] sm:$0xff] %v6824_v29  ;;  %2195 = vmatmul.bf16.vlgmr.msrb.gmra.mxu3 %v6809_v14  ;;  %v6860_v29 = vor.u32 %v4075_v31, %v3920_v57 }
 0x503   : > { %2263 = vmatpush.bf16.msra.mxu3 %v2041_v19  ;;  %v2035_v19 = vsel %vm936_vm8, %v6587_v25, %v6703_v2  ;;  %v2032_v25 = vsel %vm936_vm8, %v6515_v38, %v6575_v46 }
 0x506   : > { %1973 = vrot.lane.b32.xlu1 %v1681_v49, %s4374_s12  ;;  %2504 = vrot.lane.b32.xlu0 %v6827_v17, %s4365_s24  ;;  %v3870_v49 = vld [vmem:[#allocation7 + $0x60] sm:$0xf] }
 0x507   : > { %2264 = vmatpush.bf16.msra.mxu3 %v2038_v20  ;;  %2508 = vrot.lane.b32.xlu2 %v6832_v51, %s4365_s24  ;;  %v6855_v20 = vor.u32 %v4076_v48, %v3928_v32  ;;  %v2029_v48 = vsel %vm936_vm8, %v6655_v16, %v6499_v36  ;;  %v1686_v16 = vsel %vm410_vm5, %v6316_v62, %v6326_v6 }
 0x508   : > { %v6847_v56 = vpop.permute.xlu1 %1889  ;;  %v6849_v4 = vpop.permute.xlu0 %1935  ;;  %v2020_v62 = vsel %vm936_vm8, %v6597_v37, %v6449_v13  ;;  %v2042_v6 = vsel %vm936_vm8, %v6627_v39, %v6748_v41  ;;  %v2039_v37 = vsel %vm936_vm8, %v6563_v0, %v6613_v34 }
 0x509   : > { %v6853_v58 = vpop.permute.xlu2 %1957  ;;  %8896 = vst [vmem:[#allocation55_spill] sm:$0xff] %v6855_v20 }
 0x50b   : > { %2265 = vmatpush.bf16.msra.mxu3 %v2035_v19  ;;  %v6866_v19 = vor.u32 %v4073_v42, %v3870_v49  ;;  %v2023_v42 = vsel %vm936_vm8, %v6461_v8, %v6513_v35  ;;  %v1724_v8 = vsel %vm382_vm1, %v6421_v50, %v6525_v9  ;;  %v2036_v50 = vsel %vm936_vm8, %v6703_v2, %v6547_v22 }
 0x50c   : > { %v1725_v9 = vsel %vm382_vm1, %v6378_v53, %v6435_v63  ;;  %v2033_v22 = vsel %vm936_vm8, %v6575_v46, %v6685_v33  ;;  %v2030_v53 = vsel %vm936_vm8, %v6499_v36, %v6561_v45  ;;  %v3934_v63 = vld [vmem:[%s4528_s15 + $0x60] sm:$0xf]  ;;  %v4079_v46 = vld [vmem:[%s4528_s15 + $0x70] sm:$0xf0]  ;;  %v2024_v45 = vsel %vm936_vm8, %v6513_v35, %v6625_v44 }
 0x50e   : > { %1979 = vrot.lane.b32.xlu1 %v6306_v40, %s4374_s12  ;;  %2510 = vrot.lane.b32.xlu0 %v6855_v20, %s4365_s24  ;;  %v2026_v40 = vsel %vm936_vm8, %v6527_v28, %v6641_v52 }
 0x50f   : > { %2266 = vmatpush.bf16.msra.mxu3 %v2032_v25  ;;  %2517 = vrot.lane.b32.xlu2 %v6860_v29, %s4366_s16 }
 0x510   : > { %v6873_v38 = vpop.permute.xlu1 %1895  ;;  %v6875_v32 = vpop.permute.xlu0 %1941 }
 0x511   : > { %v6877_v31 = vpop.permute.xlu2 %1963 }
 0x512   : > { %2200 = vmatmul.bf16.gmra.mxu3 %v6866_v19 }
 0x513   : > { %2267 = vmatpush.bf16.msra.mxu3 %v2029_v48  ;;  %v2027_v48 = vsel %vm936_vm8, %v6641_v52, %v6483_v12  ;;  %v2021_v52 = vsel %vm936_vm8, %v6449_v13, %v6497_v24  ;;  %v2061_v13 = vsel %vm936_vm8, %v6707_v27, %v6769_v5 }
 0x516   : > { %1985 = vrot.lane.b32.xlu1 %v1686_v16, %s4374_s12  ;;  %2519 = vrot.lane.b32.xlu0 %v6832_v51, %s4366_s16 }
 0x517   : > { %2268 = vmatpush.bf16.msra.mxu3 %v2026_v40  ;;  %2526 = vrot.lane.b32.xlu2 %v6827_v17, %s4367_s30 }
 0x518   : > { %v6894_v57 = vpop.permute.xlu1 %1901  ;;  %v6896_v28 = vpop.permute.xlu0 %1947 }
 0x519   : > { %v6898_v25 = vpop.permute.xlu2 %1969 }
 0x51b   : > { %2269 = vmatpush.bf16.msra.mxu3 %v2023_v42 }
 0x51e   : > { %1991 = vrot.lane.b32.xlu1 %v1724_v8, %s4374_s12  ;;  %2528 = vrot.lane.b32.xlu0 %v6860_v29, %s4367_s30 }
 0x51f   : > { %2270 = vmatpush.bf16.msra.mxu3 %v2020_v62  ;;  %2532 = vrot.lane.b32.xlu2 %v6855_v20, %s4367_s30 }
 0x520   : > { %v1908_v49 = vpop.permute.xlu1 %1907  ;;  %v6917_v39 = vpop.permute.xlu0 %1953 }
 0x521   : > { %v6919_v41 = vpop.permute.xlu2 %1975 }
 0x522   : > { %2271 = vmatmul.bf16.vlgmr.msra.gmra.mxu3 %v6809_v14 }
 0x523   : > { %2339 = vmatpush.bf16.msrb.mxu3 %v2042_v6  ;;  %v2052_v6 = vsel %vm936_vm8, %v6645_v23, %v6705_v10  ;;  %v4080_v23 = vld [vmem:[%s4538_s27 + $0xa4] sm:$0xf] }
 0x526   : > { %1997 = vrot.lane.b32.xlu1 %v1725_v9, %s4374_s12  ;;  %2537 = vrot.lane.b32.xlu0 %v6860_v29, %s4368_s9 }
 0x527   : > { %2340 = vmatpush.bf16.msrb.mxu3 %v2039_v37  ;;  %2541 = vrot.lane.b32.xlu2 %v6855_v20, %s4368_s9  ;;  %v3940_v37 = vld [vmem:[%s4538_s27 + $0xb4] sm:$0xf0] }
 0x528   : > { %v6933_v0 = vpop.permute.xlu1 %1913  ;;  %v6938_v34 = vpop.permute.xlu0 %1959 }
 0x529   : > { %v6940_v2 = vpop.permute.xlu2 %1981 }
 0x52b   : > { %2341 = vmatpush.bf16.msrb.mxu3 %v2036_v50 }
 0x52e   : > { %2003 = vrot.lane.b32.xlu1 %v6394_v30, %s4374_s12  ;;  %2550 = vrot.lane.b32.xlu0 %v6860_v29, %s4369_s10  ;;  %v6961_v30 = vor.u32 %v4079_v46, %v3934_v63  ;;  %v3856_v63 = vld [vmem:[#allocation7 + $0x50] sm:$0xf0]  ;;  %v7042_v46 = vor.u32 %v4080_v23, %v3940_v37 }
 0x52f   : > { %2342 = vmatpush.bf16.msrb.mxu3 %v2033_v22  ;;  %2554 = vrot.lane.b32.xlu2 %v6855_v20, %s4369_s10 }
 0x530   : > { %v6953_v33 = vpop.permute.xlu1 %1919  ;;  %v6958_v40 = vpop.permute.xlu0 %1965  ;;  %8898 = vst [vmem:[#allocation53_spill] sm:$0xff] %v7042_v46 }
 0x531   : > { %v1988_v36 = vpop.permute.xlu2 %1987  ;;  %v2062_v23 = vsel %vm936_vm8, %v6769_v5, %v6953_v33 }
 0x532   : > { %2276 = vmatmul.bf16.gmra.mxu3 %v6866_v19 }
 0x533   : > { %2343 = vmatpush.bf16.msrb.mxu3 %v2030_v53  ;;  %v4067_v53 = vld [vmem:[#allocation7 + $0x44] sm:$0xf] }
 0x536   : > { %2009 = vrot.lane.b32.xlu1 %v6559_v11, %s4374_s12  ;;  %2556 = vrot.lane.b32.xlu0 %v6961_v30, %s4369_s10  ;;  %v1730_v11 = vsel %vm382_vm1, %v6463_v1, %v6573_v47  ;;  %v2058_v1 = vsel %vm936_vm8, %v1908_v49, %v6689_v3  ;;  %v2055_v47 = vsel %vm936_vm8, %v6719_v61, %v6894_v57 }
 0x537   : > { %2344 = vmatpush.bf16.msrb.mxu3 %v2027_v48  ;;  %2563 = vrot.lane.b32.xlu2 %v6832_v51, %s4370_s17  ;;  %v2049_v61 = vsel %vm936_vm8, %v6818_v21, %v6629_v54  ;;  %v8897_v21 = vld [vmem:[#allocation39_spill] sm:$0xff] }
 0x538   : > { %v1926_v12 = vpop.permute.xlu1 %1925  ;;  %v6975_v16 = vpop.permute.xlu0 %1971  ;;  %v2046_v22 = vsel %vm936_vm8, %v8897_v21, %v6789_v7  ;;  %v8899_v48 = vld [vmem:[#allocation35_spill] sm:$0xff] }
 0x539   : > { %v6977_v42 = vpop.permute.xlu2 %1993  ;;  %v2064_v35 = vsel %vm936_vm8, %v6791_v43, %v1926_v12  ;;  %v4085_v21 = vld [vmem:[%s4538_s27 + $0xcc] sm:$0xf] }
 0x53a   : > { %2206 = vmatpush.bf16.msrb.mxu0 %v2064_v35  ;;  %v3946_v35 = vld [vmem:[%s4538_s27 + $0xa8] sm:$0xf] }
 0x53b   : > { %2345 = vmatpush.bf16.msrb.mxu3 %v2024_v45  ;;  %v7051_v45 = vor.u32 %v4067_v53, %v3856_v63  ;;  %v4086_v63 = vld [vmem:[%s4538_s27 + $0xd4] sm:$0xf] }
 0x53e   : > { %2015 = vrot.lane.b32.xlu1 %v1730_v11, %s4374_s12  ;;  %2565 = vrot.lane.b32.xlu0 %v6855_v20, %s4370_s17  ;;  %v4083_v11 = vld [vmem:[%s4538_s27 + $0xb8] sm:$0xf0] }
 0x53f   : > { %2346 = vmatpush.bf16.msrb.mxu3 %v2021_v52  ;;  %2207 = vmatpush.bf16.msrb.mxu0 %v2061_v13  ;;  %v2065_v52 = vsel %vm936_vm8, %v1926_v12, %v6733_v60  ;;  %v7068_v12 = vor.u32 %v4083_v11, %v3946_v35  ;;  %v8905_v35 = vld [vmem:[#allocation22_spill] sm:$0xff]  ;;  %v4071_v11 = vld [vmem:[#allocation7 + $0x64] sm:$0xf] }
 0x540   : > { %2572 = vrot.lane.b32.xlu2 %v6860_v29, %s4371_s23  ;;  %v6992_v24 = vpop.permute.xlu1 %1931  ;;  %v6994_v44 = vpop.permute.xlu0 %1977 }
 0x541   : > { %v6996_v43 = vpop.permute.xlu2 %1999  ;;  %8901 = vst [vmem:[#allocation28_spill] sm:$0xff] %v7068_v12 }
 0x542   : > { %2347 = vmatmul.bf16.vlgmr.msrb.gmra.mxu3 %v6809_v14 }
 0x543   : > { %2208 = vmatpush.bf16.msrb.mxu0 %v2058_v1 }
 0x546   : > { %2506 = vrot.lane.b32.xlu1 %v6860_v29, %s4365_s24  ;;  %2574 = vrot.lane.b32.xlu0 %v6832_v51, %s4371_s23 }
 0x547   : > { %2209 = vmatpush.bf16.msrb.mxu0 %v2055_v47  ;;  %v3954_v47 = vld [vmem:[%s4538_s27 + $0xc8] sm:$0xf] }
 0x548   : > { %2578 = vrot.lane.b32.xlu2 %v6961_v30, %s4371_s23  ;;  %v7010_v27 = vpop.permute.xlu1 %1937  ;;  %v7012_v14 = vpop.permute.xlu0 %1983 }
 0x549   : > { %v7014_v62 = vpop.permute.xlu2 %2005 }
 0x54b   : > { %2210 = vmatpush.bf16.msrb.mxu0 %v2052_v6  ;;  %v4087_v6 = vld [vmem:[%s4538_s27 + $0xd8] sm:$0xf0] }
 0x54c   : > { %v7073_v37 = vor.u32 %v4087_v6, %v3954_v47  ;;  %v3872_v47 = vld [vmem:[#allocation7 + $0x70] sm:$0xf0] }
 0x54e   : > { %2515 = vrot.lane.b32.xlu1 %v6827_v17, %s4366_s16  ;;  %2583 = vrot.lane.b32.xlu0 %v6860_v29, %s4372_s26  ;;  %8902 = vst [vmem:[#allocation38_spill] sm:$0xff] %v7073_v37  ;;  %v2044_v17 = vsel %vm936_vm8, %v8899_v48, %v6767_v15 }
 0x54f   : > { %2211 = vmatpush.bf16.msrb.mxu0 %v2049_v61 }
 0x550   : > { %2587 = vrot.lane.b32.xlu2 %v6855_v20, %s4372_s26  ;;  %v7028_v8 = vpop.permute.xlu1 %1943  ;;  %v7030_v49 = vpop.permute.xlu0 %1989 }
 0x551   : > { %v7034_v50 = vpop.permute.xlu2 %2011  ;;  %v2088_v9 = vsel %vm936_vm8, %v1988_v36, %v7030_v49 }
 0x552   : > { %2352 = vmatmul.bf16.gmra.mxu3 %v6866_v19  ;;  %2225 = vmatpush.bf16.msrb.mxu1 %v2088_v9  ;;  %v8900_v19 = vld [vmem:[#allocation43_spill] sm:$0xff]  ;;  %v2059_v9 = vsel %vm936_vm8, %v6689_v3, %v6750_v18  ;;  %v2056_v3 = vsel %vm936_vm8, %v6894_v57, %v8905_v35  ;;  %v3938_v57 = vld [vmem:[%s4538_s27 + $0xa0] sm:$0xf] }
 0x553   : > { %2212 = vmatpush.bf16.msrb.mxu0 %v2046_v22  ;;  %v2043_v36 = vsel %vm936_vm8, %v8900_v19, %v8899_v48  ;;  %v3956_v22 = vld [vmem:[%s4538_s27 + $0xdc] sm:$0xf0]  ;;  %v3964_v19 = vld [vmem:[%s4538_s27 + $0xe4] sm:$0xf0] }
 0x554   : > { %v7099_v6 = vor.u32 %v4086_v63, %v3964_v19  ;;  %v8912_v48 = vld [vmem:[#allocation37_spill] sm:$0xff] }
 0x556   : > { %2521 = vrot.lane.b32.xlu1 %v6855_v20, %s4366_s16  ;;  %2589 = vrot.lane.b32.xlu0 %v6961_v30, %s4372_s26  ;;  %8906 = vst [vmem:[#allocation34_spill] sm:$0xff] %v7099_v6 }
 0x557   : > { %2213 = vmatpush.bf16.msrb.mxu0 %v2043_v36 }
 0x558   : > { %2628 = vrot.lane.b32.xlu2 %v7042_v46, %s4365_s24  ;;  %v7059_v13 = vpop.permute.xlu1 %1949  ;;  %v7061_v1 = vpop.permute.xlu0 %1995 }
 0x559   : > { %v7065_v61 = vpop.permute.xlu2 %2017 }
 0x55a   : > { %2214 = vmatmul.bf16.vlgmr.msrb.gmra.mxu0 %v7051_v45 }
 0x55b   : > { %2282 = vmatpush.bf16.msra.mxu0 %v2065_v52  ;;  %v7094_v52 = vor.u32 %v4085_v21, %v3956_v22  ;;  %v4082_v21 = vld [vmem:[%s4538_s27 + $0xb0] sm:$0xf0] }
 0x55d   : > { %8904 = vst [vmem:[#allocation52_spill] sm:$0xff] %v7094_v52 }
 0x55e   : > { %2530 = vrot.lane.b32.xlu1 %v6832_v51, %s4367_s30  ;;  %2630 = vrot.lane.b32.xlu0 %v7068_v12, %s4365_s24 }
 0x55f   : > { %2283 = vmatpush.bf16.msra.mxu0 %v2062_v23  ;;  %v7105_v23 = vor.u32 %v4071_v11, %v3872_v47  ;;  %v8909_v11 = vld [vmem:[#allocation40_spill] sm:$0xff]  ;;  %v8910_v47 = vld [vmem:[#allocation50_spill] sm:$0xff] }
 0x560   : > { %2634 = vrot.lane.b32.xlu2 %v7073_v37, %s4365_s24  ;;  %v7086_v5 = vpop.permute.xlu1 %1955  ;;  %v7088_v53 = vpop.permute.xlu0 %2001 }
 0x561   : > { %v7092_v36 = vpop.permute.xlu2 %2508 }
 0x562   : > { %8903 = vst [vmem:[#allocation48_spill] sm:$0xff] %v7092_v36 }
 0x563   : > { %2284 = vmatpush.bf16.msra.mxu0 %v2059_v9  ;;  %v2053_v9 = vsel %vm936_vm8, %v6705_v10, %v6873_v38  ;;  %v2050_v10 = vsel %vm936_vm8, %v6629_v54, %v8909_v11 }
 0x566   : > { %2539 = vrot.lane.b32.xlu1 %v6832_v51, %s4368_s9  ;;  %2636 = vrot.lane.b32.xlu0 %v7094_v52, %s4365_s24 }
 0x567   : > { %2285 = vmatpush.bf16.msra.mxu0 %v2056_v3  ;;  %v7121_v3 = vor.u32 %v4082_v21, %v3938_v57  ;;  %v4081_v57 = vld [vmem:[%s4538_s27 + $0xac] sm:$0xf]  ;;  %v3948_v21 = vld [vmem:[%s4538_s27 + $0xbc] sm:$0xf0] }
 0x568   : > { %2640 = vrot.lane.b32.xlu2 %v7099_v6, %s4365_s24  ;;  %v7114_v22 = vpop.permute.xlu1 %1961  ;;  %v7116_v63 = vpop.permute.xlu0 %2007 }
 0x569   : > { %v7118_v19 = vpop.permute.xlu2 %2517  ;;  %8908 = vst [vmem:[#allocation18_spill] sm:$0xff] %v7121_v3 }
 0x56a   : > { %8907 = vst [vmem:[#allocation56_spill] sm:$0xff] %v7118_v19  ;;  %2219 = vmatmul.bf16.gmra.mxu0 %v7105_v23 }
 0x56b   : > { %2286 = vmatpush.bf16.msra.mxu0 %v2053_v9  ;;  %v2047_v9 = vsel %vm936_vm8, %v6789_v7, %v8910_v47  ;;  %v7146_v7 = vor.u32 %v4081_v57, %v3948_v21  ;;  %v2063_v21 = vsel %vm936_vm8, %v6953_v33, %v8912_v48 }
 0x56d   : > { %8911 = vst [vmem:[#allocation17_spill] sm:$0xff] %v7146_v7 }
 0x56e   : > { %2552 = vrot.lane.b32.xlu1 %v6832_v51, %s4369_s10  ;;  %2648 = vrot.lane.b32.xlu0 %v7121_v3, %s4366_s16 }
 0x56f   : > { %2287 = vmatpush.bf16.msra.mxu0 %v2050_v10 }
 0x570   : > { %2652 = vrot.lane.b32.xlu2 %v7068_v12, %s4366_s16  ;;  %v7137_v54 = vpop.permute.xlu1 %1967  ;;  %v7139_v10 = vpop.permute.xlu0 %2013 }
 0x571   : > { %v2097_v36 = vsel %vm936_vm8, %v7034_v50, %v7139_v10  ;;  %v7144_v19 = vpop.permute.xlu2 %2526  ;;  %v3962_v50 = vld [vmem:[%s4538_s27 + $0xd0] sm:$0xf] }
 0x572   : > { %2249 = vmatpush.bf16.msrb.mxu2 %v2097_v36  ;;  %v4088_v36 = vld [vmem:[%s4538_s27 + $0xe0] sm:$0xf0] }
 0x573   : > { %2288 = vmatpush.bf16.msra.mxu0 %v2047_v9  ;;  %v2066_v9 = vsel %vm936_vm8, %v6733_v60, %v6820_v55 }
 0x576   : > { %2561 = vrot.lane.b32.xlu1 %v6860_v29, %s4370_s17  ;;  %2654 = vrot.lane.b32.xlu0 %v7146_v7, %s4366_s16 }
 0x577   : > { %2289 = vmatpush.bf16.msra.mxu0 %v2044_v17  ;;  %v7172_v17 = vor.u32 %v4088_v36, %v3962_v50  ;;  %v2057_v50 = vsel %vm936_vm8, %v8905_v35, %v6731_v59 }
 0x578   : > { %2658 = vrot.lane.b32.xlu2 %v7094_v52, %s4366_s16  ;;  %v7162_v57 = vpop.permute.xlu1 %1973  ;;  %v7167_v60 = vpop.permute.xlu0 %2504 }
 0x579   : > { %8913 = vst [vmem:[#allocation57_spill] sm:$0xff] %v7167_v60  ;;  %v7169_v55 = vpop.permute.xlu2 %2532  ;;  %v2082_v59 = vsel %vm936_vm8, %v6975_v16, %v7162_v57  ;;  %v2079_v16 = vsel %vm936_vm8, %v6877_v31, %v6958_v40 }
 0x57a   : > { %8914 = vst [vmem:[#allocation16_spill] sm:$0xff] %v7169_v55  ;;  %2290 = vmatmul.bf16.vlgmr.msra.gmra.mxu0 %v7051_v45 }
 0x57b   : > { %2358 = vmatpush.bf16.msrb.mxu0 %v2066_v9  ;;  %8915 = vst [vmem:[#allocation59_spill] sm:$0xff] %v7172_v17  ;;  %v2060_v9 = vsel %vm936_vm8, %v6750_v18, %v6933_v0 }
 0x57e   : > { %2567 = vrot.lane.b32.xlu1 %v6961_v30, %s4370_s17  ;;  %2660 = vrot.lane.b32.xlu0 %v7172_v17, %s4366_s16  ;;  %v8918_v30 = vld [vmem:[#allocation45_spill] sm:$0xff] }
 0x57f   : > { %2359 = vmatpush.bf16.msrb.mxu0 %v2063_v21  ;;  %v2054_v48 = vsel %vm936_vm8, %v6873_v38, %v8918_v30  ;;  %v2051_v38 = vsel %vm936_vm8, %v8909_v11, %v6847_v56  ;;  %v2076_v56 = vsel %vm936_vm8, %v7086_v5, %v6853_v58  ;;  %v8921_v11 = vld [vmem:[#allocation23_spill] sm:$0xff]  ;;  %v3862_v5 = vld [vmem:[#allocation7 + $0x48] sm:$0xf] }
 0x580   : > { %2670 = vrot.lane.b32.xlu2 %v7121_v3, %s4367_s30  ;;  %v1980_v33 = vpop.permute.xlu1 %1979  ;;  %v7186_v36 = vpop.permute.xlu0 %2510 }
 0x581   : > { %8916 = vst [vmem:[#allocation26_spill] sm:$0xff] %v7186_v36  ;;  %v2085_v18 = vsel %vm936_vm8, %v1980_v33, %v6940_v2  ;;  %v7190_v0 = vpop.permute.xlu2 %2541  ;;  %v8920_v33 = vld [vmem:[#allocation19_spill] sm:$0xff] }
 0x582   : > { %8917 = vst [vmem:[#allocation44_spill] sm:$0xff] %v7190_v0  ;;  %2226 = vmatpush.bf16.msrb.mxu1 %v2085_v18 }
 0x583   : > { %2360 = vmatpush.bf16.msrb.mxu0 %v2060_v9 }
 0x586   : > { %2576 = vrot.lane.b32.xlu1 %v6855_v20, %s4371_s23  ;;  %2672 = vrot.lane.b32.xlu0 %v7042_v46, %s4367_s30 }
 0x587   : > { %2361 = vmatpush.bf16.msrb.mxu0 %v2057_v50  ;;  %2227 = vmatpush.bf16.msrb.mxu1 %v2082_v59  ;;  %v2048_v50 = vsel %vm936_vm8, %v8910_v47, %v8920_v33  ;;  %v2045_v47 = vsel %vm936_vm8, %v6767_v15, %v8921_v11  ;;  %v2070_v15 = vsel %vm936_vm8, %v6771_v26, %v6875_v32  ;;  %v4070_v59 = vld [vmem:[#allocation7 + $0x54] sm:$0xf0]  ;;  %v8922_v33 = vld [vmem:[#allocation42_spill] sm:$0xff] }
 0x588   : > { %2676 = vrot.lane.b32.xlu2 %v7146_v7, %s4367_s30  ;;  %v7204_v35 = vpop.permute.xlu1 %1985  ;;  %v7209_v21 = vpop.permute.xlu0 %2519 }
 0x589   : > { %v7211_v9 = vpop.permute.xlu2 %2554 }
 0x58a   : > { %8919 = vst [vmem:[#allocation51_spill] sm:$0xff] %v7211_v9  ;;  %2295 = vmatmul.bf16.gmra.mxu0 %v7105_v23 }
 0x58b   : > { %2362 = vmatpush.bf16.msrb.mxu0 %v2054_v48  ;;  %2228 = vmatpush.bf16.msrb.mxu1 %v2079_v16  ;;  %v2073_v48 = vsel %vm936_vm8, %v6896_v28, %v7059_v13 }
 0x58e   : > { %2585 = vrot.lane.b32.xlu1 %v6832_v51, %s4372_s26  ;;  %2678 = vrot.lane.b32.xlu0 %v7073_v37, %s4367_s30 }
 0x58f   : > { %2363 = vmatpush.bf16.msrb.mxu0 %v2051_v38  ;;  %2229 = vmatpush.bf16.msrb.mxu1 %v2076_v56  ;;  %v7260_v56 = vor.u32 %v4070_v59, %v3862_v5  ;;  %v2083_v5 = vsel %vm936_vm8, %v7162_v57, %v6919_v41  ;;  %v4074_v57 = vld [vmem:[#allocation7 + $0x74] sm:$0xf0] }
 0x590   : > { %2682 = vrot.lane.b32.xlu2 %v7172_v17, %s4367_s30  ;;  %v7229_v31 = vpop.permute.xlu1 %1991  ;;  %v7234_v18 = vpop.permute.xlu0 %2528 }
 0x591   : > { %v7236_v30 = vpop.permute.xlu2 %2563  ;;  %v2089_v26 = vsel %vm936_vm8, %v7030_v49, %v7229_v31 }
 0x593   : > { %2364 = vmatpush.bf16.msrb.mxu0 %v2048_v50  ;;  %2230 = vmatpush.bf16.msrb.mxu1 %v2073_v48  ;;  %v2067_v50 = vsel %vm936_vm8, %v6992_v24, %v8922_v33  ;;  %v2086_v24 = vsel %vm936_vm8, %v6940_v2, %v7012_v14  ;;  %v4068_v48 = vld [vmem:[#allocation7 + $0x4c] sm:$0xf] }
 0x596   : > { %2626 = vrot.lane.b32.xlu1 %v7121_v3, %s4365_s24  ;;  %2684 = vrot.lane.b32.xlu0 %v7099_v6, %s4367_s30 }
 0x597   : > { %2365 = vmatpush.bf16.msrb.mxu0 %v2045_v47  ;;  %2231 = vmatpush.bf16.msrb.mxu1 %v2070_v15  ;;  %v3864_v15 = vld [vmem:[#allocation7 + $0x58] sm:$0xf0] }
 0x598   : > { %2694 = vrot.lane.b32.xlu2 %v7068_v12, %s4368_s9  ;;  %v7250_v38 = vpop.permute.xlu1 %1997  ;;  %v7252_v28 = vpop.permute.xlu0 %2537  ;;  %v7287_v59 = vor.u32 %v4068_v48, %v3864_v15  ;;  %v8926_v48 = vld [vmem:[#allocation36_spill] sm:$0xff] }
 0x599   : > { %v2091_v2 = vsel %vm936_vm8, %v7061_v1, %v7250_v38  ;;  %v2074_v15 = vsel %vm936_vm8, %v7059_v13, %v8926_v48  ;;  %v2071_v13 = vsel %vm936_vm8, %v6875_v32, %v7028_v8  ;;  %v2068_v32 = vsel %vm936_vm8, %v8922_v33, %v6849_v4 }
 0x59a   : > { %v7254_v16 = vpop.permute.xlu2 %2572  ;;  %2366 = vmatmul.bf16.vlgmr.msrb.gmra.mxu0 %v7051_v45  ;;  %v2092_v33 = vsel %vm936_vm8, %v7250_v38, %v6996_v43 }
 0x59b   : > { %2232 = vmatpush.bf16.msrb.mxu1 %v2067_v50  ;;  %v2080_v50 = vsel %vm936_vm8, %v6958_v40, %v7137_v54  ;;  %v2077_v40 = vsel %vm936_vm8, %v6853_v58, %v6938_v34  ;;  %v3974_v58 = vld [vmem:[%s4538_s27 + $0xd8] sm:$0xf] }
 0x59e   : > { %2233 = vmatmul.bf16.vlgmr.msrb.gmra.mxu1 %v7260_v56  ;;  %2632 = vrot.lane.b32.xlu1 %v7146_v7, %s4365_s24 }
 0x59f   : > { %2301 = vmatpush.bf16.msra.mxu1 %v2089_v26  ;;  %2696 = vrot.lane.b32.xlu0 %v7146_v7, %s4368_s9  ;;  %v3878_v26 = vld [vmem:[#allocation7 + $0x68] sm:$0xf] }
 0x5a0   : > { %2700 = vrot.lane.b32.xlu2 %v7172_v17, %s4368_s9  ;;  %v2004_v45 = vpop.permute.xlu1 %2003  ;;  %v7275_v11 = vpop.permute.xlu0 %2550 }
 0x5a1   : > { %v2094_v49 = vsel %vm936_vm8, %v2004_v45, %v7014_v62 }
 0x5a2   : > { %v7279_v47 = vpop.permute.xlu2 %2578  ;;  %2250 = vmatpush.bf16.msrb.mxu2 %v2094_v49  ;;  %v7305_v49 = vor.u32 %v4074_v57, %v3878_v26  ;;  %v4072_v57 = vld [vmem:[#allocation7 + $0x6c] sm:$0xf] }
 0x5a3   : > { %2302 = vmatpush.bf16.msra.mxu1 %v2086_v24  ;;  %8923 = vst [vmem:[#allocation31_spill] sm:$0xff] %v7279_v47 }
 0x5a6   : > { %2638 = vrot.lane.b32.xlu1 %v7172_v17, %s4365_s24  ;;  %2251 = vmatpush.bf16.msrb.mxu2 %v2091_v2  ;;  %v4089_v2 = vld [vmem:[%s4538_s27 + $0xe8] sm:$0xf0] }
 0x5a7   : > { %2303 = vmatpush.bf16.msra.mxu1 %v2083_v5  ;;  %2702 = vrot.lane.b32.xlu0 %v7099_v6, %s4368_s9  ;;  %v7331_v20 = vor.u32 %v4089_v2, %v3974_v58 }
 0x5a8   : > { %2720 = vrot.lane.b32.xlu2 %v7068_v12, %s4369_s10  ;;  %v2010_v1 = vpop.permute.xlu1 %2009  ;;  %v7298_v24 = vpop.permute.xlu0 %2556 }
 0x5a9   : > { %8924 = vst [vmem:[#allocation29_spill] sm:$0xff] %v7298_v24  ;;  %3884 = vmatmul.msk.bf16.vlgmr.msrb.gmra.mxu2 %vm1099_vm9, %v7287_v59 }
 0x5aa   : > { %v7302_v45 = vpop.permute.xlu2 %2587  ;;  %2371 = vmatmul.bf16.gmra.mxu0 %v7105_v23 }
 0x5ab   : > { %2304 = vmatpush.bf16.msra.mxu1 %v2080_v50  ;;  %8925 = vst [vmem:[#allocation63_spill] sm:$0xff] %v7302_v45 }
 0x5ae   : > { %2238 = vmatmul.bf16.gmra.mxu1 %v7305_v49  ;;  %2650 = vrot.lane.b32.xlu1 %v7042_v46, %s4366_s16 }
 0x5af   : > { %2305 = vmatpush.bf16.msra.mxu1 %v2077_v40  ;;  %2722 = vrot.lane.b32.xlu0 %v7146_v7, %s4369_s10  ;;  %v3880_v40 = vld [vmem:[#allocation7 + $0x78] sm:$0xf0] }
 0x5b0   : > { %2726 = vrot.lane.b32.xlu2 %v7094_v52, %s4369_s10  ;;  %v2016_v23 = vpop.permute.xlu1 %2015  ;;  %v7320_v5 = vpop.permute.xlu0 %2565  ;;  %v7336_v45 = vor.u32 %v4072_v57, %v3880_v40 }
 0x5b1   : > { %v2098_v50 = vsel %vm936_vm8, %v7139_v10, %v2016_v23 }
 0x5b2   : > { %v7326_v26 = vpop.permute.xlu2 %2628  ;;  %2325 = vmatpush.bf16.msra.mxu2 %v2098_v50  ;;  %v2099_v50 = vsel %vm936_vm8, %v2016_v23, %v7065_v61  ;;  %v2084_v61 = vsel %vm936_vm8, %v6919_v41, %v6994_v44  ;;  %v4084_v23 = vld [vmem:[%s4538_s27 + $0xc0] sm:$0xf0]  ;;  %v2081_v41 = vsel %vm936_vm8, %v7137_v54, %v6898_v25  ;;  %v2075_v54 = vsel %vm936_vm8, %v8926_v48, %v6917_v39 }
 0x5b3   : > { %2306 = vmatpush.bf16.msra.mxu1 %v2074_v15  ;;  %8927 = vst [vmem:[#allocation69_spill] sm:$0xff] %v7326_v26  ;;  %v2095_v15 = vsel %vm936_vm8, %v7014_v62, %v7116_v63  ;;  %v2090_v62 = vsel %vm936_vm8, %v7229_v31, %v6977_v42  ;;  %v2087_v42 = vsel %vm936_vm8, %v7012_v14, %v7204_v35  ;;  %v3970_v35 = vld [vmem:[%s4538_s27 + $0xb0] sm:$0xf] }
 0x5b4   : > { %v2096_v31 = vsel %vm936_vm8, %v7116_v63, %v2010_v1  ;;  %v2093_v63 = vsel %vm936_vm8, %v6996_v43, %v7088_v53  ;;  %v7389_v1 = vor.u32 %v4084_v23, %v3970_v35  ;;  %v2078_v43 = vsel %vm936_vm8, %v6938_v34, %v7114_v22  ;;  %v8934_v22 = vld [vmem:[#allocation54_spill] sm:$0xff] }
 0x5b5   : > { %v2072_v40 = vsel %vm936_vm8, %v7028_v8, %v8934_v22  ;;  %v2069_v48 = vsel %vm936_vm8, %v6849_v4, %v7010_v27 }
 0x5b6   : > { %2656 = vrot.lane.b32.xlu1 %v7073_v37, %s4366_s16  ;;  %2326 = vmatpush.bf16.msra.mxu2 %v2095_v15 }
 0x5b7   : > { %2307 = vmatpush.bf16.msra.mxu1 %v2071_v13  ;;  %2728 = vrot.lane.b32.xlu0 %v7172_v17, %s4369_s10 }
 0x5b8   : > { %2732 = vrot.lane.b32.xlu2 %v7331_v20, %s4369_s10  ;;  %v7347_v10 = vpop.permute.xlu1 %2506  ;;  %v7352_v58 = vpop.permute.xlu0 %2574 }
 0x5b9   : > { %3885 = vmatmul.msk.bf16.gmra.mxu2 %vm1099_vm9, %v7336_v45 }
 0x5ba   : > { %v7359_v2 = vpop.permute.xlu2 %2634  ;;  %2327 = vmatpush.bf16.msra.mxu2 %v2092_v33 }
 0x5bb   : > { %2308 = vmatpush.bf16.msra.mxu1 %v2068_v32  ;;  %8928 = vst [vmem:[#allocation33_spill] sm:$0xff] %v7359_v2 }
 0x5be   : > { %2401 = vmatpush.bf16.msrb.mxu2 %v2099_v50  ;;  %2309 = vmatmul.bf16.vlgmr.msra.gmra.mxu1 %v7260_v56 }
 0x5bf   : > { %2377 = vmatpush.bf16.msrb.mxu1 %v2090_v62  ;;  %2662 = vrot.lane.b32.xlu1 %v7099_v6, %s4366_s16 }
 0x5c0   : > { %2740 = vrot.lane.b32.xlu0 %v7042_v46, %s4370_s17  ;;  %v7373_v38 = vpop.permute.xlu1 %2515  ;;  %v7378_v14 = vpop.permute.xlu0 %2583  ;;  %2744 = vrot.lane.b32.xlu2 %v7146_v7, %s4370_s17 }
 0x5c1   : > { %8929 = vst [vmem:[#allocation62_spill] sm:$0xff] %v7378_v14 }
 0x5c2   : > { %2402 = vmatpush.bf16.msrb.mxu2 %v2096_v31  ;;  %v7384_v57 = vpop.permute.xlu2 %2640 }
 0x5c3   : > { %2378 = vmatpush.bf16.msrb.mxu1 %v2087_v42  ;;  %8930 = vst [vmem:[#allocation66_spill] sm:$0xff] %v7384_v57 }
 0x5c6   : > { %2403 = vmatpush.bf16.msrb.mxu2 %v2093_v63 }
 0x5c7   : > { %2379 = vmatpush.bf16.msrb.mxu1 %v2084_v61  ;;  %2674 = vrot.lane.b32.xlu1 %v7068_v12, %s4367_s30 }
 0x5c8   : > { %2746 = vrot.lane.b32.xlu0 %v7389_v1, %s4370_s17  ;;  %v7398_v44 = vpop.permute.xlu1 %2521  ;;  %v7403_v53 = vpop.permute.xlu0 %2589  ;;  %2750 = vrot.lane.b32.xlu2 %v7172_v17, %s4370_s17 }
 0x5c9   : > { %8931 = vst [vmem:[#allocation67_spill] sm:$0xff] %v7398_v44  ;;  %3886 = vmatmul.msk.bf16.vlgmr.msra.gmra.mxu2 %vm1099_vm9, %v7287_v59 }
 0x5ca   : > { %8932 = vst [vmem:[#allocation75_spill] sm:$0xff] %v7403_v53  ;;  %v7409_v25 = vpop.permute.xlu2 %2652 }
 0x5cb   : > { %2380 = vmatpush.bf16.msrb.mxu1 %v2081_v41  ;;  %8933 = vst [vmem:[#allocation27_spill] sm:$0xff] %v7409_v25 }
 0x5ce   : > { %2314 = vmatmul.bf16.gmra.mxu1 %v7305_v49 }
 0x5cf   : > { %2381 = vmatpush.bf16.msrb.mxu1 %v2078_v43  ;;  %2680 = vrot.lane.b32.xlu1 %v7094_v52, %s4367_s30 }
 0x5d0   : > { %2752 = vrot.lane.b32.xlu0 %v7099_v6, %s4370_s17  ;;  %v7419_v34 = vpop.permute.xlu1 %2530  ;;  %v7424_v13 = vpop.permute.xlu0 %2630  ;;  %2762 = vrot.lane.b32.xlu2 %v7389_v1, %s4367_s30 }
 0x5d1   : > { %8935 = vst [vmem:[#allocation60_spill] sm:$0xff] %v7424_v13 }
 0x5d2   : > { %v7428_v39 = vpop.permute.xlu2 %2658 }
 0x5d3   : > { %2382 = vmatpush.bf16.msrb.mxu1 %v2075_v54  ;;  %8936 = vst [vmem:[#allocation73_spill] sm:$0xff] %v7428_v39 }
 0x5d7   : > { %2383 = vmatpush.bf16.msrb.mxu1 %v2072_v40  ;;  %2692 = vrot.lane.b32.xlu1 %v7042_v46, %s4368_s9  ;;  %v2215_v40 = vpop.f32.mrf.mxu0 }
 0x5d8   : > { %2764 = vrot.lane.b32.xlu0 %v7331_v20, %s4367_s30  ;;  %v7437_v8 = vpop.permute.xlu1 %2539  ;;  %v7439_v15 = vpop.permute.xlu0 %2636  ;;  %2770 = vrot.lane.b32.xlu2 %v7331_v20, %s4368_s9 }
 0x5d9   : > { %8937 = vst [vmem:[#allocation76_spill] sm:$0xff] %v7439_v15  ;;  %3887 = vmatmul.msk.bf16.gmra.mxu2 %vm1099_vm9, %v7336_v45 }
 0x5da   : > { %v7445_v32 = vpop.permute.xlu2 %2670 }
 0x5db   : > { %2384 = vmatpush.bf16.msrb.mxu1 %v2069_v48 }
 0x5de   : > { %2385 = vmatmul.bf16.vlgmr.msrb.gmra.mxu1 %v7260_v56 }
 0x5df   : > { %2698 = vrot.lane.b32.xlu1 %v7094_v52, %s4368_s9  ;;  %v2217_v17 = vpop.f32.mrf.mxu0 }
 0x5e0   : > { %v7450_v4 = vpop.permute.xlu1 %2552  ;;  %v7452_v27 = vpop.permute.xlu0 %2648 }
 0x5e1   : > { %8938 = vst [vmem:[#allocation65_spill] sm:$0xff] %v7452_v27 }
 0x5e2   : > { %v7454_v62 = vpop.permute.xlu2 %2676 }
 0x5e3   : > { %8939 = vst [vmem:[#allocation68_spill] sm:$0xff] %v7454_v62 }
 0x5e7   : > { %2718 = vrot.lane.b32.xlu1 %v7042_v46, %s4369_s10 }
 0x5e8   : > { %v7458_v33 = vpop.permute.xlu1 %2561  ;;  %v7460_v50 = vpop.permute.xlu0 %2654 }
 0x5e9   : > { %8940 = vst [vmem:[#allocation47_spill] sm:$0xff] %v7460_v50  ;;  %3888 = vmatmul.msk.bf16.vlgmr.msrb.gmra.mxu2 %vm1099_vm9, %v7287_v59 }
 0x5ea   : > { %v7464_v56 = vpop.permute.xlu2 %2682 }
 0x5ee   : > { %2390 = vmatmul.bf16.gmra.mxu1 %v7305_v49 }
 0x5ef   : > { %2724 = vrot.lane.b32.xlu1 %v7389_v1, %s4369_s10 }
 0x5f0   : > { %v7469_v42 = vpop.permute.xlu1 %2567  ;;  %v7471_v31 = vpop.permute.xlu0 %2660 }
 0x5f1   : > { %8941 = vst [vmem:[#allocation71_spill] sm:$0xff] %v7469_v42  ;;  %v7525_v42 = vpop.f32.mrf.mxu0 }
 0x5f2   : > { %8942 = vst [vmem:[#allocation61_spill] sm:$0xff] %v7471_v31  ;;  %v7473_v61 = vpop.permute.xlu2 %2694 }
 0x5f7   : > { %2730 = vrot.lane.b32.xlu1 %v7099_v6, %s4369_s10 }
 0x5f8   : > { %v7477_v35 = vpop.permute.xlu1 %2576  ;;  %v7479_v23 = vpop.permute.xlu0 %2672 }
 0x5f9   : > { %3889 = vmatmul.msk.bf16.gmra.mxu2 %vm1099_vm9, %v7336_v45  ;;  %v2196_v45 = vpop.f32.mrf.mxu3 }
 0x5fa   : > { %v7483_v59 = vpop.permute.xlu2 %2700 }
 0x5ff   : > { %2742 = vrot.lane.b32.xlu1 %v7068_v12, %s4370_s17 }
 0x600   : > { %v7487_v49 = vpop.permute.xlu1 %2585  ;;  %v7489_v63 = vpop.permute.xlu0 %2678 }
 0x601   : > { %8943 = vst [vmem:[#allocation58_spill] sm:$0xff] %v7487_v49  ;;  %v2198_v6 = vpop.f32.mrf.mxu3 }
 0x602   : > { %8944 = vst [vmem:[#allocation64_spill] sm:$0xff] %v7489_v63  ;;  %v7491_v41 = vpop.permute.xlu2 %2720 }
 0x603   : > { %8945 = vst [vmem:[#allocation74_spill] sm:$0xff] %v7491_v41 }
 0x607   : > { %2748 = vrot.lane.b32.xlu1 %v7094_v52, %s4370_s17  ;;  %v7538_v52 = vpop.f32.mrf.mxu0 }
 0x608   : > { %v7495_v43 = vpop.permute.xlu1 %2626  ;;  %v7497_v54 = vpop.permute.xlu0 %2684 }
 0x609   : > { %8946 = vst [vmem:[#allocation72_spill] sm:$0xff] %v7495_v43 }
 0x60a   : > { %8947 = vst [vmem:[#allocation70_spill] sm:$0xff] %v7497_v54  ;;  %v7499_v22 = vpop.permute.xlu2 %2726 }
 0x60b   : > { %8948 = vst [vmem:[#allocation46_spill] sm:$0xff] %v7499_v22  ;;  %v8967_v22 = vld [vmem:[#allocation30_spill] sm:$0xff] }
 0x60f   : > { %2754 = vrot.lane.b32.xlu1 %v7331_v20, %s4370_s17  ;;  %v2291_v26 = vpop.f32.mrf.mxu0 }
 0x610   : > { %v7503_v48 = vpop.permute.xlu1 %2632 }
 0x611   : > { %8949 = vst [vmem:[#allocation39_spill] sm:$0xff] %v7503_v48  ;;  %v7505_v7 = vpop.permute.xlu0 %2696  ;;  %v7521_v48 = vpop.f32.mrf.mxu3 }
 0x612   : > { %v7507_v53 = vpop.permute.xlu2 %2732 }
 0x613   : > { %8950 = vst [vmem:[#allocation35_spill] sm:$0xff] %v7507_v53 }
 0x617   : > { %2768 = vrot.lane.b32.xlu1 %v7389_v1, %s4368_s9 }
 0x618   : > { %v7511_v50 = vpop.permute.xlu1 %2638 }
 0x619   : > { %8951 = vst [vmem:[#allocation43_spill] sm:$0xff] %v7511_v50  ;;  %v7513_v12 = vpop.permute.xlu0 %2702  ;;  %v7535_v14 = vpop.f32.mrf.mxu3 }
 0x61a   : > { %v7515_v57 = vpop.permute.xlu2 %2744 }
 0x61b   : > { %8952 = vst [vmem:[#allocation22_spill] sm:$0xff] %v7515_v57  ;;  %v2234_v46 = vpop.f32.mrf.mxu1 }
 0x620   : > { %v7517_v20 = vpop.permute.xlu1 %2650 }
 0x621   : > { %8953 = vst [vmem:[#allocation40_spill] sm:$0xff] %v7517_v20  ;;  %v7519_v24 = vpop.permute.xlu0 %2722  ;;  %v2272_v50 = vpop.f32.mrf.mxu3 }
 0x622   : > { %v7523_v51 = vpop.permute.xlu2 %2750 }
 0x623   : > { %8954 = vst [vmem:[#allocation50_spill] sm:$0xff] %v7523_v51  ;;  %v2236_v53 = vpop.f32.mrf.mxu1  ;;  %v8965_v51 = vld [vmem:[#allocation41_spill] sm:$0xff] }
 0x628   : > { %v7527_v1 = vpop.permute.xlu1 %2656 }
 0x629   : > { %8955 = vst [vmem:[#allocation37_spill] sm:$0xff] %v7527_v1  ;;  %v7529_v43 = vpop.permute.xlu0 %2728  ;;  %v2274_v55 = vpop.f32.mrf.mxu3 }
 0x62a   : > { %v2763_v3 = vpop.permute.xlu2 %2762 }
 0x62b   : > { %v7531_v44 = vpop.f32.mrf.mxu1  ;;  %v2766_v57 = vsel %vm372_vm0, %v7454_v62, %v2763_v3 }
 0x62c   : > { %v2253_v49 = vpop.f32.mrf.mxu2  ;;  %2778 = vrot.lane.b32.xlu2 %v2766_v57, %s4368_s9 }
 0x631   : > { %v7540_v47 = vpop.permute.xlu1 %2662 }
 0x632   : > { %8956 = vst [vmem:[#allocation45_spill] sm:$0xff] %v7540_v47  ;;  %v7542_v36 = vpop.permute.xlu0 %2740 }
 0x633   : > { %v7544_v27 = vpop.f32.mrf.mxu1 }
 0x634   : > { %v2255_v37 = vpop.f32.mrf.mxu2 }
 0x639   : > { %v2675_v13 = vpop.permute.xlu1 %2674 }
 0x63a   : > { %v7546_v31 = vpop.permute.xlu0 %2746  ;;  %v7550_v3 = vsel %vm372_vm0, %v2675_v13, %v7454_v62  ;;  %v7554_v57 = vsel %vm372_vm0, %v7479_v23, %v2675_v13  ;;  %v7573_v62 = vsel %vm372_vm0, %v7464_v56, %v7497_v54 }
 0x63b   : > { %8957 = vst [vmem:[#allocation19_spill] sm:$0xff] %v7546_v31  ;;  %2776 = vrot.lane.b32.xlu1 %v7550_v3, %s4368_s9  ;;  %2774 = vrot.lane.b32.xlu0 %v7554_v57, %s4368_s9  ;;  %v2310_v47 = vpop.f32.mrf.mxu1  ;;  %v8961_v31 = vld [vmem:[#allocation25_spill] sm:$0xff] }
 0x63c   : > { %8958 = vst [vmem:[#allocation23_spill] sm:$0xff] %v7550_v3  ;;  %v2258_v63 = vpop.f32.mrf.mxu2  ;;  %v2197_v15 = vadd.f32 %v2196_v45, %v8961_v31  ;;  %v2293_v3 = vpop.f32.mrf.mxu0 }
 0x63d   : > { %8959 = vst [vmem:[#allocation42_spill] sm:$0xff] %v7554_v57 }
 0x63e   : > { %8963 = vst [vmem:[#allocation25_spill] sm:$0xff] %v7573_v62  ;;  %v2216_v45 = vadd.f32 %v2215_v40, %v2197_v15  ;;  %v7593_v15 = vsel %vm382_vm1, %v7473_v61, %v7505_v7 }
 0x640   : > { %v2235_v1 = vadd.f32 %v2234_v46, %v2216_v45  ;;  %v2277_v46 = vpop.f32.mrf.mxu3 }
 0x641   : > { %v7560_v2 = vpop.permute.xlu1 %2680 }
 0x642   : > { %8960 = vst [vmem:[#allocation36_spill] sm:$0xff] %v7560_v2  ;;  %v7563_v9 = vpop.permute.xlu0 %2752  ;;  %v7568_v13 = vsel %vm372_vm0, %v7560_v2, %v7464_v56  ;;  %v2273_v2 = vadd.f32 %v2272_v50, %v8961_v31  ;;  %v2254_v39 = vadd.f32 %v2253_v49, %v2235_v1  ;;  %v2199_v56 = vadd.f32 %v2198_v6, %v8965_v51 }
 0x643   : > { %8962 = vst [vmem:[#allocation54_spill] sm:$0xff] %v7568_v13  ;;  %2780 = vrot.lane.b32.xlu0 %v7568_v13, %s4368_s9  ;;  %2782 = vrot.lane.b32.xlu1 %v7573_v62, %s4368_s9  ;;  %v2312_v20 = vpop.f32.mrf.mxu1  ;;  %v2275_v62 = vadd.f32 %v2274_v55, %v8965_v51  ;;  %v7615_v55 = vsel %vm382_vm1, %v7483_v59, %v7513_v12 }
 0x644   : > { %v7579_v25 = vpop.f32.mrf.mxu2  ;;  %v2292_v0 = vadd.f32 %v2291_v26, %v2273_v2  ;;  %v2218_v6 = vadd.f32 %v2217_v17, %v2199_v56  ;;  %v2415_v26 = vmul.f32 0.2, %v2254_v39  ;;  %v2296_v49 = vpop.f32.mrf.mxu0 }
 0x645   : > { %v2294_v17 = vadd.f32 %v2293_v3, %v2275_v62 }
 0x646   : > { %v2311_v2 = vadd.f32 %v2310_v47, %v2292_v0  ;;  %v2237_v1 = vadd.f32 %v2236_v53, %v2218_v6 }
 0x647   : > { %v2313_v62 = vadd.f32 %v2312_v20, %v2294_v17  ;;  %v3977_v20 = vld [vmem:[%s8472_s3 + $0x48] sm:$0xff] }
 0x648   : > { %v2279_v3 = vpop.f32.mrf.mxu3 }
 0x649   : > { %v7582_v41 = vpop.permute.xlu1 %2692 }
 0x64a   : > { %8964 = vst [vmem:[#allocation78_spill] sm:$0xff] %v7582_v41  ;;  %v2765_v57 = vpop.permute.xlu0 %2764  ;;  %v7588_v13 = vsel %vm382_vm1, %v7582_v41, %v7473_v61  ;;  %v2427_v41 = vmax.f32 %v2254_v39, %v2415_v26  ;;  %v2278_v26 = vadd.f32 %v2277_v46, %v8967_v22 }
 0x64b   : > { %8966 = vst [vmem:[#allocation41_spill] sm:$0xff] %v7588_v13  ;;  %v2767_v50 = vsel %vm372_vm0, %v7497_v54, %v2765_v57  ;;  %2786 = vrot.lane.b32.xlu0 %v7588_v13, %s4368_s9  ;;  %2788 = vrot.lane.b32.xlu1 %v7593_v15, %s4368_s9  ;;  %v2315_v45 = vpop.f32.mrf.mxu1  ;;  %v2256_v57 = vadd.f32 %v2255_v37, %v2237_v1 }
 0x64c   : > { %2784 = vrot.lane.b32.xlu2 %v2767_v50, %s4368_s9  ;;  %v2329_v40 = vpop.f32.mrf.mxu2  ;;  %v2202_v13 = vadd.f32 %v7521_v48, %v8967_v22  ;;  %v2439_v53 = vsel %vm6256_vm11, %v2427_v41, 0.0  ;;  %v3976_v41 = vld [vmem:[%s8472_s3 + $0x40] sm:$0xff] }
 0x64d   : > { %v2330_v61 = vadd.f32 %v2329_v40, %v2311_v2  ;;  %v2418_v39 = vmul.f32 0.2, %v2256_v57 }
 0x64e   : > { %v2221_v37 = vadd.f32 %v7525_v42, %v2202_v13  ;;  %v2298_v13 = vpop.f32.mrf.mxu0 }
 0x64f   : > { %v2416_v54 = vmul.f32 0.2, %v2330_v61  ;;  %v2430_v2 = vmax.f32 %v2256_v57, %v2418_v39 }
 0x650   : > { %v2240_v6 = vadd.f32 %v7531_v44, %v2221_v37  ;;  %v2297_v37 = vadd.f32 %v2296_v49, %v2278_v26 }
 0x651   : > { %v7605_v60 = vpop.permute.xlu1 %2698  ;;  %v2428_v56 = vmax.f32 %v2330_v61, %v2416_v54  ;;  %v8970_v61 = vld [vmem:[#allocation49_spill] sm:$0xff]  ;;  %v2442_v57 = vsel %vm6256_vm11, %v2430_v2, 0.0 }
 0x652   : > { %v7610_v0 = vsel %vm382_vm1, %v7605_v60, %v7483_v59  ;;  %v2259_v40 = vadd.f32 %v2258_v63, %v2240_v6  ;;  %v2204_v17 = vadd.f32 %v7535_v14, %v8970_v61  ;;  %v2316_v39 = vadd.f32 %v2315_v45, %v2297_v37  ;;  %v2348_v6 = vpop.f32.mrf.mxu3  ;;  %v3979_v45 = vld [vmem:[%s8472_s3 + $0x58] sm:$0xff] }
 0x653   : > { %2792 = vrot.lane.b32.xlu0 %v7610_v0, %s4368_s9  ;;  %2794 = vrot.lane.b32.xlu1 %v7615_v55, %s4368_s9  ;;  %v2440_v48 = vsel %vm6260_vm12, %v2428_v56, 0.0  ;;  %v2317_v44 = vpop.f32.mrf.mxu1  ;;  %v2280_v49 = vadd.f32 %v2279_v3, %v8970_v61  ;;  %v8971_v3 = vld [vmem:[#allocation24_spill] sm:$0xff] }
 0x654   : > { %v2451_v50 = vpack.c.bf16 %v2440_v48, %v2439_v53  ;;  %v2331_v59 = vpop.f32.mrf.mxu2  ;;  %v2223_v63 = vadd.f32 %v7538_v52, %v2204_v17  ;;  %v2421_v53 = vmul.f32 0.2, %v2259_v40 }
 0x655   : > { %v2332_v42 = vadd.f32 %v2331_v59, %v2313_v62 }
 0x656   : > { %3890 = vst [vmem:[%s6278_s14 + $0x54] sm:$0xff] %v2451_v50  ;;  %v2242_v50 = vadd.f32 %v7544_v27, %v2223_v63  ;;  %v2433_v52 = vmax.f32 %v2259_v40, %v2421_v53  ;;  %v2367_v2 = vpop.f32.mrf.mxu0  ;;  %v2349_v53 = vadd.f32 %v2348_v6, %v8961_v31 }
 0x657   : > { %v2419_v1 = vmul.f32 0.2, %v2332_v42 }
 0x659   : > { %v7637_v56 = vpop.permute.xlu1 %2718  ;;  %v2431_v46 = vmax.f32 %v2332_v42, %v2419_v1  ;;  %v2261_v42 = vadd.f32 %v7579_v25, %v2242_v50  ;;  %v2445_v25 = vsel %vm6256_vm11, %v2433_v52, 0.0  ;;  %v2368_v50 = vadd.f32 %v2367_v2, %v2349_v53 }
 0x65b   : > { %2822 = vperm.xlu0 %4191, %v3976_v41   ;;  %2827 = vperm.xlu1 %4192, %v3977_v20   ;;  %v2443_v62 = vsel %vm6260_vm12, %v2431_v46, 0.0  ;;  %v2299_v41 = vadd.f32 %v2298_v13, %v2280_v49  ;;  %v2386_v17 = vpop.f32.mrf.mxu1  ;;  %v2424_v40 = vmul.f32 0.2, %v2261_v42  ;;  %v2580_v49 = vsel %vm422_vm6, %v7254_v16, %v7352_v58 }
 0x65c   : > { %v2453_v48 = vpack.c.bf16 %v2443_v62, %v2442_v57  ;;  %v2334_v14 = vpop.f32.mrf.mxu2  ;;  %v2387_v6 = vadd.f32 %v2386_v17, %v2368_v50  ;;  %v2558_v17 = vsel %vm398_vm4, %v7275_v11, %v7450_v4 }
 0x65d   : > { %v2335_v59 = vadd.f32 %v2334_v14, %v2316_v39  ;;  %v2318_v37 = vadd.f32 %v2317_v44, %v2299_v41  ;;  %v2436_v39 = vmax.f32 %v2261_v42, %v2424_v40 }
 0x65e   : > { %3892 = vst [vmem:[%s6278_s14 + $0x68] sm:$0xff] %v2453_v48  ;;  %v2350_v48 = vpop.f32.mrf.mxu3  ;;  %v2369_v52 = vpop.f32.mrf.mxu0 }
 0x65f   : > { %v2422_v26 = vmul.f32 0.2, %v2335_v59  ;;  %v2448_v31 = vsel %vm6256_vm11, %v2436_v39, 0.0  ;;  %v2351_v41 = vadd.f32 %v2350_v48, %v8965_v51 }
 0x661   : > { %v2725_v1 = vpop.permute.xlu1 %2724  ;;  %v2434_v20 = vmax.f32 %v2335_v59, %v2422_v26 }
 0x662   : > { %v7653_v27 = vsel %vm398_vm4, %v7519_v24, %v2725_v1 }
 0x663   : > { %2837 = vperm.xlu0 %4191, %v3979_v45   ;;  %2878 = vrot.lane.b32.xlu1 %v8971_v3, %s4374_s12  ;;  %v2446_v46 = vsel %vm6260_vm12, %v2434_v20, 0.0  ;;  %v2388_v26 = vpop.f32.mrf.mxu1 }
 0x664   : > { %v2455_v63 = vpack.c.bf16 %v2446_v46, %v2445_v25  ;;  %v2336_v13 = vpop.f32.mrf.mxu2  ;;  %v2370_v25 = vadd.f32 %v2369_v52, %v2351_v41  ;;  %v2543_v52 = vsel %vm382_vm1, %v7252_v28, %v7437_v8 }
 0x665   : > { %v2337_v57 = vadd.f32 %v2336_v13, %v2318_v37 }
 0x666   : > { %3894 = vst [vmem:[%s6278_s14 + $0x7c] sm:$0xff] %v2455_v63  ;;  %v2353_v37 = vpop.f32.mrf.mxu3  ;;  %v2389_v46 = vadd.f32 %v2388_v26, %v2370_v25  ;;  %v2372_v13 = vpop.f32.mrf.mxu0 }
 0x667   : > { %v2425_v62 = vmul.f32 0.2, %v2337_v57  ;;  %v2354_v48 = vadd.f32 %v2353_v37, %v8967_v22 }
 0x669   : > { %v7663_v14 = vpop.permute.xlu1 %2730  ;;  %v2437_v59 = vmax.f32 %v2337_v57, %v2425_v62 }
 0x66a   : > { %v7668_v44 = vsel %vm398_vm4, %v7529_v43, %v7663_v14 }
 0x66b   : > { %2936 = vrot.lane.b32.xlu0 %v2580_v49, %s4374_s12  ;;  %2926 = vrot.lane.b32.xlu1 %v7458_v33, %s4374_s12  ;;  %v2449_v42 = vsel %vm6260_vm12, %v2437_v59, 0.0  ;;  %v2391_v62 = vpop.f32.mrf.mxu1  ;;  %v2373_v49 = vadd.f32 %v2372_v13, %v2354_v48 }
 0x66c   : > { %v2457_v45 = vpack.c.bf16 %v2449_v42, %v2448_v31  ;;  %v2405_v2 = vpop.f32.mrf.mxu2  ;;  %v2534_v31 = vsel %vm372_vm0, %v7144_v19, %v7234_v18 }
 0x66d   : > { %v2406_v1 = vadd.f32 %v2405_v2, %v2387_v6  ;;  %v2392_v6 = vadd.f32 %v2391_v62, %v2373_v49 }
 0x66e   : > { %3896 = vst [vmem:[%s6278_s14 + $0x90] sm:$0xff] %v2457_v45  ;;  %v2355_v42 = vpop.f32.mrf.mxu3 }
 0x66f   : > { %v2417_v20 = vmul.f32 0.2, %v2406_v1  ;;  %v2356_v41 = vadd.f32 %v2355_v42, %v8970_v61 }
 0x671   : > { %v7682_v3 = vpop.permute.xlu1 %2742  ;;  %v2429_v40 = vmax.f32 %v2406_v1, %v2417_v20  ;;  %v2374_v1 = vpop.f32.mrf.mxu0 }
 0x673   : > { %2918 = vrot.lane.b32.xlu0 %v7275_v11, %s4374_s12  ;;  %2920 = vrot.lane.b32.xlu1 %v2558_v17, %s4374_s12  ;;  %v2441_v51 = vsel %vm6345_vm13, %v2429_v40, 0.0  ;;  %v2393_v25 = vpop.f32.mrf.mxu1  ;;  %v8973_v40 = vld [vmem:[#allocation56_spill] sm:$0xff] }
 0x674   : > { %v2452_v57 = vpack.c.bf16 %v2441_v51, %v2441_v51  ;;  %v2407_v53 = vpop.f32.mrf.mxu2  ;;  %v2524_v17 = vsel %vm360_vm3, %v8973_v40, %v7209_v21  ;;  %v2523_v37 = vsel %vm360_vm3, %v7373_v38, %v8973_v40  ;;  %v8976_v40 = vld [vmem:[#allocation46_spill] sm:$0xff] }
 0x675   : > { %v2408_v39 = vadd.f32 %v2407_v53, %v2389_v46  ;;  %v2375_v46 = vadd.f32 %v2374_v1, %v2356_v41 }
 0x676   : > { %3891 = vst [vmem:[%s6278_s14 + $0x5c] sm:$0xf] %v2452_v57 }
 0x677   : > { %v2420_v50 = vmul.f32 0.2, %v2408_v39  ;;  %v2394_v61 = vadd.f32 %v2393_v25, %v2375_v46  ;;  %v8978_v46 = vld [vmem:[#allocation44_spill] sm:$0xff] }
 0x679   : > { %v7694_v59 = vpop.permute.xlu1 %2748  ;;  %v2432_v11 = vmax.f32 %v2408_v39, %v2420_v50 }
 0x67b   : > { %2912 = vrot.lane.b32.xlu0 %v2543_v52, %s4374_s12  ;;  %2902 = vrot.lane.b32.xlu1 %v2534_v31, %s4374_s12  ;;  %v2444_v22 = vsel %vm6345_vm13, %v2432_v11, 0.0  ;;  %v8974_v11 = vld [vmem:[#allocation48_spill] sm:$0xff] }
 0x67c   : > { %v2454_v26 = vpack.c.bf16 %v2444_v22, %v2444_v22  ;;  %v2410_v45 = vpop.f32.mrf.mxu2  ;;  %v2513_v52 = vsel %vm348_vm2, %v7347_v10, %v8974_v11  ;;  %v2771_v22 = vpop.permute.xlu2 %2770 }
 0x67d   : > { %v2411_v2 = vadd.f32 %v2410_v45, %v2392_v6  ;;  %v2773_v42 = vsel %vm382_vm1, %v7513_v12, %v2771_v22  ;;  %v2581_v45 = vsel %vm422_vm6, %v7352_v58, %v7477_v35  ;;  %v2569_v58 = vsel %vm410_vm5, %v7458_v33, %v7236_v30 }
 0x67e   : > { %3893 = vst [vmem:[%s6278_s14 + $0x70] sm:$0xf] %v2454_v26  ;;  %v3978_v26 = vld [vmem:[%s8472_s3 + $0x50] sm:$0xff] }
 0x67f   : > { %v2423_v20 = vmul.f32 0.2, %v2411_v2 }
 0x681   : > { %v2755_v19 = vpop.permute.xlu1 %2754  ;;  %v2435_v51 = vmax.f32 %v2411_v2, %v2423_v20  ;;  %v2570_v2 = vsel %vm410_vm5, %v7236_v30, %v7320_v5  ;;  %v2535_v30 = vsel %vm372_vm0, %v7234_v18, %v7419_v34 }
 0x682   : > { %v7716_v13 = vsel %vm410_vm5, %v7563_v9, %v2755_v19 }
 0x683   : > { %2894 = vrot.lane.b32.xlu0 %v2523_v37, %s4374_s12  ;;  %2896 = vrot.lane.b32.xlu1 %v2524_v17, %s4374_s12  ;;  %v2447_v57 = vsel %vm6345_vm13, %v2435_v51, 0.0  ;;  %v2544_v51 = vsel %vm382_vm1, %v7437_v8, %v8978_v46  ;;  %v2756_v8 = vsel %vm410_vm5, %v7542_v36, %v7682_v3 }
 0x684   : > { %v2456_v53 = vpack.c.bf16 %v2447_v57, %v2447_v57  ;;  %v2412_v39 = vpop.f32.mrf.mxu2 }
 0x685   : > { %v2413_v62 = vadd.f32 %v2412_v39, %v2394_v61  ;;  %v8979_v61 = vld [vmem:[#allocation50_spill] sm:$0xff] }
 0x686   : > { %3895 = vst [vmem:[%s6278_s14 + $0x84] sm:$0xf] %v2456_v53  ;;  %v2759_v57 = vsel %vm410_vm5, %v7694_v59, %v8979_v61  ;;  %v8980_v53 = vld [vmem:[#allocation74_spill] sm:$0xff] }
 0x687   : > { %v2426_v38 = vmul.f32 0.2, %v2413_v62  ;;  %v2734_v39 = vsel %vm398_vm4, %v7637_v56, %v8980_v53 }
 0x689   : > { %v2769_v48 = vpop.permute.xlu1 %2768  ;;  %v2438_v50 = vmax.f32 %v2413_v62, %v2426_v38  ;;  %v7809_v62 = vpop.permute.xlu2 %2778 }
 0x68a   : > { %v2772_v49 = vsel %vm382_vm1, %v7505_v7, %v2769_v48  ;;  %v8982_v48 = vld [vmem:[#allocation37_spill] sm:$0xff] }
 0x68b   : > { %2888 = vrot.lane.b32.xlu0 %v2513_v52, %s4374_s12  ;;  %2790 = vrot.lane.b32.xlu2 %v2772_v49, %s4368_s9  ;;  %v2450_v31 = vsel %vm6345_vm13, %v2438_v50, 0.0  ;;  %v8983_v52 = vld [vmem:[#allocation27_spill] sm:$0xff] }
 0x68c   : > { %v2458_v6 = vpack.c.bf16 %v2450_v31, %v2450_v31  ;;  %v8984_v31 = vld [vmem:[#allocation40_spill] sm:$0xff] }
 0x68e   : > { %3897 = vst [vmem:[%s6278_s14 + $0x98] sm:$0xf] %v2458_v6  ;;  %v2665_v6 = vsel %vm360_vm3, %v8984_v31, %v8983_v52 }
 0x693   : > { %2880 = vrot.lane.b32.xlu0 %v6860_v29, %s4374_s12  ;;  %2796 = vrot.lane.b32.xlu2 %v2773_v42, %s4368_s9  ;;  %v2686_v29 = vsel %vm372_vm0, %v7445_v32, %v7479_v23  ;;  %s4112_s9 = smul.u32 240, %s4428_s22  ;;  %s3556_s22 = sshll.u32 %s6278_s14, 4  ;;  %s3557_s22 = int_to_ptr.vmem [resolvable:$true] %s3556_s22 }
 0x695   : > { %s3555_s6 = scalar_lea.hbm %s8474_s5, %s4112_s9 }
 0x696   : > { %s3558_s20 = sshll.u32 %s3555_s6, 4  ;;  %s3559_s20 = int_to_ptr.hbm [resolvable:$true] %s3558_s20 }
 0x697   : > { %s4298_s11 = sshra.s32 %s3559_s20, 4  ;;  %s4299_s11 = int_to_ptr.hbm [resolvable:$true] %s4298_s11 }
 0x698   : > { %s4300_s0 = scalar_lea.hbm %s4299_s11, 240  ;;  %p4305_p9 = scmp.lt.s32.totalorder %s4299_s11, %s8474_s5 }
 0x699   : > { %p4301_p1 = scmp.ne.s32.totalorder %s4299_s11, %s4300_s0  ;;  %p4306_p10 = scmp.lt.s32.totalorder %s4304_s28, %s4300_s0 }
 0x69b   : > { %2938 = vrot.lane.b32.xlu0 %v2581_v45, %s4374_s12  ;;  %2832 = vperm.xlu2 %4193, %v3978_v26   ;;  %v8985_v45 = vld [vmem:[#allocation41_spill] sm:$0xff]  ;;  %p4302_p4 = pnand %p4301_p1, %p4474_p7  ;;  %p4307_p11 = por %p4306_p10, %p4305_p9 }
 0x69d   : > { %p4303_p8 = pneg %p4302_p4 }
 0x69f   : > { %p4308_p2 = pnand %p4307_p11, %p4303_p8 }
 0x6a3   : > { %2930 = vrot.lane.b32.xlu0 %v2570_v2, %s4374_s12  ;;  %2934 = vrot.lane.b32.xlu2 %v7254_v16, %s4374_s12  ;;  %v8986_v2 = vld [vmem:[#allocation51_spill] sm:$0xff] }
 0x6a6   : > { %v7822_v49 = vpop.permute.xlu2 %2784 }
 0x6ab   : > { %2998 = vrot.lane.b32.xlu0 %v2686_v29, %s4374_s12  ;;  %2928 = vrot.lane.b32.xlu2 %v2569_v58, %s4374_s12  ;;  %v2559_v29 = vsel %vm398_vm4, %v7450_v4, %v8986_v2 }
 0x6ad   : > { %v7759_v1 = vpop.permute.xlu1 %2776  ;;  %v2775_v41 = vpop.permute.xlu0 %2774 }
 0x6ae   : > { %3062 = vrot.lane.b32.xlu1 %v2775_v41, %s4374_s12  ;;  %v2798_v17 = vsel %vm382_vm1, %v2775_v41, %v7759_v1 }
 0x6b3   : > { %3030 = vrot.lane.b32.xlu0 %v7637_v56, %s4374_s12  ;;  %2910 = vrot.lane.b32.xlu2 %v7252_v28, %s4374_s12  ;;  %v8975_v28 = vld [vmem:[#allocation57_spill] sm:$0xff] }
 0x6b4   : > { %v2512_v20 = vsel %vm348_vm2, %v8975_v28, %v7347_v10  ;;  %v8977_v10 = vld [vmem:[#allocation42_spill] sm:$0xff] }
 0x6b5   : > { %v7766_v16 = vpop.permute.xlu1 %2782  ;;  %v7768_v32 = vpop.permute.xlu0 %2780 }
 0x6b6   : > { %3054 = vrot.lane.b32.xlu1 %v7694_v59, %s4374_s12  ;;  %v8981_v59 = vld [vmem:[#allocation73_spill] sm:$0xff] }
 0x6b7   : > { %v2667_v50 = vsel %vm360_vm3, %v8982_v48, %v8981_v59  ;;  %v8993_v48 = vld [vmem:[#allocation60_spill] sm:$0xff] }
 0x6bb   : > { %2904 = vrot.lane.b32.xlu2 %v2535_v30, %s4374_s12  ;;  %v8987_v30 = vld [vmem:[#allocation76_spill] sm:$0xff] }
 0x6bd   : > { %v7776_v33 = vpop.permute.xlu1 %2788  ;;  %v2787_v23 = vpop.permute.xlu0 %2786 }
 0x6be   : > { %3046 = vrot.lane.b32.xlu1 %v7542_v36, %s4374_s12  ;;  %v2737_v36 = vsel %vm398_vm4, %v8976_v40, %v7529_v43  ;;  %v2802_v43 = vsel %vm382_vm1, %v2787_v23, %v7776_v33 }
 0x6c3   : > { %2886 = vrot.lane.b32.xlu2 %v2512_v20, %s4374_s12 }
 0x6c5   : > { %v7784_v25 = vpop.permute.xlu1 %2794  ;;  %v2793_v19 = vpop.permute.xlu0 %2792 }
 0x6c6   : > { %v2804_v18 = vsel %vm382_vm1, %v2793_v19, %v7784_v25  ;;  %3038 = vrot.lane.b32.xlu1 %v8976_v40, %s4374_s12 }
 0x6c7   : > { %3088 = vrot.lane.b32.xlu0 %v2804_v18, %s4374_s12  ;;  %v8989_v18 = vld [vmem:[#allocation16_spill] sm:$0xff] }
 0x6cb   : > { %3064 = vrot.lane.b32.xlu2 %v2798_v17, %s4374_s12  ;;  %v8990_v17 = vld [vmem:[#allocation36_spill] sm:$0xff] }
 0x6cd   : > { %v7794_v37 = vpop.permute.xlu0 %2822  ;;  %v7835_v22 = vpop.permute.xlu1 %2827 }
 0x6ce   : > { %3000 = vrot.lane.b32.xlu1 %v8977_v10, %s4374_s12  ;;  %v8991_v10 = vld [vmem:[#allocation64_spill] sm:$0xff] }
 0x6cf   : > { %2914 = vrot.lane.b32.xlu0 %v2544_v51, %s4374_s12  ;;  %v2689_v51 = vsel %vm372_vm0, %v8991_v10, %v8990_v17  ;;  %v8997_v17 = vld [vmem:[#allocation65_spill] sm:$0xff] }
 0x6d0   : > { %v2664_v10 = vsel %vm360_vm3, %v8997_v17, %v8984_v31  ;;  %v2800_v17 = vsel %vm382_vm1, %v7768_v32, %v7766_v16 }
 0x6d3   : > { %3056 = vrot.lane.b32.xlu2 %v2759_v57, %s4374_s12 }
 0x6d5   : > { %v7811_v38 = vpop.permute.xlu0 %2837  ;;  %v7857_v20 = vpop.permute.xlu1 %2878 }
 0x6d6   : > { %3032 = vrot.lane.b32.xlu1 %v2734_v39, %s4374_s12  ;;  %v8992_v39 = vld [vmem:[#allocation61_spill] sm:$0xff] }
 0x6d7   : > { %3078 = vrot.lane.b32.xlu0 %v2787_v23, %s4374_s12  ;;  %v2536_v23 = vsel %vm372_vm0, %v7419_v34, %v8989_v18 }
 0x6db   : > { %3048 = vrot.lane.b32.xlu2 %v2756_v8, %s4374_s12 }
 0x6dd   : > { %v7824_v56 = vpop.permute.xlu0 %2936  ;;  %v2927_v57 = vpop.permute.xlu1 %2926 }
 0x6de   : > { %2990 = vrot.lane.b32.xlu1 %v2667_v50, %s4374_s12  ;;  %v8994_v50 = vld [vmem:[#allocation69_spill] sm:$0xff] }
 0x6df   : > { %2984 = vrot.lane.b32.xlu0 %v2665_v6, %s4374_s12  ;;  %v2643_v6 = vsel %vm348_vm2, %v8994_v50, %v8993_v48 }
 0x6e3   : > { %3040 = vrot.lane.b32.xlu2 %v2737_v36, %s4374_s12 }
 0x6e5   : > { %v7837_v42 = vpop.permute.xlu2 %2790  ;;  %v2919_v26 = vpop.permute.xlu0 %2918 }
 0x6e6   : > { %3022 = vrot.lane.b32.xlu1 %v7605_v60, %s4374_s12  ;;  %v8988_v60 = vld [vmem:[#allocation33_spill] sm:$0xff] }
 0x6e7   : > { %3016 = vrot.lane.b32.xlu0 %v8985_v45, %s4374_s12  ;;  %v2645_v28 = vsel %vm348_vm2, %v8988_v60, %v8987_v30  ;;  %v7885_v45 = vpop.permute.xlu1 %2920 }
 0x6eb   : > { %2922 = vrot.lane.b32.xlu2 %v2559_v29, %s4374_s12  ;;  %v8995_v29 = vld [vmem:[#allocation43_spill] sm:$0xff] }
 0x6ed   : > { %v7849_v58 = vpop.permute.xlu2 %2796  ;;  %v7851_v41 = vpop.permute.xlu0 %2912 }
 0x6ee   : > { %3080 = vrot.lane.b32.xlu1 %v2802_v43, %s4374_s12  ;;  %v2646_v43 = vsel %vm348_vm2, %v8987_v30, %v8995_v29 }
 0x6ef   : > { %2974 = vrot.lane.b32.xlu0 %v2645_v28, %s4374_s12  ;;  %v8996_v28 = vld [vmem:[#allocation38_spill] sm:$0xff]  ;;  %v2903_v30 = vpop.permute.xlu1 %2902 }
 0x6f3   : > { %3086 = vrot.lane.b32.xlu2 %v2793_v19, %s4374_s12  ;;  %v2668_v19 = vsel %vm360_vm3, %v8981_v59, %v8992_v39 }
 0x6f5   : > { %v7861_v4 = vpop.permute.xlu2 %2832  ;;  %v2895_v40 = vpop.permute.xlu0 %2894 }
 0x6f6   : > { %2906 = vrot.lane.b32.xlu1 %v2536_v23, %s4374_s12 }
 0x6f7   : > { %3006 = vrot.lane.b32.xlu0 %v2689_v51, %s4374_s12 }
 0x6fb   : > { %2992 = vrot.lane.b32.xlu2 %v2668_v19, %s4374_s12  ;;  %v8998_v19 = vld [vmem:[#allocation54_spill] sm:$0xff] }
 0x6fd   : > { %v2935_v8 = vpop.permute.xlu2 %2934  ;;  %v7882_v36 = vpop.permute.xlu0 %2888 }
 0x6fe   : > { %v3115_v34 = vsel %vm936_vm8, %v2935_v8, %v7824_v56  ;;  %3070 = vrot.lane.b32.xlu1 %v7768_v32, %s4374_s12  ;;  %v3982_v32 = vld [vmem:[#allocation7 + $0x80] sm:$0xf] }
 0x6ff   : > { %2968 = vrot.lane.b32.xlu0 %v2643_v6, %s4374_s12  ;;  %3262 = vmatpush.bf16.msra.mxu3 %v3115_v34  ;;  %v9000_v6 = vld [vmem:[#allocation26_spill] sm:$0xff] }
 0x703   : > { %3024 = vrot.lane.b32.xlu2 %v7610_v0, %s4374_s12  ;;  %v3109_v0 = vsel %vm936_vm8, %v2919_v26, %v7885_v45  ;;  %v8999_v26 = vld [vmem:[#allocation78_spill] sm:$0xff] }
 0x705   : > { %v2929_v59 = vpop.permute.xlu2 %2928  ;;  %v7896_v23 = vpop.permute.xlu0 %2880 }
 0x706   : > { %2976 = vrot.lane.b32.xlu1 %v2646_v43, %s4374_s12  ;;  %v3112_v60 = vsel %vm936_vm8, %v2927_v57, %v2929_v59  ;;  %v2760_v57 = vsel %vm410_vm5, %v8979_v61, %v7563_v9  ;;  %v2514_v9 = vsel %vm348_vm2, %v8974_v11, %v9000_v6  ;;  %v9001_v61 = vld [vmem:[#allocation31_spill] sm:$0xff] }
 0x707   : > { %2958 = vrot.lane.b32.xlu0 %v8996_v28, %s4374_s12  ;;  %3263 = vmatpush.bf16.msra.mxu3 %v3112_v60  ;;  %v2582_v43 = vsel %vm422_vm6, %v7477_v35, %v9001_v61  ;;  %v7927_v28 = vpop.permute.xlu1 %2896  ;;  %v3094_v61 = vsel %vm936_vm8, %v7857_v20, %v7896_v23 }
 0x708   : > { %v3100_v11 = vsel %vm936_vm8, %v2895_v40, %v7927_v28  ;;  %v4092_v40 = vld [vmem:[#allocation7 + $0x8c] sm:$0xf0] }
 0x70b   : > { %2982 = vrot.lane.b32.xlu2 %v2664_v10, %s4374_s12  ;;  %3264 = vmatpush.bf16.msra.mxu3 %v3109_v0  ;;  %v9002_v0 = vld [vmem:[#allocation52_spill] sm:$0xff] }
 0x70d   : > { %v2911_v51 = vpop.permute.xlu2 %2910  ;;  %v7912_v31 = vpop.permute.xlu0 %2938 }
 0x70e   : > { %3008 = vrot.lane.b32.xlu1 %v8998_v19, %s4374_s12  ;;  %v3106_v8 = vsel %vm936_vm8, %v2911_v51, %v7851_v41  ;;  %v9004_v51 = vld [vmem:[#allocation62_spill] sm:$0xff] }
 0x70f   : > { %3058 = vrot.lane.b32.xlu0 %v2760_v57, %s4374_s12  ;;  %3265 = vmatpush.bf16.msra.mxu3 %v3106_v8 }
 0x713   : > { %3014 = vrot.lane.b32.xlu2 %v8999_v26, %s4374_s12  ;;  %v9005_v26 = vld [vmem:[#allocation67_spill] sm:$0xff] }
 0x715   : > { %v7916_v34 = vpop.permute.xlu2 %2904  ;;  %v7936_v10 = vpop.permute.xlu0 %2930 }
 0x716   : > { %2890 = vrot.lane.b32.xlu1 %v2514_v9, %s4374_s12  ;;  %v3103_v60 = vsel %vm936_vm8, %v2903_v30, %v7916_v34  ;;  %v9003_v30 = vld [vmem:[#allocation58_spill] sm:$0xff]  ;;  %v2525_v9 = vsel %vm360_vm3, %v7209_v21, %v9005_v26 }
 0x717   : > { %2940 = vrot.lane.b32.xlu0 %v2582_v43, %s4374_s12  ;;  %3266 = vmatpush.bf16.msra.mxu3 %v3103_v60  ;;  %v2591_v57 = vsel %vm434_vm7, %v9004_v51, %v9003_v30  ;;  %v7952_v43 = vor.u32 %v4092_v40, %v3982_v32  ;;  %v3116_v60 = vsel %vm936_vm8, %v7824_v56, %v7912_v31  ;;  %v9006_v21 = vld [vmem:[#allocation18_spill] sm:$0xff] }
 0x718   : > { %v3113_v56 = vsel %vm936_vm8, %v2929_v59, %v7936_v10  ;;  %v9009_v32 = vld [vmem:[#allocation22_spill] sm:$0xff] }
 0x719   : > { %v2757_v40 = vsel %vm410_vm5, %v7682_v3, %v9009_v32  ;;  %v2799_v3 = vsel %vm382_vm1, %v7759_v1, %v7809_v62 }
 0x71b   : > { %3072 = vrot.lane.b32.xlu2 %v2800_v17, %s4374_s12  ;;  %3267 = vmatpush.bf16.msra.mxu3 %v3100_v11 }
 0x71d   : > { %v2887_v35 = vpop.permute.xlu2 %2886  ;;  %v2999_v20 = vpop.permute.xlu0 %2998 }
 0x71e   : > { %2960 = vrot.lane.b32.xlu1 %v9002_v0, %s4374_s12  ;;  %v3097_v19 = vsel %vm936_vm8, %v2887_v35, %v7882_v36  ;;  %v9007_v35 = vld [vmem:[#allocation23_spill] sm:$0xff] }
 0x71f   : > { %2944 = vrot.lane.b32.xlu0 %v2591_v57, %s4374_s12  ;;  %3268 = vmatpush.bf16.msra.mxu3 %v3097_v19  ;;  %v9008_v57 = vld [vmem:[#allocation72_spill] sm:$0xff] }
 0x720   : > { %v3063_v8 = vpop.permute.xlu1 %3062  ;;  %v2642_v19 = vsel %vm348_vm2, %v9008_v57, %v8994_v50  ;;  %v3998_v50 = vld [vmem:[#allocation7 + $0xa0] sm:$0xf] }
 0x723   : > { %2898 = vrot.lane.b32.xlu2 %v2525_v9, %s4374_s12  ;;  %3269 = vmatpush.bf16.msra.mxu3 %v3094_v61  ;;  %v2805_v9 = vsel %vm382_vm1, %v7784_v25, %v7849_v58  ;;  %v4096_v61 = vld [vmem:[#allocation7 + $0xac] sm:$0xf0]  ;;  %v9010_v25 = vld [vmem:[#allocation71_spill] sm:$0xff] }
 0x725   : > { %v7958_v17 = vpop.permute.xlu2 %3064 }
 0x726   : > { %v3163_v11 = vsel %vm936_vm8, %v3063_v8, %v7958_v17  ;;  %2950 = vrot.lane.b32.xlu1 %v9006_v21, %s4374_s12  ;;  %3270 = vmatmul.bf16.vlgmr.msra.gmra.mxu3 %v7952_v43  ;;  %v7988_v21 = vor.u32 %v4096_v61, %v3998_v50 }
 0x727   : > { %3338 = vmatpush.bf16.msrb.mxu3 %v3116_v60  ;;  %3300 = vmatpush.bf16.msra.mxu1 %v3163_v11  ;;  %v3031_v11 = vpop.permute.xlu0 %3030 }
 0x728   : > { %3002 = vrot.lane.b32.xlu0 %v9007_v35, %s4374_s12  ;;  %v3055_v0 = vpop.permute.xlu1 %3054  ;;  %v2571_v35 = vsel %vm410_vm5, %v7320_v5, %v9010_v25  ;;  %v9012_v5 = vld [vmem:[#allocation29_spill] sm:$0xff] }
 0x72b   : > { %3339 = vmatpush.bf16.msrb.mxu3 %v3113_v56  ;;  %2966 = vrot.lane.b32.xlu2 %v2642_v19, %s4374_s12  ;;  %v9011_v19 = vld [vmem:[#allocation21_spill] sm:$0xff] }
 0x72d   : > { %v7976_v8 = vpop.permute.xlu2 %3056 }
 0x72e   : > { %3050 = vrot.lane.b32.xlu1 %v2757_v40, %s4374_s12  ;;  %v3160_v59 = vsel %vm936_vm8, %v3055_v0, %v7976_v8  ;;  %v2560_v40 = vsel %vm398_vm4, %v8986_v2, %v9012_v5  ;;  %v9013_v2 = vld [vmem:[#allocation53_spill] sm:$0xff] }
 0x72f   : > { %3301 = vmatpush.bf16.msra.mxu1 %v3160_v59 }
 0x730   : > { %3090 = vrot.lane.b32.xlu0 %v2805_v9, %s4374_s12  ;;  %v3047_v60 = vpop.permute.xlu1 %3046 }
 0x733   : > { %3066 = vrot.lane.b32.xlu2 %v2799_v3, %s4374_s12  ;;  %v9014_v3 = vld [vmem:[#allocation45_spill] sm:$0xff] }
 0x734   : > { %v2669_v25 = vsel %vm360_vm3, %v8992_v39, %v9014_v3 }
 0x735   : > { %v7994_v56 = vpop.permute.xlu2 %3048 }
 0x736   : > { %2932 = vrot.lane.b32.xlu1 %v2571_v35, %s4374_s12  ;;  %3275 = vmatmul.bf16.gmra.mxu3 %v7988_v21  ;;  %v3157_v0 = vsel %vm936_vm8, %v3047_v60, %v7994_v56 }
 0x737   : > { %3302 = vmatpush.bf16.msra.mxu1 %v3157_v0 }
 0x738   : > { %3026 = vrot.lane.b32.xlu0 %v7615_v55, %s4374_s12  ;;  %v3039_v1 = vpop.permute.xlu1 %3038 }
 0x739   : > { %v8002_v57 = vpop.permute.xlu0 %3088 }
 0x73b   : > { %2882 = vrot.lane.b32.xlu2 %v9011_v19, %s4374_s12 }
 0x73d   : > { %v8009_v9 = vpop.permute.xlu2 %3040 }
 0x73e   : > { %2924 = vrot.lane.b32.xlu1 %v2560_v40, %s4374_s12  ;;  %v3154_v59 = vsel %vm936_vm8, %v3039_v1, %v8009_v9 }
 0x73f   : > { %3303 = vmatpush.bf16.msra.mxu1 %v3154_v59 }
 0x740   : > { %2908 = vrot.lane.b32.xlu0 %v8989_v18, %s4374_s12  ;;  %v8016_v55 = vpop.permute.xlu1 %3000  ;;  %v9015_v18 = vld [vmem:[#allocation66_spill] sm:$0xff] }
 0x741   : > { %v3139_v50 = vsel %vm936_vm8, %v2999_v20, %v8016_v55  ;;  %v8020_v61 = vpop.permute.xlu0 %2914  ;;  %v2647_v35 = vsel %vm348_vm2, %v8995_v29, %v9015_v18 }
 0x742   : > { %3281 = vmatpush.bf16.msra.mxu0 %v3139_v50  ;;  %v3107_v39 = vsel %vm936_vm8, %v7851_v41, %v8020_v61  ;;  %v9017_v50 = vld [vmem:[#allocation59_spill] sm:$0xff] }
 0x743   : > { %2952 = vrot.lane.b32.xlu2 %v9013_v2, %s4374_s12 }
 0x745   : > { %v8024_v60 = vpop.permute.xlu2 %2922 }
 0x746   : > { %2994 = vrot.lane.b32.xlu1 %v2669_v25, %s4374_s12  ;;  %v3110_v20 = vsel %vm936_vm8, %v7885_v45, %v8024_v60  ;;  %v2803_v45 = vsel %vm382_vm1, %v7776_v33, %v7837_v42  ;;  %v2735_v25 = vsel %vm398_vm4, %v8980_v53, %v7519_v24 }
 0x747   : > { %3340 = vmatpush.bf16.msrb.mxu3 %v3110_v20 }
 0x748   : > { %2978 = vrot.lane.b32.xlu0 %v2647_v35, %s4374_s12  ;;  %v8037_v0 = vpop.permute.xlu1 %3032  ;;  %v9018_v35 = vld [vmem:[#allocation28_spill] sm:$0xff] }
 0x749   : > { %v3079_v1 = vpop.permute.xlu0 %3078  ;;  %v3151_v19 = vsel %vm936_vm8, %v3031_v11, %v8037_v0  ;;  %v9016_v11 = vld [vmem:[#allocation39_spill] sm:$0xff] }
 0x74a   : > { %3304 = vmatpush.bf16.msra.mxu1 %v3151_v19  ;;  %v2644_v40 = vsel %vm348_vm2, %v8993_v48, %v9016_v11 }
 0x74b   : > { %2942 = vrot.lane.b32.xlu2 %v9004_v51, %s4374_s12  ;;  %3341 = vmatpush.bf16.msrb.mxu3 %v3107_v39 }
 0x74d   : > { %v3087_v29 = vpop.permute.xlu2 %3086 }
 0x74e   : > { %v3172_v5 = vsel %vm936_vm8, %v3087_v29, %v8002_v57  ;;  %3082 = vrot.lane.b32.xlu1 %v2803_v45, %s4374_s12 }
 0x74f   : > { %3324 = vmatpush.bf16.msra.mxu2 %v3172_v5  ;;  %v9020_v5 = vld [vmem:[#allocation47_spill] sm:$0xff] }
 0x750   : > { %2970 = vrot.lane.b32.xlu0 %v2644_v40, %s4374_s12  ;;  %v2991_v41 = vpop.permute.xlu1 %2990  ;;  %v9021_v40 = vld [vmem:[#allocation55_spill] sm:$0xff] }
 0x751   : > { %v8056_v51 = vpop.permute.xlu0 %2984 }
 0x753   : > { %3042 = vrot.lane.b32.xlu2 %v7668_v44, %s4374_s12 }
 0x755   : > { %v8060_v33 = vpop.permute.xlu2 %2992 }
 0x756   : > { %3018 = vrot.lane.b32.xlu1 %v7593_v15, %s4374_s12  ;;  %v3136_v59 = vsel %vm936_vm8, %v2991_v41, %v8060_v33 }
 0x757   : > { %3282 = vmatpush.bf16.msra.mxu0 %v3136_v59 }
 0x758   : > { %2962 = vrot.lane.b32.xlu0 %v9017_v50, %s4374_s12  ;;  %v3023_v48 = vpop.permute.xlu1 %3022 }
 0x759   : > { %v8068_v2 = vpop.permute.xlu0 %3016 }
 0x75b   : > { %3034 = vrot.lane.b32.xlu2 %v2735_v25, %s4374_s12 }
 0x75d   : > { %v8074_v44 = vpop.permute.xlu2 %3024 }
 0x75e   : > { %2900 = vrot.lane.b32.xlu1 %v9005_v26, %s4374_s12  ;;  %v3148_v15 = vsel %vm936_vm8, %v3023_v48, %v8074_v44  ;;  %v9019_v26 = vld [vmem:[#allocation63_spill] sm:$0xff]  ;;  %v9022_v48 = vld [vmem:[#allocation68_spill] sm:$0xff] }
 0x75f   : > { %3305 = vmatpush.bf16.msra.mxu1 %v3148_v15  ;;  %v2592_v39 = vsel %vm434_vm7, %v9003_v30, %v9019_v26 }
 0x760   : > { %2954 = vrot.lane.b32.xlu0 %v9018_v35, %s4374_s12  ;;  %v8082_v20 = vpop.permute.xlu1 %3080 }
 0x761   : > { %v2975_v19 = vpop.permute.xlu0 %2974  ;;  %v3169_v24 = vsel %vm936_vm8, %v3079_v1, %v8082_v20 }
 0x762   : > { %3325 = vmatpush.bf16.msra.mxu2 %v3169_v24  ;;  %v9023_v24 = vld [vmem:[#allocation25_spill] sm:$0xff] }
 0x763   : > { %2916 = vrot.lane.b32.xlu2 %v8978_v46, %s4374_s12 }
 0x765   : > { %v2983_v53 = vpop.permute.xlu2 %2982 }
 0x766   : > { %2892 = vrot.lane.b32.xlu1 %v9000_v6, %s4374_s12  ;;  %v3133_v45 = vsel %vm936_vm8, %v2983_v53, %v8056_v51  ;;  %v2666_v6 = vsel %vm360_vm3, %v8983_v52, %v9020_v5  ;;  %v2801_v52 = vsel %vm382_vm1, %v7766_v16, %v7822_v49 }
 0x767   : > { %3283 = vmatpush.bf16.msra.mxu0 %v3133_v45 }
 0x768   : > { %2946 = vrot.lane.b32.xlu0 %v2592_v39, %s4374_s12  ;;  %v8096_v29 = vpop.permute.xlu1 %2906 }
 0x769   : > { %v3007_v1 = vpop.permute.xlu0 %3006  ;;  %v3104_v46 = vsel %vm936_vm8, %v7916_v34, %v8096_v29 }
 0x76a   : > { %3342 = vmatpush.bf16.msrb.mxu3 %v3104_v46  ;;  %v4091_v46 = vld [vmem:[#allocation7 + $0x8c] sm:$0xf] }
 0x76b   : > { %2986 = vrot.lane.b32.xlu2 %v2666_v6, %s4374_s12 }
 0x76d   : > { %v3015_v30 = vpop.permute.xlu2 %3014 }
 0x76e   : > { %2884 = vrot.lane.b32.xlu1 %v9021_v40, %s4374_s12  ;;  %v3145_v41 = vsel %vm936_vm8, %v3015_v30, %v8068_v2  ;;  %v4093_v40 = vld [vmem:[#allocation7 + $0x94] sm:$0xf0] }
 0x76f   : > { %3306 = vmatpush.bf16.msra.mxu1 %v3145_v41 }
 0x770   : > { %2988 = vrot.lane.b32.xlu0 %v9020_v5, %s4374_s12  ;;  %v3071_v59 = vpop.permute.xlu1 %3070  ;;  %v3992_v5 = vld [vmem:[#allocation7 + $0x98] sm:$0xf0] }
 0x771   : > { %v8111_v34 = vpop.permute.xlu0 %2968 }
 0x773   : > { %3074 = vrot.lane.b32.xlu2 %v2801_v52, %s4374_s12  ;;  %v9025_v52 = vld [vmem:[#allocation75_spill] sm:$0xff] }
 0x775   : > { %v8117_v50 = vpop.permute.xlu2 %3072 }
 0x776   : > { %3004 = vrot.lane.b32.xlu1 %v9022_v48, %s4374_s12  ;;  %v3166_v25 = vsel %vm936_vm8, %v3071_v59, %v8117_v50  ;;  %v2593_v48 = vsel %vm434_vm7, %v9019_v26, %v9025_v52  ;;  %v9026_v26 = vld [vmem:[#allocation19_spill] sm:$0xff] }
 0x777   : > { %3326 = vmatpush.bf16.msra.mxu2 %v3166_v25 }
 0x778   : > { %2980 = vrot.lane.b32.xlu0 %v9015_v18, %s4374_s12  ;;  %v8125_v15 = vpop.permute.xlu1 %2976 }
 0x779   : > { %v2959_v35 = vpop.permute.xlu0 %2958  ;;  %v3130_v16 = vsel %vm936_vm8, %v2975_v19, %v8125_v15 }
 0x77a   : > { %3284 = vmatpush.bf16.msra.mxu0 %v3130_v16 }
 0x77b   : > { %3010 = vrot.lane.b32.xlu2 %v9023_v24, %s4374_s12  ;;  %v2758_v24 = vsel %vm410_vm5, %v9009_v32, %v9026_v26 }
 0x77d   : > { %v8131_v53 = vpop.permute.xlu2 %2898 }
 0x77e   : > { %2996 = vrot.lane.b32.xlu1 %v9014_v3, %s4374_s12  ;;  %v3101_v18 = vsel %vm936_vm8, %v7927_v28, %v8131_v53 }
 0x77f   : > { %3343 = vmatpush.bf16.msrb.mxu3 %v3101_v18  ;;  %v4095_v18 = vld [vmem:[#allocation7 + $0xac] sm:$0xf] }
 0x780   : > { %2972 = vrot.lane.b32.xlu0 %v9016_v11, %s4374_s12  ;;  %v8140_v39 = vpop.permute.xlu1 %3008  ;;  %v9024_v11 = vld [vmem:[#allocation34_spill] sm:$0xff] }
 0x781   : > { %v8142_v19 = vpop.permute.xlu0 %3058  ;;  %v3142_v45 = vsel %vm936_vm8, %v3007_v1, %v8140_v39  ;;  %v8156_v1 = vor.u32 %v4091_v46, %v3992_v5 }
 0x782   : > { %3307 = vmatpush.bf16.msra.mxu1 %v3142_v45  ;;  %v4008_v45 = vld [vmem:[#allocation7 + $0xb8] sm:$0xf0] }
 0x783   : > { %3068 = vrot.lane.b32.xlu2 %v7809_v62, %s4374_s12  ;;  %4012 = vmatmul.msk.bf16.vlgmr.msra.gmra.mxu2 %vm1099_vm9, %v8156_v1 }
 0x785   : > { %v2967_v3 = vpop.permute.xlu2 %2966 }
 0x786   : > { %3036 = vrot.lane.b32.xlu1 %v7653_v27, %s4374_s12  ;;  %v3127_v28 = vsel %vm936_vm8, %v2967_v3, %v8111_v34  ;;  %v3990_v27 = vld [vmem:[#allocation7 + $0x88] sm:$0xf]  ;;  %v8201_v3 = vor.u32 %v4095_v18, %v4008_v45  ;;  %v4094_v45 = vld [vmem:[#allocation7 + $0xa4] sm:$0xf] }
 0x787   : > { %3285 = vmatpush.bf16.msra.mxu0 %v3127_v28  ;;  %v8165_v41 = vor.u32 %v4093_v40, %v3990_v27 }
 0x788   : > { %2964 = vrot.lane.b32.xlu0 %v9024_v11, %s4374_s12  ;;  %v8154_v6 = vpop.permute.xlu1 %2890  ;;  %v9027_v11 = vld [vmem:[#allocation35_spill] sm:$0xff] }
 0x789   : > { %v2941_v30 = vpop.permute.xlu0 %2940  ;;  %v3098_v62 = vsel %vm936_vm8, %v7882_v36, %v8154_v6  ;;  %3308 = vmatmul.bf16.vlgmr.msra.gmra.mxu1 %v8165_v41 }
 0x78a   : > { %3344 = vmatpush.bf16.msrb.mxu3 %v3098_v62  ;;  %v3117_v32 = vsel %vm936_vm8, %v7912_v31, %v2941_v30  ;;  %v4097_v31 = vld [vmem:[#allocation7 + $0xb4] sm:$0xf0]  ;;  %v9028_v30 = vld [vmem:[#allocation70_spill] sm:$0xff] }
 0x78b   : > { %3060 = vrot.lane.b32.xlu2 %v7716_v13, %s4374_s12 }
 0x78d   : > { %v8167_v59 = vpop.permute.xlu2 %3066 }
 0x78e   : > { %v3164_v36 = vsel %vm936_vm8, %v7958_v17, %v8167_v59  ;;  %3028 = vrot.lane.b32.xlu1 %v7513_v12, %s4374_s12  ;;  %v3161_v12 = vsel %vm936_vm8, %v7976_v8, %v8142_v19 }
 0x78f   : > { %3376 = vmatpush.bf16.msrb.mxu1 %v3164_v36  ;;  %v3984_v36 = vld [vmem:[#allocation7 + $0x90] sm:$0xf0] }
 0x790   : > { %2948 = vrot.lane.b32.xlu0 %v2593_v48, %s4374_s12  ;;  %v8179_v13 = vpop.permute.xlu1 %2960  ;;  %v4090_v48 = vld [vmem:[#allocation7 + $0x84] sm:$0xf] }
 0x791   : > { %v8181_v25 = vpop.permute.xlu0 %2944  ;;  %v3124_v16 = vsel %vm936_vm8, %v2959_v35, %v8179_v13 }
 0x792   : > { %3286 = vmatpush.bf16.msra.mxu0 %v3124_v16 }
 0x793   : > { %3052 = vrot.lane.b32.xlu2 %v2758_v24, %s4374_s12  ;;  %3377 = vmatpush.bf16.msrb.mxu1 %v3161_v12  ;;  %v8235_v24 = vor.u32 %v4090_v48, %v3984_v36 }
 0x794   : > { %4013 = vmatmul.msk.bf16.gmra.mxu2 %vm1099_vm9, %v8201_v3 }
 0x795   : > { %v8192_v17 = vpop.permute.xlu2 %2882 }
 0x796   : > { %3020 = vrot.lane.b32.xlu1 %v7505_v7, %s4374_s12  ;;  %v3095_v35 = vsel %vm936_vm8, %v7896_v23, %v8192_v17  ;;  %v2739_v7 = vsel %vm398_vm4, %v7663_v14, %v9027_v11  ;;  %v4006_v23 = vld [vmem:[#allocation7 + $0xa8] sm:$0xf] }
 0x797   : > { %3345 = vmatpush.bf16.msrb.mxu3 %v3095_v35  ;;  %v8212_v46 = vor.u32 %v4097_v31, %v4006_v23 }
 0x798   : > { %v2951_v8 = vpop.permute.xlu1 %2950 }
 0x799   : > { %3313 = vmatmul.bf16.gmra.mxu1 %v8212_v46 }
 0x79a   : > { %v8203_v28 = vpop.permute.xlu0 %3002  ;;  %3346 = vmatmul.bf16.vlgmr.msrb.gmra.mxu3 %v7952_v43 }
 0x79b   : > { %3414 = vmatpush.bf16.msra.mxu3 %v3117_v32  ;;  %3044 = vrot.lane.b32.xlu2 %v2739_v7, %s4374_s12 }
 0x79d   : > { %v8214_v5 = vpop.permute.xlu2 %2952 }
 0x79e   : > { %3012 = vrot.lane.b32.xlu1 %v9028_v30, %s4374_s12  ;;  %v3121_v62 = vsel %vm936_vm8, %v2951_v8, %v8214_v5  ;;  %v4000_v8 = vld [vmem:[#allocation7 + $0xb0] sm:$0xf0] }
 0x79f   : > { %3287 = vmatpush.bf16.msra.mxu0 %v3121_v62  ;;  %v8262_v7 = vor.u32 %v4094_v45, %v4000_v8 }
 0x7a0   : > { %v8221_v14 = vpop.permute.xlu1 %3050 }
 0x7a1   : > { %v3158_v40 = vsel %vm936_vm8, %v7994_v56, %v8221_v14  ;;  %v3140_v56 = vsel %vm936_vm8, %v8016_v55, %v8203_v28 }
 0x7a2   : > { %v8223_v27 = vpop.permute.xlu0 %3090  ;;  %3378 = vmatpush.bf16.msrb.mxu1 %v3158_v40 }
 0x7a3   : > { %v3173_v52 = vsel %vm936_vm8, %v8002_v57, %v8223_v27  ;;  %3092 = vrot.lane.b32.xlu2 %v7849_v58, %s4374_s12 }
 0x7a4   : > { %3400 = vmatpush.bf16.msrb.mxu2 %v3173_v52 }
 0x7a5   : > { %v2943_v16 = vpop.permute.xlu2 %2942 }
 0x7a6   : > { %v3118_v26 = vsel %vm936_vm8, %v2943_v16, %v8181_v25 }
 0x7a7   : > { %3288 = vmatpush.bf16.msra.mxu0 %v3118_v26 }
 0x7a8   : > { %v2933_v12 = vpop.permute.xlu1 %2932 }
 0x7a9   : > { %v3114_v58 = vsel %vm936_vm8, %v7936_v10, %v2933_v12 }
 0x7aa   : > { %v8240_v57 = vpop.permute.xlu0 %3026  ;;  %3289 = vmatmul.bf16.vlgmr.msra.gmra.mxu0 %v8235_v24  ;;  %3351 = vmatmul.bf16.gmra.mxu3 %v7988_v21 }
 0x7ab   : > { %3357 = vmatpush.bf16.msrb.mxu0 %v3140_v56  ;;  %3415 = vmatpush.bf16.msra.mxu3 %v3114_v58 }
 0x7ac   : > { %3084 = vrot.lane.b32.xlu2 %v7837_v42, %s4374_s12 }
 0x7ad   : > { %v8248_v35 = vpop.permute.xlu2 %3042 }
 0x7ae   : > { %v3155_v55 = vsel %vm936_vm8, %v8009_v9, %v8248_v35 }
 0x7af   : > { %3379 = vmatpush.bf16.msrb.mxu1 %v3155_v55 }
 0x7b0   : > { %v2925_v32 = vpop.permute.xlu1 %2924 }
 0x7b1   : > { %v3111_v10 = vsel %vm936_vm8, %v8024_v60, %v2925_v32 }
 0x7b2   : > { %v2909_v18 = vpop.permute.xlu0 %2908  ;;  %3416 = vmatpush.bf16.msra.mxu3 %v3111_v10 }
 0x7b3   : > { %v3105_v52 = vsel %vm936_vm8, %v8096_v29, %v2909_v18 }
 0x7b4   : > { %3076 = vrot.lane.b32.xlu2 %v7822_v49, %s4374_s12  ;;  %v9029_v49 = vld [vmem:[#allocation17_spill] sm:$0xff] }
 0x7b5   : > { %v8257_v11 = vpop.permute.xlu2 %3034 }
 0x7b6   : > { %v3152_v42 = vsel %vm936_vm8, %v8037_v0, %v8257_v11  ;;  %v3149_v0 = vsel %vm936_vm8, %v8074_v44, %v8240_v57 }
 0x7b7   : > { %3380 = vmatpush.bf16.msrb.mxu1 %v3152_v42 }
 0x7b8   : > { %v8264_v9 = vpop.permute.xlu1 %2994 }
 0x7b9   : > { %v3137_v60 = vsel %vm936_vm8, %v8060_v33, %v8264_v9 }
 0x7ba   : > { %v8266_v23 = vpop.permute.xlu0 %2978  ;;  %3294 = vmatmul.bf16.gmra.mxu0 %v8262_v7 }
 0x7bb   : > { %3358 = vmatpush.bf16.msrb.mxu0 %v3137_v60  ;;  %3381 = vmatpush.bf16.msrb.mxu1 %v3149_v0  ;;  %v3131_v29 = vsel %vm936_vm8, %v8125_v15, %v8266_v23 }
 0x7bc   : > { %2956 = vrot.lane.b32.xlu2 %v9029_v49, %s4374_s12 }
 0x7bd   : > { %v2917_v31 = vpop.permute.xlu2 %2916 }
 0x7be   : > { %v3108_v30 = vsel %vm936_vm8, %v8020_v61, %v2917_v31 }
 0x7bf   : > { %3417 = vmatpush.bf16.msra.mxu3 %v3108_v30 }
 0x7c0   : > { %v8279_v62 = vpop.permute.xlu1 %3082 }
 0x7c1   : > { %v3170_v33 = vsel %vm936_vm8, %v8082_v20, %v8279_v62 }
 0x7c2   : > { %v8281_v40 = vpop.permute.xlu0 %2970  ;;  %3401 = vmatpush.bf16.msrb.mxu2 %v3170_v33 }
 0x7c3   : > { %3418 = vmatpush.bf16.msra.mxu3 %v3105_v52 }
 0x7c5   : > { %v8288_v44 = vpop.permute.xlu2 %2986 }
 0x7c6   : > { %v3134_v61 = vsel %vm936_vm8, %v8056_v51, %v8288_v44  ;;  %v3128_v51 = vsel %vm936_vm8, %v8111_v34, %v8281_v40 }
 0x7c7   : > { %3359 = vmatpush.bf16.msrb.mxu0 %v3134_v61 }
 0x7c8   : > { %v8293_v48 = vpop.permute.xlu1 %3018 }
 0x7c9   : > { %v3146_v20 = vsel %vm936_vm8, %v8068_v2, %v8293_v48 }
 0x7ca   : > { %v8295_v36 = vpop.permute.xlu0 %2962  ;;  %3382 = vmatpush.bf16.msrb.mxu1 %v3146_v20 }
 0x7cb   : > { %3360 = vmatpush.bf16.msrb.mxu0 %v3131_v29  ;;  %v3125_v15 = vsel %vm936_vm8, %v8179_v13, %v8295_v36 }
 0x7cd   : > { %v8303_v16 = vpop.permute.xlu2 %3074 }
 0x7ce   : > { %v3167_v26 = vsel %vm936_vm8, %v8117_v50, %v8303_v16 }
 0x7cf   : > { %3361 = vmatpush.bf16.msrb.mxu0 %v3128_v51  ;;  %3402 = vmatpush.bf16.msrb.mxu2 %v3167_v26 }
 0x7d0   : > { %v2901_v56 = vpop.permute.xlu1 %2900 }
 0x7d1   : > { %v3102_v12 = vsel %vm936_vm8, %v8131_v53, %v2901_v56 }
 0x7d2   : > { %v8311_v2 = vpop.permute.xlu0 %2954  ;;  %3419 = vmatpush.bf16.msra.mxu3 %v3102_v12  ;;  %4014 = vmatmul.msk.bf16.vlgmr.msrb.gmra.mxu2 %vm1099_vm9, %v8156_v1 }
 0x7d3   : > { %3362 = vmatpush.bf16.msrb.mxu0 %v3125_v15  ;;  %v3122_v50 = vsel %vm936_vm8, %v8214_v5, %v8311_v2 }
 0x7d5   : > { %v8320_v34 = vpop.permute.xlu2 %3010 }
 0x7d6   : > { %v3143_v58 = vsel %vm936_vm8, %v8140_v39, %v8320_v34 }
 0x7d7   : > { %3363 = vmatpush.bf16.msrb.mxu0 %v3122_v50  ;;  %3383 = vmatpush.bf16.msrb.mxu1 %v3143_v58 }
 0x7d8   : > { %v2893_v53 = vpop.permute.xlu1 %2892 }
 0x7d9   : > { %v3099_v13 = vsel %vm936_vm8, %v8154_v6, %v2893_v53 }
 0x7da   : > { %v8328_v55 = vpop.permute.xlu0 %2946  ;;  %3420 = vmatpush.bf16.msra.mxu3 %v3099_v13  ;;  %3384 = vmatmul.bf16.vlgmr.msrb.gmra.mxu1 %v8165_v41 }
 0x7db   : > { %v3119_v32 = vsel %vm936_vm8, %v8181_v25, %v8328_v55 }
 0x7dc   : > { %3364 = vmatpush.bf16.msrb.mxu0 %v3119_v32 }
 0x7dd   : > { %v3069_v5 = vpop.permute.xlu2 %3068 }
 0x7de   : > { %v3165_v39 = vsel %vm936_vm8, %v8167_v59, %v3069_v5 }
 0x7df   : > { %3365 = vmatmul.bf16.vlgmr.msrb.gmra.mxu0 %v8235_v24  ;;  %3452 = vmatpush.bf16.msra.mxu1 %v3165_v39 }
 0x7e0   : > { %v2885_v18 = vpop.permute.xlu1 %2884 }
 0x7e1   : > { %v3096_v6 = vsel %vm936_vm8, %v8192_v17, %v2885_v18 }
 0x7e2   : > { %v2989_v10 = vpop.permute.xlu0 %2988  ;;  %3421 = vmatpush.bf16.msra.mxu3 %v3096_v6  ;;  %4015 = vmatmul.msk.bf16.gmra.mxu2 %vm1099_vm9, %v8201_v3 }
 0x7e3   : > { %v3135_v0 = vsel %vm936_vm8, %v8288_v44, %v2989_v10 }
 0x7e5   : > { %v3061_v25 = vpop.permute.xlu2 %3060  ;;  %3422 = vmatmul.bf16.vlgmr.msra.gmra.mxu3 %v7952_v43 }
 0x7e6   : > { %v3162_v45 = vsel %vm936_vm8, %v8142_v19, %v3061_v25 }
 0x7e7   : > { %3453 = vmatpush.bf16.msra.mxu1 %v3162_v45 }
 0x7e8   : > { %v3005_v59 = vpop.permute.xlu1 %3004 }
 0x7e9   : > { %v3141_v8 = vsel %vm936_vm8, %v8203_v28, %v3005_v59 }
 0x7ea   : > { %v2981_v42 = vpop.permute.xlu0 %2980  ;;  %3433 = vmatpush.bf16.msra.mxu0 %v3141_v8  ;;  %4098 = vmatpush.bf16.msrb.mxu3 %v3141_v8 }
 0x7eb   : > { %3389 = vmatmul.bf16.gmra.mxu1 %v8212_v46  ;;  %v3132_v30 = vsel %vm936_vm8, %v8266_v23, %v2981_v42 }
 0x7ed   : > { %v3053_v17 = vpop.permute.xlu2 %3052 }
 0x7ee   : > { %v3159_v60 = vsel %vm936_vm8, %v8221_v14, %v3053_v17 }
 0x7ef   : > { %3370 = vmatmul.bf16.gmra.mxu0 %v8262_v7  ;;  %3454 = vmatpush.bf16.msra.mxu1 %v3159_v60 }
 0x7f0   : > { %v2997_v43 = vpop.permute.xlu1 %2996 }
 0x7f1   : > { %v3138_v19 = vsel %vm936_vm8, %v8264_v9, %v2997_v43 }
 0x7f2   : > { %3434 = vmatpush.bf16.msra.mxu0 %v3138_v19  ;;  %4099 = vmatpush.bf16.msrb.mxu3 %v3138_v19  ;;  %v2973_v49 = vpop.permute.xlu0 %2972 }
 0x7f3   : > { %v3129_v33 = vsel %vm936_vm8, %v8281_v40, %v2973_v49 }
 0x7f5   : > { %v3045_v28 = vpop.permute.xlu2 %3044  ;;  %3427 = vmatmul.bf16.gmra.mxu3 %v7988_v21 }
 0x7f6   : > { %3435 = vmatpush.bf16.msra.mxu0 %v3135_v0  ;;  %4100 = vmatpush.bf16.msrb.mxu3 %v3135_v0  ;;  %v3156_v31 = vsel %vm936_vm8, %v8248_v35, %v3045_v28 }
 0x7f7   : > { %3455 = vmatpush.bf16.msra.mxu1 %v3156_v31 }
 0x7f8   : > { %v3037_v14 = vpop.permute.xlu1 %3036 }
 0x7f9   : > { %v3153_v9 = vsel %vm936_vm8, %v8257_v11, %v3037_v14 }
 0x7fa   : > { %3436 = vmatpush.bf16.msra.mxu0 %v3132_v30  ;;  %4101 = vmatpush.bf16.msrb.mxu3 %v3132_v30  ;;  %v2965_v52 = vpop.permute.xlu0 %2964 }
 0x7fb   : > { %3456 = vmatpush.bf16.msra.mxu1 %v3153_v9  ;;  %v3126_v23 = vsel %vm936_vm8, %v8295_v36, %v2965_v52 }
 0x7fd   : > { %v3093_v21 = vpop.permute.xlu2 %3092 }
 0x7fe   : > { %v3174_v44 = vsel %vm936_vm8, %v8223_v27, %v3093_v21  ;;  %3437 = vmatpush.bf16.msra.mxu0 %v3129_v33  ;;  %4102 = vmatpush.bf16.msrb.mxu3 %v3129_v33 }
 0x7ff   : > { %3476 = vmatpush.bf16.msra.mxu2 %v3174_v44 }
 0x800   : > { %v3029_v35 = vpop.permute.xlu1 %3028 }
 0x801   : > { %v3150_v11 = vsel %vm936_vm8, %v8240_v57, %v3029_v35 }
 0x802   : > { %3438 = vmatpush.bf16.msra.mxu0 %v3126_v23  ;;  %4103 = vmatpush.bf16.msrb.mxu3 %v3126_v23  ;;  %v2949_v26 = vpop.permute.xlu0 %2948 }
 0x803   : > { %3457 = vmatpush.bf16.msra.mxu1 %v3150_v11 }
 0x806   : > { %v3085_v61 = vpop.permute.xlu2 %3084  ;;  %v3328_v56 = vpop.f32.mrf.mxu2 }
 0x807   : > { %v3171_v40 = vsel %vm936_vm8, %v8279_v62, %v3085_v61 }
 0x808   : > { %3477 = vmatpush.bf16.msra.mxu2 %v3171_v40  ;;  %v3021_v20 = vpop.permute.xlu1 %3020 }
 0x809   : > { %v3147_v27 = vsel %vm936_vm8, %v8293_v48, %v3021_v20 }
 0x80a   : > { %3458 = vmatpush.bf16.msra.mxu1 %v3147_v27 }
 0x80e   : > { %v3077_v29 = vpop.permute.xlu2 %3076 }
 0x80f   : > { %v3168_v36 = vsel %vm936_vm8, %v8303_v16, %v3077_v29  ;;  %v3120_v16 = vsel %vm936_vm8, %v8328_v55, %v2949_v26 }
 0x810   : > { %3478 = vmatpush.bf16.msra.mxu2 %v3168_v36  ;;  %v3013_v51 = vpop.permute.xlu1 %3012 }
 0x811   : > { %v3144_v57 = vsel %vm936_vm8, %v8320_v34, %v3013_v51  ;;  %v3330_v34 = vpop.f32.mrf.mxu2 }
 0x812   : > { %3459 = vmatpush.bf16.msra.mxu1 %v3144_v57 }
 0x813   : > { %4016 = vmatmul.msk.bf16.vlgmr.msra.gmra.mxu2 %vm1099_vm9, %v8156_v1  ;;  %v3271_v1 = vpop.f32.mrf.mxu3 }
 0x814   : > { %v3272_v5 = vadd.f32 %v3271_v1, %v7794_v37 }
 0x815   : > { %3460 = vmatmul.bf16.vlgmr.msra.gmra.mxu1 %v8165_v41  ;;  %v3309_v41 = vpop.f32.mrf.mxu1 }
 0x816   : > { %v2957_v62 = vpop.permute.xlu2 %2956 }
 0x817   : > { %v3123_v48 = vsel %vm936_vm8, %v8311_v2, %v2957_v62 }
 0x818   : > { %3439 = vmatpush.bf16.msra.mxu0 %v3123_v48  ;;  %4104 = vmatpush.bf16.msrb.mxu3 %v3123_v48 }
 0x819   : > { %v3333_v55 = vpop.f32.mrf.mxu2 }
 0x81b   : > { %v3273_v2 = vpop.f32.mrf.mxu3 }
 0x81c   : > { %3440 = vmatpush.bf16.msra.mxu0 %v3120_v16  ;;  %4105 = vmatpush.bf16.msrb.mxu3 %v3120_v16  ;;  %v3274_v10 = vadd.f32 %v3273_v2, %v7835_v22 }
 0x81d   : > { %v3311_v15 = vpop.f32.mrf.mxu1 }
 0x81f   : > { %3441 = vmatmul.bf16.vlgmr.msra.gmra.mxu0 %v8235_v24  ;;  %3446 = vmatmul.bf16.vlgmr.msrb.gmra.mxu3 %v8262_v7 }
 0x821   : > { %v3335_v7 = vpop.f32.mrf.mxu2 }
 0x823   : > { %4017 = vmatmul.msk.bf16.gmra.mxu2 %vm1099_vm9, %v8201_v3  ;;  %v3276_v50 = vpop.f32.mrf.mxu3 }
 0x824   : > { %v3277_v0 = vadd.f32 %v3276_v50, %v7861_v4 }
 0x825   : > { %3465 = vmatmul.bf16.gmra.mxu1 %v8212_v46  ;;  %v3314_v53 = vpop.f32.mrf.mxu1 }
 0x827   : > { %v3290_v12 = vpop.f32.mrf.mxu0 }
 0x828   : > { %v3291_v39 = vadd.f32 %v3290_v12, %v3272_v5 }
 0x82a   : > { %v3310_v18 = vadd.f32 %v3309_v41, %v3291_v39 }
 0x82b   : > { %v3278_v13 = vpop.f32.mrf.mxu3 }
 0x82c   : > { %v3329_v8 = vadd.f32 %v3328_v56, %v3310_v18  ;;  %v3279_v51 = vadd.f32 %v3278_v13, %v7811_v38 }
 0x82d   : > { %v3316_v32 = vpop.f32.mrf.mxu1 }
 0x82e   : > { %v3490_v19 = vmul.f32 0.2, %v3329_v8 }
 0x82f   : > { %v3292_v58 = vpop.f32.mrf.mxu0 }
 0x830   : > { %v3293_v45 = vadd.f32 %v3292_v58, %v3274_v10  ;;  %v3502_v21 = vmax.f32 %v3329_v8, %v3490_v19 }
 0x832   : > { %v3312_v43 = vadd.f32 %v3311_v15, %v3293_v45  ;;  %v3514_v40 = vsel %vm6256_vm11, %v3502_v21, 0.0 }
 0x833   : > { %v3347_v3 = vpop.f32.mrf.mxu3 }
 0x834   : > { %v3348_v59 = vadd.f32 %v3347_v3, %v7794_v37  ;;  %v3331_v14 = vadd.f32 %v3330_v34, %v3312_v43 }
 0x836   : > { %v3493_v61 = vmul.f32 0.2, %v3331_v14 }
 0x837   : > { %v3295_v24 = vpop.f32.mrf.mxu0 }
 0x838   : > { %v3296_v33 = vadd.f32 %v3295_v24, %v3277_v0  ;;  %v3505_v62 = vmax.f32 %v3331_v14, %v3493_v61 }
 0x83a   : > { %v3315_v20 = vadd.f32 %v3314_v53, %v3296_v33  ;;  %v3517_v34 = vsel %vm6256_vm11, %v3505_v62, 0.0 }
 0x83b   : > { %v3349_v42 = vpop.f32.mrf.mxu3 }
 0x83c   : > { %v3350_v9 = vadd.f32 %v3349_v42, %v7835_v22  ;;  %v3334_v16 = vadd.f32 %v3333_v55, %v3315_v20 }
 0x83e   : > { %v3496_v50 = vmul.f32 0.2, %v3334_v16 }
 0x83f   : > { %v3297_v46 = vpop.f32.mrf.mxu0 }
 0x840   : > { %v3298_v1 = vadd.f32 %v3297_v46, %v3279_v51  ;;  %v3508_v39 = vmax.f32 %v3334_v16, %v3496_v50 }
 0x842   : > { %v3317_v58 = vadd.f32 %v3316_v32, %v3298_v1 }
 0x843   : > { %v3352_v11 = vpop.f32.mrf.mxu3 }
 0x844   : > { %v3353_v26 = vadd.f32 %v3352_v11, %v7861_v4  ;;  %v3336_v46 = vadd.f32 %v3335_v7, %v3317_v58 }
 0x846   : > { %v3499_v8 = vmul.f32 0.2, %v3336_v46 }
 0x848   : > { %v3511_v19 = vmax.f32 %v3336_v46, %v3499_v8 }
 0x84a   : > { %v3523_v0 = vsel %vm6256_vm11, %v3511_v19, 0.0 }
 0x84b   : > { %v3354_v24 = vpop.f32.mrf.mxu3 }
 0x84c   : > { %v3355_v55 = vadd.f32 %v3354_v24, %v7811_v38 }
 0x855   : > { %v3404_v25 = vpop.f32.mrf.mxu2 }
 0x857   : > { %v3385_v6 = vpop.f32.mrf.mxu1 }
 0x85c   : > { %v3366_v17 = vpop.f32.mrf.mxu0 }
 0x85d   : > { %v3367_v60 = vadd.f32 %v3366_v17, %v3348_v59  ;;  %v3406_v30 = vpop.f32.mrf.mxu2  ;;  %v3520_v59 = vsel %vm6256_vm11, %v3508_v39, 0.0 }
 0x85f   : > { %v3386_v49 = vadd.f32 %v3385_v6, %v3367_v60  ;;  %v3387_v28 = vpop.f32.mrf.mxu1 }
 0x861   : > { %v3405_v31 = vadd.f32 %v3404_v25, %v3386_v49 }
 0x863   : > { %v3491_v52 = vmul.f32 0.2, %v3405_v31 }
 0x864   : > { %v3368_v44 = vpop.f32.mrf.mxu0 }
 0x865   : > { %v3503_v35 = vmax.f32 %v3405_v31, %v3491_v52  ;;  %v3369_v23 = vadd.f32 %v3368_v44, %v3350_v9  ;;  %v3409_v2 = vpop.f32.mrf.mxu2 }
 0x867   : > { %v3515_v27 = vsel %vm6260_vm12, %v3503_v35, 0.0  ;;  %v3388_v29 = vadd.f32 %v3387_v28, %v3369_v23 }
 0x868   : > { %v3526_v36 = vpack.c.bf16 %v3515_v27, %v3514_v40  ;;  %v3390_v48 = vpop.f32.mrf.mxu1  ;;  %v3423_v49 = vpop.f32.mrf.mxu3 }
 0x869   : > { %v3407_v57 = vadd.f32 %v3406_v30, %v3388_v29  ;;  %v3424_v44 = vadd.f32 %v3423_v49, %v7794_v37 }
 0x86a   : > { %4018 = vst [vmem:[%s6278_s14 + $0xa4] sm:$0xff] %v3526_v36 }
 0x86b   : > { %v3494_v41 = vmul.f32 0.2, %v3407_v57 }
 0x86c   : > { %v3371_v56 = vpop.f32.mrf.mxu0 }
 0x86d   : > { %v3506_v12 = vmax.f32 %v3407_v57, %v3494_v41  ;;  %v3372_v15 = vadd.f32 %v3371_v56, %v3353_v26  ;;  %v3411_v32 = vpop.f32.mrf.mxu2 }
 0x86f   : > { %v3518_v53 = vsel %vm6260_vm12, %v3506_v12, 0.0  ;;  %v3391_v13 = vadd.f32 %v3390_v48, %v3372_v15 }
 0x870   : > { %v3528_v5 = vpack.c.bf16 %v3518_v53, %v3517_v34  ;;  %v3392_v6 = vpop.f32.mrf.mxu1  ;;  %v3425_v30 = vpop.f32.mrf.mxu3 }
 0x871   : > { %v3410_v3 = vadd.f32 %v3409_v2, %v3391_v13  ;;  %v3426_v54 = vadd.f32 %v3425_v30, %v7835_v22 }
 0x872   : > { %4020 = vst [vmem:[%s6278_s14 + $0xb8] sm:$0xff] %v3528_v5 }
 0x873   : > { %v3497_v18 = vmul.f32 0.2, %v3410_v3 }
 0x874   : > { %v3373_v10 = vpop.f32.mrf.mxu0 }
 0x875   : > { %v3509_v25 = vmax.f32 %v3410_v3, %v3497_v18  ;;  %v3374_v45 = vadd.f32 %v3373_v10, %v3355_v55 }
 0x877   : > { %v3521_v42 = vsel %vm6260_vm12, %v3509_v25, 0.0  ;;  %v3393_v17 = vadd.f32 %v3392_v6, %v3374_v45 }
 0x878   : > { %v3530_v60 = vpack.c.bf16 %v3521_v42, %v3520_v59  ;;  %v3428_v9 = vpop.f32.mrf.mxu3 }
 0x879   : > { %v3412_v43 = vadd.f32 %v3411_v32, %v3393_v17  ;;  %v3429_v47 = vadd.f32 %v3428_v9, %v7861_v4 }
 0x87a   : > { %4022 = vst [vmem:[%s6278_s14 + $0xcc] sm:$0xff] %v3530_v60 }
 0x87b   : > { %v3500_v7 = vmul.f32 0.2, %v3412_v43 }
 0x87d   : > { %v3512_v28 = vmax.f32 %v3412_v43, %v3500_v7 }
 0x87f   : > { %v3524_v31 = vsel %vm6260_vm12, %v3512_v28, 0.0 }
 0x880   : > { %v3532_v14 = vpack.c.bf16 %v3524_v31, %v3523_v0  ;;  %v3430_v52 = vpop.f32.mrf.mxu3 }
 0x881   : > { %v3431_v56 = vadd.f32 %v3430_v52, %v7811_v38 }
 0x882   : > { %4024 = vst [vmem:[%s6278_s14 + $0xe0] sm:$0xff] %v3532_v14 }
 0x892   : > { %v3461_v21 = vpop.f32.mrf.mxu1 }
 0x896   : > { %v3480_v33 = vpop.f32.mrf.mxu2 }
 0x89a   : > { %v3463_v35 = vpop.f32.mrf.mxu1 }
 0x89c   : > { %v3442_v23 = vpop.f32.mrf.mxu0 }
 0x89d   : > { %v3443_v11 = vadd.f32 %v3442_v23, %v3424_v44 }
 0x89e   : > { %v3482_v61 = vpop.f32.mrf.mxu2 }
 0x89f   : > { %v3462_v40 = vadd.f32 %v3461_v21, %v3443_v11 }
 0x8a1   : > { %v3481_v20 = vadd.f32 %v3480_v33, %v3462_v40 }
 0x8a2   : > { %v3447_v27 = vpop.f32.mrf.mxu3  ;;  %v3466_v51 = vpop.f32.mrf.mxu1 }
 0x8a3   : > { %v3492_v29 = vmul.f32 0.2, %v3481_v20  ;;  %v3448_v36 = vadd.f32 %v3447_v27, %v3429_v47 }
 0x8a4   : > { %v3444_v57 = vpop.f32.mrf.mxu0 }
 0x8a5   : > { %v3504_v62 = vmax.f32 %v3481_v20, %v3492_v29  ;;  %v3445_v48 = vadd.f32 %v3444_v57, %v3426_v54  ;;  %v3467_v37 = vadd.f32 %v3466_v51, %v3448_v36 }
 0x8a6   : > { %v3485_v26 = vpop.f32.mrf.mxu2 }
 0x8a7   : > { %v3516_v16 = vsel %vm6345_vm13, %v3504_v62, 0.0  ;;  %v3464_v1 = vadd.f32 %v3463_v35, %v3445_v48  ;;  %v3486_v41 = vadd.f32 %v3485_v26, %v3467_v37 }
 0x8a8   : > { %v3527_v4 = vpack.c.bf16 %v3516_v16, %v3516_v16 }
 0x8a9   : > { %v3483_v2 = vadd.f32 %v3482_v61, %v3464_v1  ;;  %v3498_v22 = vmul.f32 0.2, %v3486_v41 }
 0x8aa   : > { %4019 = vst [vmem:[%s6278_s14 + $0xac] sm:$0xf] %v3527_v4  ;;  %v3449_v12 = vpop.f32.mrf.mxu3  ;;  %v3468_v58 = vpop.f32.mrf.mxu1 }
 0x8ab   : > { %v3495_v15 = vmul.f32 0.2, %v3483_v2  ;;  %v3510_v34 = vmax.f32 %v3486_v41, %v3498_v22  ;;  %v3450_v50 = vadd.f32 %v3449_v12, %v3431_v56 }
 0x8ad   : > { %v3507_v53 = vmax.f32 %v3483_v2, %v3495_v15  ;;  %v3522_v13 = vsel %vm6345_vm13, %v3510_v34, 0.0  ;;  %v3469_v24 = vadd.f32 %v3468_v58, %v3450_v50 }
 0x8ae   : > { %v3531_v5 = vpack.c.bf16 %v3522_v13, %v3522_v13  ;;  %v3487_v38 = vpop.f32.mrf.mxu2 }
 0x8af   : > { %v3519_v3 = vsel %vm6345_vm13, %v3507_v53, 0.0  ;;  %v3488_v55 = vadd.f32 %v3487_v38, %v3469_v24 }
 0x8b0   : > { %v3529_v39 = vpack.c.bf16 %v3519_v3, %v3519_v3  ;;  %4023 = vst [vmem:[%s6278_s14 + $0xd4] sm:$0xf] %v3531_v5 }
 0x8b1   : > { %v3501_v46 = vmul.f32 0.2, %v3488_v55 }
 0x8b2   : > { %4021 = vst [vmem:[%s6278_s14 + $0xc0] sm:$0xf] %v3529_v39 }
 0x8b3   : > { %v3513_v18 = vmax.f32 %v3488_v55, %v3501_v46 }
 0x8b5   : > { %v3525_v10 = vsel %vm6345_vm13, %v3513_v18, 0.0 }
 0x8b6   : > { %v3533_v6 = vpack.c.bf16 %v3525_v10, %v3525_v10 }
 0x8b8   : > { %4025 = vst [vmem:[%s6278_s14 + $0xe8] sm:$0xf] %v3533_v6 }
 0x8b9   : > { %4311 = shalt.err (!%p4308_p2)
}
 0x8ba   : > { %s4375_s2 = smov 320   ;;  %s4376_s14 = smov 20  }
 0x8bb   : > { %4121 = dma.vmem_to_hbm [thread:$0]  (%p4474_p7), %s3557_s22, 3840, %s3559_s20, %s3544_s8, %s4375_s2, %s4375_s2, %s4376_s14  }
 0x8bc PF: > { %s3573_s24 = sand.u32 1, %s4346_s18   ;;  %p9030_p12 = scmp.ge.s32.totalorder %s4358_s21, 2 }
 0x8bd   : > { %s3574_s16 = scalar_lea.sflag [#allocation4], %s3573_s24 }
 0x8be   : > { %p4135_p13 = pnand %p9030_p12, %p4442_p6 }
 0x8c0   : > { %p4136_p0 = pneg %p4135_p13 }
 0x8c2   : > { %4341 = dma.done.wait (%p4136_p0), %s3574_s16, 3840  }
 0x8c3   : > { %4343 = vsyncadd (%p4136_p0), %s3574_s16, 4294963456  ;;  %s9031_s21 = sld [smem:[#allocation14_spill]]  ;;  %s9034_s18 = smov %s4350_s19 }
 0x8c4   : > { %s9032_s30 = sld [smem:[#allocation13_spill]] }
 0x8c5   : > { %s9033_s20 = sld [smem:[#allocation15_spill]] }
 0x8c9   : > { %p21_p3 = scmp.ge.s32.totalorder %s9031_s21, 4  }
 0x8ca   : > { %s9035_s19 = smov %s9032_s30 }
 0x8cb   :  { %23 = sbr.rel (!%p21_p3) target bundleno = 10 (0xa), region = 112 }
 0x8d0   :  { %3580 = vsyncpa [#allocation3], 1 }
 0x8d1   :  { %3582 = vsyncpa [#allocation3 + $0x1], 1 }
 0x8d2   :  { %3583 = vsyncpa [#allocation6], 1 }
 0x8d3   :  { %3585 = vsyncpa [#allocation6 + $0x1], 1 }
 0x8d4   :  { %3586 = vsyncpa [#allocation4], 1 }
 0x8d5   :  { %3588 = vsyncpa [#allocation4 + $0x1], 1 }

</bundles_post_ra>
